<compile_context>
chip_gen: v5e
topology: v5e:2x2
jax: 0.10.0
libtpu: 0.0.40
codegen_flags: <defaults>
</compile_context>

<pallas_src>
import numpy as np
import jax
import jax.numpy as jnp
from jax import lax
from jax.experimental import pallas as pl
from jax.experimental.pallas import tpu as pltpu

MAXDISP = 15  # maxdisp + 1 = 16 disparity planes (small synthetic setting)


# ----------------------------------------------------------------------------
# Compile-time interpolation tables
# ----------------------------------------------------------------------------
def linear_interp_matrix(n_out, n_in):
    # Row-stochastic 1-D linear interpolation matrix matching
    # F.interpolate(mode='trilinear', align_corners=False) along one axis
    # (half-pixel coords, negative-source clamp, right-edge index clamp).
    m = np.zeros((n_out, n_in), dtype=np.float32)
    if n_in == 1:
        m[:, 0] = 1.0
        return m
    scale = n_in / n_out
    for o in range(n_out):
        src = max((o + 0.5) * scale - 0.5, 0.0)
        i0 = min(int(np.floor(src)), n_in - 1)
        i1 = min(i0 + 1, n_in - 1)
        l1 = src - i0
        m[o, i0] += 1.0 - l1
        m[o, i1] += l1
    return m


def depth_tap_tables(n_out, n_in):
    # Uniform 2-tap (index, weight) tables for the depth axis; at most two
    # input depths contribute to each output depth for linear interpolation.
    md = linear_interp_matrix(n_out, n_in)
    idx = np.zeros((n_out, 2), np.int32)
    wgt = np.zeros((n_out, 2), np.float32)
    for o in range(n_out):
        nz = np.nonzero(md[o])[0]
        if len(nz) == 1:
            idx[o] = (nz[0], nz[0])
            wgt[o] = (md[o, nz[0]], 0.0)
        else:
            idx[o] = (nz[0], nz[1])
            wgt[o] = (md[o, nz[0]], md[o, nz[1]])
    return idx, wgt


# ----------------------------------------------------------------------------
# Kernel
# ----------------------------------------------------------------------------
def make_disp_kernel(B, Din, Dout, Hout, Wout):
    BH = B * Hout                           # rows per input-depth plane slice
    unroll = max(u for u in (8, 4, 2, 1) if Dout % u == 0)
    hp = lax.Precision.HIGHEST              # f32 parity with the PyTorch module

    def kernel(x_ref, mwt_ref, mhbd_ref, tapi_ref, tapw_ref, o_ref, planes_ref):
        # x_ref     : [B*Din*Hin, Win]   rows ordered (b, d, h_in)
        # mwt_ref   : [Win, Wout]        W interpolation matrix, pre-transposed
        # mhbd_ref  : [Din*B*Hout, B*Din*Hin]  fused block H-interp matrix
        # tapi_ref  : [Dout, 2] int32    depth taps (SMEM)
        # tapw_ref  : [Dout, 2] float32  depth tap weights (SMEM)
        # o_ref     : [B*Hout, Wout]     rows ordered (b, h_out)
        # planes_ref: [Din*B*Hout, Wout] VMEM scratch, rows ordered (d, b, h_out)

        # --- W interpolation: ONE MXU matmul covering all (b, d, h) rows -----
        t1 = jnp.dot(x_ref[...], mwt_ref[...],
                     preferred_element_type=jnp.float32, precision=hp)

        # --- H interpolation: ONE fused MXU matmul (block matrix).  Result is
        #     parked in VMEM scratch so only small slices are ever live. ------
        planes_ref[...] = jnp.dot(mhbd_ref[...], t1,
                                  preferred_element_type=jnp.float32,
                                  precision=hp)

        def y_at(dd):
            # 2-tap depth interpolation recomputed on demand (review item:
            # never hold all Dout planes live).  Plane slices are sublane
            # aligned (BH = B*Hout is a multiple of 8).
            i0 = tapi_ref[dd, 0]
            i1 = tapi_ref[dd, 1]
            w0 = tapw_ref[dd, 0]
            w1 = tapw_ref[dd, 1]
            p0 = planes_ref[pl.ds(pl.multiple_of(i0 * BH, 8), BH), :]
            p1 = planes_ref[pl.ds(pl.multiple_of(i1 * BH, 8), BH), :]
            return w0 * p0 + w1 * p1

        # --- pass 1: per-pixel running min over depth (VPU only) -------------
        def min_body(step, mn):
            for j in range(unroll):                       # short static window
                mn = jnp.minimum(mn, y_at(step * unroll + j))
            return mn

        mn = lax.fori_loop(0, Dout // unroll, min_body,
                           jnp.full((BH, Wout), jnp.inf, dtype=jnp.float32))

        # --- pass 2: softmin + disparity regression, fused --------------------
        # softmin(y) = softmax(-y); stabilized with the per-pixel min of y.
        def acc_body(step, carry):
            den, num = carry
            for j in range(unroll):
                dd = step * unroll + j
                e = jnp.exp(mn - y_at(dd))                # EUP
                den = den + e
                num = num + dd.astype(jnp.float32) * e    # disparity-weighted
            return den, num

        den, num = lax.fori_loop(
            0, Dout // unroll, acc_body,
            (jnp.zeros((BH, Wout), jnp.float32),
             jnp.zeros((BH, Wout), jnp.float32)))

        # Exact divide: approx EUP reciprocal costs ~4e-3 relative error on the
        # regressed disparity, which broke parity with the f32 reference.
        o_ref[...] = num / den

    return kernel


# ----------------------------------------------------------------------------
# Wrapper
# ----------------------------------------------------------------------------
def disp_forward(x5, maxdisp=MAXDISP):
    B, C, Din, Hin, Win = x5.shape
    assert C == 1, "Disp expects a single-channel 5-D cost volume"
    Dout = maxdisp + 1
    Hout, Wout = 4 * Hin, 4 * Win

    mh = linear_interp_matrix(Hout, Hin)                   # [Hout, Hin]
    mwt = jnp.asarray(linear_interp_matrix(Wout, Win).T)   # [Win, Wout]

    # Fused H-interp block matrix: rows ordered (d, b, h_out) so both batches
    # of a given input depth are contiguous for the depth-tap slices; columns
    # ordered (b, d, h_in) to match the natural x layout.  Compile-time const.
    mh_bd = np.zeros((Din * B * Hout, B * Din * Hin), np.float32)
    for b in range(B):
        for d in range(Din):
            r0 = (d * B + b) * Hout
            c0 = (b * Din + d) * Hin
            mh_bd[r0:r0 + Hout, c0:c0 + Hin] = mh
    mh_bd = jnp.asarray(mh_bd)

    tap_idx_np, tap_wgt_np = depth_tap_tables(Dout, Din)
    tap_idx = jnp.asarray(tap_idx_np)                      # [Dout, 2] int32
    tap_wgt = jnp.asarray(tap_wgt_np)                      # [Dout, 2] float32

    # [B, 1, D, H, W] -> [B*Din*Hin, Win]: lane axis = W, batch folded into M.
    x2 = x5[:, 0].reshape(B * Din * Hin, Win).astype(jnp.float32)

    kernel = make_disp_kernel(B, Din, Dout, Hout, Wout)

    out = pl.pallas_call(
        kernel,
        out_shape=jax.ShapeDtypeStruct((B * Hout, Wout), jnp.float32),
        in_specs=[
            pl.BlockSpec(memory_space=pltpu.MemorySpace.VMEM),   # x2
            pl.BlockSpec(memory_space=pltpu.MemorySpace.VMEM),   # mwt
            pl.BlockSpec(memory_space=pltpu.MemorySpace.VMEM),   # mh_bd
            pl.BlockSpec(memory_space=pltpu.MemorySpace.SMEM),   # tap_idx
            pl.BlockSpec(memory_space=pltpu.MemorySpace.SMEM),   # tap_wgt
        ],
        out_specs=pl.BlockSpec(memory_space=pltpu.MemorySpace.VMEM),
        scratch_shapes=[pltpu.VMEM((Din * B * Hout, Wout), jnp.float32)],
    )(x2, mwt, mh_bd, tap_idx, tap_wgt)

    return out.reshape(B, Hout, Wout)


# ----------------------------------------------------------------------------
# Pure-JAX reference with identical semantics (validation only)
# ----------------------------------------------------------------------------
def disp_reference(x5, maxdisp=MAXDISP):
    B, C, Din, Hin, Win = x5.shape
    Dout = maxdisp + 1
    Hout, Wout = 4 * Hin, 4 * Win
    hp = lax.Precision.HIGHEST
    md = jnp.asarray(linear_interp_matrix(Dout, Din))
    mh = jnp.asarray(linear_interp_matrix(Hout, Hin))
    mw = jnp.asarray(linear_interp_matrix(Wout, Win))
    x = x5[:, 0].astype(jnp.float32)
    y = jnp.einsum('Dd,bdhw->bDhw', md, x, precision=hp)
    y = jnp.einsum('Hh,bDhw->bDHw', mh, y, precision=hp)
    y = jnp.einsum('Ww,bDHw->bDHW', mw, y, precision=hp)
    p = jax.nn.softmax(-y, axis=1)                         # Softmin(dim=1)
    d = jnp.arange(Dout, dtype=jnp.float32)
    return jnp.einsum('bDHW,D->bHW', p, d, precision=hp)   # disparity regression


if __name__ == "__main__":
    key = jax.random.PRNGKey(0)
    # small cost volume: [B=2, C=1, D=6, H=8, W=8] -> output [2, 32, 32]
    x5 = jax.random.normal(key, (2, 1, 6, 8, 8), dtype=jnp.float32)

    out = jax.block_until_ready(disp_forward(x5, MAXDISP))
    ref = jax.block_until_ready(disp_reference(x5, MAXDISP))

    assert out.shape == (2, 4 * 8, 4 * 8), out.shape
    # Exact divide + HIGHEST-precision matmuls -> tight f32 parity.
    np.testing.assert_allclose(np.asarray(out), np.asarray(ref),
                               rtol=1e-3, atol=1e-3)

    print("KERNEL_OK")
</pallas_src>

<mosaic_0001>
module attributes {stable_mosaic.version = 11 : i64} {
  func.func @kernel(%arg0: memref<96x8xf32, #tpu.memory_space<vmem>>, %arg1: memref<8x32xf32, #tpu.memory_space<vmem>>, %arg2: memref<384x96xf32, #tpu.memory_space<vmem>>, %arg3: memref<16x2xi32, #tpu.memory_space<smem>>, %arg4: memref<16x2xf32, #tpu.memory_space<smem>>, %arg5: memref<64x32xf32, #tpu.memory_space<vmem>>, %arg6: memref<384x32xf32, #tpu.memory_space<vmem>>) attributes {dimension_semantics = [], scalar_prefetch = 0 : i64, scratch_operands = 1 : i64, tpu.core_type = #tpu.core_type<tc>} {
    %c0 = arith.constant 0 : index
    %c0_0 = arith.constant 0 : index
    %0 = vector.load %arg0[%c0, %c0_0] : memref<96x8xf32, #tpu.memory_space<vmem>>, vector<96x8xf32>
    %c0_1 = arith.constant 0 : index
    %c0_2 = arith.constant 0 : index
    %1 = vector.load %arg1[%c0_1, %c0_2] : memref<8x32xf32, #tpu.memory_space<vmem>>, vector<8x32xf32>
    %cst = arith.constant dense<0.000000e+00> : vector<96x32xf32>
    %2 = tpu.matmul %0, %1, %cst {dimension_numbers = #tpu.dot_dimension_numbers<[1], [0], [0], [1], [0, 0, 1, 1], [], []>, precision = #tpu.contract_precision<fp32>} : vector<96x8xf32>, vector<8x32xf32>, vector<96x32xf32> -> vector<96x32xf32>
    %c0_3 = arith.constant 0 : index
    %c0_4 = arith.constant 0 : index
    %3 = vector.load %arg2[%c0_3, %c0_4] : memref<384x96xf32, #tpu.memory_space<vmem>>, vector<384x96xf32>
    %cst_5 = arith.constant dense<0.000000e+00> : vector<384x32xf32>
    %4 = tpu.matmul %3, %2, %cst_5 {dimension_numbers = #tpu.dot_dimension_numbers<[1], [0], [0], [1], [0, 0, 1, 1], [], []>, precision = #tpu.contract_precision<fp32>} : vector<384x96xf32>, vector<96x32xf32>, vector<384x32xf32> -> vector<384x32xf32>
    %c0_6 = arith.constant 0 : index
    %c0_7 = arith.constant 0 : index
    %5 = vector.load %arg6[%c0_6, %c0_7] : memref<384x32xf32, #tpu.memory_space<vmem>>, vector<384x32xf32>
    tpu.vector_store %arg6[%c0_6, %c0_7], %4 {strides = array<i32>} : memref<384x32xf32, #tpu.memory_space<vmem>>, vector<384x32xf32>,
    %cst_8 = arith.constant 0x7F800000 : f32
    %6 = vector.broadcast %cst_8 : f32 to vector<64x32xf32>
    %c0_i32 = arith.constant 0 : i32
    %c2_i32 = arith.constant 2 : i32
    %7 = arith.addi %c0_i32, %c2_i32 : i32
    %c1_i32 = arith.constant 1 : i32
    %8 = scf.for %arg7 = %c0_i32 to %7 step %c1_i32 iter_args(%arg8 = %6) -> (vector<64x32xf32>)  : i32 {
      %c8_i32 = arith.constant 8 : i32
      %15 = arith.muli %arg7, %c8_i32 : i32
      %c0_i32_18 = arith.constant 0 : i32
      %16 = arith.addi %15, %c0_i32_18 : i32
      %17 = arith.index_cast %16 : i32 to index
      %c0_19 = arith.constant 0 : index
      %18 = memref.load %arg3[%17, %c0_19] : memref<16x2xi32, #tpu.memory_space<smem>>
      %19 = arith.index_cast %16 : i32 to index
      %c1 = arith.constant 1 : index
      %20 = memref.load %arg3[%19, %c1] : memref<16x2xi32, #tpu.memory_space<smem>>
      %21 = arith.index_cast %16 : i32 to index
      %c0_20 = arith.constant 0 : index
      %22 = memref.load %arg4[%21, %c0_20] : memref<16x2xf32, #tpu.memory_space<smem>>
      %23 = arith.index_cast %16 : i32 to index
      %c1_21 = arith.constant 1 : index
      %24 = memref.load %arg4[%23, %c1_21] : memref<16x2xf32, #tpu.memory_space<smem>>
      %c64_i32 = arith.constant 64 : i32
      %25 = arith.muli %18, %c64_i32 : i32
      %26 = tpu.assume_multiple %25, 8 : i32
      %27 = arith.index_cast %26 : i32 to index
      %c0_22 = arith.constant 0 : index
      %28 = vector.load %arg6[%27, %c0_22] : memref<384x32xf32, #tpu.memory_space<vmem>>, vector<64x32xf32>
      %c64_i32_23 = arith.constant 64 : i32
      %29 = arith.muli %20, %c64_i32_23 : i32
      %30 = tpu.assume_multiple %29, 8 : i32
      %31 = arith.index_cast %30 : i32 to index
      %c0_24 = arith.constant 0 : index
      %32 = vector.load %arg6[%31, %c0_24] : memref<384x32xf32, #tpu.memory_space<vmem>>, vector<64x32xf32>
      %33 = vector.broadcast %22 : f32 to vector<64x32xf32>
      %34 = arith.mulf %33, %28 : vector<64x32xf32>
      %35 = vector.broadcast %24 : f32 to vector<64x32xf32>
      %36 = arith.mulf %35, %32 : vector<64x32xf32>
      %37 = arith.addf %34, %36 : vector<64x32xf32>
      %38 = arith.minimumf %arg8, %37 : vector<64x32xf32>
      %c8_i32_25 = arith.constant 8 : i32
      %39 = arith.muli %arg7, %c8_i32_25 : i32
      %c1_i32_26 = arith.constant 1 : i32
      %40 = arith.addi %39, %c1_i32_26 : i32
      %41 = arith.index_cast %40 : i32 to index
      %c0_27 = arith.constant 0 : index
      %42 = memref.load %arg3[%41, %c0_27] : memref<16x2xi32, #tpu.memory_space<smem>>
      %43 = arith.index_cast %40 : i32 to index
      %c1_28 = arith.constant 1 : index
      %44 = memref.load %arg3[%43, %c1_28] : memref<16x2xi32, #tpu.memory_space<smem>>
      %45 = arith.index_cast %40 : i32 to index
      %c0_29 = arith.constant 0 : index
      %46 = memref.load %arg4[%45, %c0_29] : memref<16x2xf32, #tpu.memory_space<smem>>
      %47 = arith.index_cast %40 : i32 to index
      %c1_30 = arith.constant 1 : index
      %48 = memref.load %arg4[%47, %c1_30] : memref<16x2xf32, #tpu.memory_space<smem>>
      %c64_i32_31 = arith.constant 64 : i32
      %49 = arith.muli %42, %c64_i32_31 : i32
      %50 = tpu.assume_multiple %49, 8 : i32
      %51 = arith.index_cast %50 : i32 to index
      %c0_32 = arith.constant 0 : index
      %52 = vector.load %arg6[%51, %c0_32] : memref<384x32xf32, #tpu.memory_space<vmem>>, vector<64x32xf32>
      %c64_i32_33 = arith.constant 64 : i32
      %53 = arith.muli %44, %c64_i32_33 : i32
      %54 = tpu.assume_multiple %53, 8 : i32
      %55 = arith.index_cast %54 : i32 to index
      %c0_34 = arith.constant 0 : index
      %56 = vector.load %arg6[%55, %c0_34] : memref<384x32xf32, #tpu.memory_space<vmem>>, vector<64x32xf32>
      %57 = vector.broadcast %46 : f32 to vector<64x32xf32>
      %58 = arith.mulf %57, %52 : vector<64x32xf32>
      %59 = vector.broadcast %48 : f32 to vector<64x32xf32>
      %60 = arith.mulf %59, %56 : vector<64x32xf32>
      %61 = arith.addf %58, %60 : vector<64x32xf32>
      %62 = arith.minimumf %38, %61 : vector<64x32xf32>
      %c8_i32_35 = arith.constant 8 : i32
      %63 = arith.muli %arg7, %c8_i32_35 : i32
      %c2_i32_36 = arith.constant 2 : i32
      %64 = arith.addi %63, %c2_i32_36 : i32
      %65 = arith.index_cast %64 : i32 to index
      %c0_37 = arith.constant 0 : index
      %66 = memref.load %arg3[%65, %c0_37] : memref<16x2xi32, #tpu.memory_space<smem>>
      %67 = arith.index_cast %64 : i32 to index
      %c1_38 = arith.constant 1 : index
      %68 = memref.load %arg3[%67, %c1_38] : memref<16x2xi32, #tpu.memory_space<smem>>
      %69 = arith.index_cast %64 : i32 to index
      %c0_39 = arith.constant 0 : index
      %70 = memref.load %arg4[%69, %c0_39] : memref<16x2xf32, #tpu.memory_space<smem>>
      %71 = arith.index_cast %64 : i32 to index
      %c1_40 = arith.constant 1 : index
      %72 = memref.load %arg4[%71, %c1_40] : memref<16x2xf32, #tpu.memory_space<smem>>
      %c64_i32_41 = arith.constant 64 : i32
      %73 = arith.muli %66, %c64_i32_41 : i32
      %74 = tpu.assume_multiple %73, 8 : i32
      %75 = arith.index_cast %74 : i32 to index
      %c0_42 = arith.constant 0 : index
      %76 = vector.load %arg6[%75, %c0_42] : memref<384x32xf32, #tpu.memory_space<vmem>>, vector<64x32xf32>
      %c64_i32_43 = arith.constant 64 : i32
      %77 = arith.muli %68, %c64_i32_43 : i32
      %78 = tpu.assume_multiple %77, 8 : i32
      %79 = arith.index_cast %78 : i32 to index
      %c0_44 = arith.constant 0 : index
      %80 = vector.load %arg6[%79, %c0_44] : memref<384x32xf32, #tpu.memory_space<vmem>>, vector<64x32xf32>
      %81 = vector.broadcast %70 : f32 to vector<64x32xf32>
      %82 = arith.mulf %81, %76 : vector<64x32xf32>
      %83 = vector.broadcast %72 : f32 to vector<64x32xf32>
      %84 = arith.mulf %83, %80 : vector<64x32xf32>
      %85 = arith.addf %82, %84 : vector<64x32xf32>
      %86 = arith.minimumf %62, %85 : vector<64x32xf32>
      %c8_i32_45 = arith.constant 8 : i32
      %87 = arith.muli %arg7, %c8_i32_45 : i32
      %c3_i32 = arith.constant 3 : i32
      %88 = arith.addi %87, %c3_i32 : i32
      %89 = arith.index_cast %88 : i32 to index
      %c0_46 = arith.constant 0 : index
      %90 = memref.load %arg3[%89, %c0_46] : memref<16x2xi32, #tpu.memory_space<smem>>
      %91 = arith.index_cast %88 : i32 to index
      %c1_47 = arith.constant 1 : index
      %92 = memref.load %arg3[%91, %c1_47] : memref<16x2xi32, #tpu.memory_space<smem>>
      %93 = arith.index_cast %88 : i32 to index
      %c0_48 = arith.constant 0 : index
      %94 = memref.load %arg4[%93, %c0_48] : memref<16x2xf32, #tpu.memory_space<smem>>
      %95 = arith.index_cast %88 : i32 to index
      %c1_49 = arith.constant 1 : index
      %96 = memref.load %arg4[%95, %c1_49] : memref<16x2xf32, #tpu.memory_space<smem>>
      %c64_i32_50 = arith.constant 64 : i32
      %97 = arith.muli %90, %c64_i32_50 : i32
      %98 = tpu.assume_multiple %97, 8 : i32
      %99 = arith.index_cast %98 : i32 to index
      %c0_51 = arith.constant 0 : index
      %100 = vector.load %arg6[%99, %c0_51] : memref<384x32xf32, #tpu.memory_space<vmem>>, vector<64x32xf32>
      %c64_i32_52 = arith.constant 64 : i32
      %101 = arith.muli %92, %c64_i32_52 : i32
      %102 = tpu.assume_multiple %101, 8 : i32
      %103 = arith.index_cast %102 : i32 to index
      %c0_53 = arith.constant 0 : index
      %104 = vector.load %arg6[%103, %c0_53] : memref<384x32xf32, #tpu.memory_space<vmem>>, vector<64x32xf32>
      %105 = vector.broadcast %94 : f32 to vector<64x32xf32>
      %106 = arith.mulf %105, %100 : vector<64x32xf32>
      %107 = vector.broadcast %96 : f32 to vector<64x32xf32>
      %108 = arith.mulf %107, %104 : vector<64x32xf32>
      %109 = arith.addf %106, %108 : vector<64x32xf32>
      %110 = arith.minimumf %86, %109 : vector<64x32xf32>
      %c8_i32_54 = arith.constant 8 : i32
      %111 = arith.muli %arg7, %c8_i32_54 : i32
      %c4_i32 = arith.constant 4 : i32
      %112 = arith.addi %111, %c4_i32 : i32
      %113 = arith.index_cast %112 : i32 to index
      %c0_55 = arith.constant 0 : index
      %114 = memref.load %arg3[%113, %c0_55] : memref<16x2xi32, #tpu.memory_space<smem>>
      %115 = arith.index_cast %112 : i32 to index
      %c1_56 = arith.constant 1 : index
      %116 = memref.load %arg3[%115, %c1_56] : memref<16x2xi32, #tpu.memory_space<smem>>
      %117 = arith.index_cast %112 : i32 to index
      %c0_57 = arith.constant 0 : index
      %118 = memref.load %arg4[%117, %c0_57] : memref<16x2xf32, #tpu.memory_space<smem>>
      %119 = arith.index_cast %112 : i32 to index
      %c1_58 = arith.constant 1 : index
      %120 = memref.load %arg4[%119, %c1_58] : memref<16x2xf32, #tpu.memory_space<smem>>
      %c64_i32_59 = arith.constant 64 : i32
      %121 = arith.muli %114, %c64_i32_59 : i32
      %122 = tpu.assume_multiple %121, 8 : i32
      %123 = arith.index_cast %122 : i32 to index
      %c0_60 = arith.constant 0 : index
      %124 = vector.load %arg6[%123, %c0_60] : memref<384x32xf32, #tpu.memory_space<vmem>>, vector<64x32xf32>
      %c64_i32_61 = arith.constant 64 : i32
      %125 = arith.muli %116, %c64_i32_61 : i32
      %126 = tpu.assume_multiple %125, 8 : i32
      %127 = arith.index_cast %126 : i32 to index
      %c0_62 = arith.constant 0 : index
      %128 = vector.load %arg6[%127, %c0_62] : memref<384x32xf32, #tpu.memory_space<vmem>>, vector<64x32xf32>
      %129 = vector.broadcast %118 : f32 to vector<64x32xf32>
      %130 = arith.mulf %129, %124 : vector<64x32xf32>
      %131 = vector.broadcast %120 : f32 to vector<64x32xf32>
      %132 = arith.mulf %131, %128 : vector<64x32xf32>
      %133 = arith.addf %130, %132 : vector<64x32xf32>
      %134 = arith.minimumf %110, %133 : vector<64x32xf32>
      %c8_i32_63 = arith.constant 8 : i32
      %135 = arith.muli %arg7, %c8_i32_63 : i32
      %c5_i32 = arith.constant 5 : i32
      %136 = arith.addi %135, %c5_i32 : i32
      %137 = arith.index_cast %136 : i32 to index
      %c0_64 = arith.constant 0 : index
      %138 = memref.load %arg3[%137, %c0_64] : memref<16x2xi32, #tpu.memory_space<smem>>
      %139 = arith.index_cast %136 : i32 to index
      %c1_65 = arith.constant 1 : index
      %140 = memref.load %arg3[%139, %c1_65] : memref<16x2xi32, #tpu.memory_space<smem>>
      %141 = arith.index_cast %136 : i32 to index
      %c0_66 = arith.constant 0 : index
      %142 = memref.load %arg4[%141, %c0_66] : memref<16x2xf32, #tpu.memory_space<smem>>
      %143 = arith.index_cast %136 : i32 to index
      %c1_67 = arith.constant 1 : index
      %144 = memref.load %arg4[%143, %c1_67] : memref<16x2xf32, #tpu.memory_space<smem>>
      %c64_i32_68 = arith.constant 64 : i32
      %145 = arith.muli %138, %c64_i32_68 : i32
      %146 = tpu.assume_multiple %145, 8 : i32
      %147 = arith.index_cast %146 : i32 to index
      %c0_69 = arith.constant 0 : index
      %148 = vector.load %arg6[%147, %c0_69] : memref<384x32xf32, #tpu.memory_space<vmem>>, vector<64x32xf32>
      %c64_i32_70 = arith.constant 64 : i32
      %149 = arith.muli %140, %c64_i32_70 : i32
      %150 = tpu.assume_multiple %149, 8 : i32
      %151 = arith.index_cast %150 : i32 to index
      %c0_71 = arith.constant 0 : index
      %152 = vector.load %arg6[%151, %c0_71] : memref<384x32xf32, #tpu.memory_space<vmem>>, vector<64x32xf32>
      %153 = vector.broadcast %142 : f32 to vector<64x32xf32>
      %154 = arith.mulf %153, %148 : vector<64x32xf32>
      %155 = vector.broadcast %144 : f32 to vector<64x32xf32>
      %156 = arith.mulf %155, %152 : vector<64x32xf32>
      %157 = arith.addf %154, %156 : vector<64x32xf32>
      %158 = arith.minimumf %134, %157 : vector<64x32xf32>
      %c8_i32_72 = arith.constant 8 : i32
      %159 = arith.muli %arg7, %c8_i32_72 : i32
      %c6_i32 = arith.constant 6 : i32
      %160 = arith.addi %159, %c6_i32 : i32
      %161 = arith.index_cast %160 : i32 to index
      %c0_73 = arith.constant 0 : index
      %162 = memref.load %arg3[%161, %c0_73] : memref<16x2xi32, #tpu.memory_space<smem>>
      %163 = arith.index_cast %160 : i32 to index
      %c1_74 = arith.constant 1 : index
      %164 = memref.load %arg3[%163, %c1_74] : memref<16x2xi32, #tpu.memory_space<smem>>
      %165 = arith.index_cast %160 : i32 to index
      %c0_75 = arith.constant 0 : index
      %166 = memref.load %arg4[%165, %c0_75] : memref<16x2xf32, #tpu.memory_space<smem>>
      %167 = arith.index_cast %160 : i32 to index
      %c1_76 = arith.constant 1 : index
      %168 = memref.load %arg4[%167, %c1_76] : memref<16x2xf32, #tpu.memory_space<smem>>
      %c64_i32_77 = arith.constant 64 : i32
      %169 = arith.muli %162, %c64_i32_77 : i32
      %170 = tpu.assume_multiple %169, 8 : i32
      %171 = arith.index_cast %170 : i32 to index
      %c0_78 = arith.constant 0 : index
      %172 = vector.load %arg6[%171, %c0_78] : memref<384x32xf32, #tpu.memory_space<vmem>>, vector<64x32xf32>
      %c64_i32_79 = arith.constant 64 : i32
      %173 = arith.muli %164, %c64_i32_79 : i32
      %174 = tpu.assume_multiple %173, 8 : i32
      %175 = arith.index_cast %174 : i32 to index
      %c0_80 = arith.constant 0 : index
      %176 = vector.load %arg6[%175, %c0_80] : memref<384x32xf32, #tpu.memory_space<vmem>>, vector<64x32xf32>
      %177 = vector.broadcast %166 : f32 to vector<64x32xf32>
      %178 = arith.mulf %177, %172 : vector<64x32xf32>
      %179 = vector.broadcast %168 : f32 to vector<64x32xf32>
      %180 = arith.mulf %179, %176 : vector<64x32xf32>
      %181 = arith.addf %178, %180 : vector<64x32xf32>
      %182 = arith.minimumf %158, %181 : vector<64x32xf32>
      %c8_i32_81 = arith.constant 8 : i32
      %183 = arith.muli %arg7, %c8_i32_81 : i32
      %c7_i32 = arith.constant 7 : i32
      %184 = arith.addi %183, %c7_i32 : i32
      %185 = arith.index_cast %184 : i32 to index
      %c0_82 = arith.constant 0 : index
      %186 = memref.load %arg3[%185, %c0_82] : memref<16x2xi32, #tpu.memory_space<smem>>
      %187 = arith.index_cast %184 : i32 to index
      %c1_83 = arith.constant 1 : index
      %188 = memref.load %arg3[%187, %c1_83] : memref<16x2xi32, #tpu.memory_space<smem>>
      %189 = arith.index_cast %184 : i32 to index
      %c0_84 = arith.constant 0 : index
      %190 = memref.load %arg4[%189, %c0_84] : memref<16x2xf32, #tpu.memory_space<smem>>
      %191 = arith.index_cast %184 : i32 to index
      %c1_85 = arith.constant 1 : index
      %192 = memref.load %arg4[%191, %c1_85] : memref<16x2xf32, #tpu.memory_space<smem>>
      %c64_i32_86 = arith.constant 64 : i32
      %193 = arith.muli %186, %c64_i32_86 : i32
      %194 = tpu.assume_multiple %193, 8 : i32
      %195 = arith.index_cast %194 : i32 to index
      %c0_87 = arith.constant 0 : index
      %196 = vector.load %arg6[%195, %c0_87] : memref<384x32xf32, #tpu.memory_space<vmem>>, vector<64x32xf32>
      %c64_i32_88 = arith.constant 64 : i32
      %197 = arith.muli %188, %c64_i32_88 : i32
      %198 = tpu.assume_multiple %197, 8 : i32
      %199 = arith.index_cast %198 : i32 to index
      %c0_89 = arith.constant 0 : index
      %200 = vector.load %arg6[%199, %c0_89] : memref<384x32xf32, #tpu.memory_space<vmem>>, vector<64x32xf32>
      %201 = vector.broadcast %190 : f32 to vector<64x32xf32>
      %202 = arith.mulf %201, %196 : vector<64x32xf32>
      %203 = vector.broadcast %192 : f32 to vector<64x32xf32>
      %204 = arith.mulf %203, %200 : vector<64x32xf32>
      %205 = arith.addf %202, %204 : vector<64x32xf32>
      %206 = arith.minimumf %182, %205 : vector<64x32xf32>
      scf.yield %206 : vector<64x32xf32>
    }
    %c2_i32_9 = arith.constant 2 : i32
    %cst_10 = arith.constant 0.000000e+00 : f32
    %9 = vector.broadcast %cst_10 : f32 to vector<64x32xf32>
    %cst_11 = arith.constant 0.000000e+00 : f32
    %10 = vector.broadcast %cst_11 : f32 to vector<64x32xf32>
    %c0_i32_12 = arith.constant 0 : i32
    %c2_i32_13 = arith.constant 2 : i32
    %11 = arith.addi %c0_i32_12, %c2_i32_13 : i32
    %c1_i32_14 = arith.constant 1 : i32
    %12:2 = scf.for %arg7 = %c0_i32_12 to %11 step %c1_i32_14 iter_args(%arg8 = %9, %arg9 = %10) -> (vector<64x32xf32>, vector<64x32xf32>)  : i32 {
      %c8_i32 = arith.constant 8 : i32
      %15 = arith.muli %arg7, %c8_i32 : i32
      %c0_i32_18 = arith.constant 0 : i32
      %16 = arith.addi %15, %c0_i32_18 : i32
      %17 = arith.index_cast %16 : i32 to index
      %c0_19 = arith.constant 0 : index
      %18 = memref.load %arg3[%17, %c0_19] : memref<16x2xi32, #tpu.memory_space<smem>>
      %19 = arith.index_cast %16 : i32 to index
      %c1 = arith.constant 1 : index
      %20 = memref.load %arg3[%19, %c1] : memref<16x2xi32, #tpu.memory_space<smem>>
      %21 = arith.index_cast %16 : i32 to index
      %c0_20 = arith.constant 0 : index
      %22 = memref.load %arg4[%21, %c0_20] : memref<16x2xf32, #tpu.memory_space<smem>>
      %23 = arith.index_cast %16 : i32 to index
      %c1_21 = arith.constant 1 : index
      %24 = memref.load %arg4[%23, %c1_21] : memref<16x2xf32, #tpu.memory_space<smem>>
      %c64_i32 = arith.constant 64 : i32
      %25 = arith.muli %18, %c64_i32 : i32
      %26 = tpu.assume_multiple %25, 8 : i32
      %27 = arith.index_cast %26 : i32 to index
      %c0_22 = arith.constant 0 : index
      %28 = vector.load %arg6[%27, %c0_22] : memref<384x32xf32, #tpu.memory_space<vmem>>, vector<64x32xf32>
      %c64_i32_23 = arith.constant 64 : i32
      %29 = arith.muli %20, %c64_i32_23 : i32
      %30 = tpu.assume_multiple %29, 8 : i32
      %31 = arith.index_cast %30 : i32 to index
      %c0_24 = arith.constant 0 : index
      %32 = vector.load %arg6[%31, %c0_24] : memref<384x32xf32, #tpu.memory_space<vmem>>, vector<64x32xf32>
      %33 = vector.broadcast %22 : f32 to vector<64x32xf32>
      %34 = arith.mulf %33, %28 : vector<64x32xf32>
      %35 = vector.broadcast %24 : f32 to vector<64x32xf32>
      %36 = arith.mulf %35, %32 : vector<64x32xf32>
      %37 = arith.addf %34, %36 : vector<64x32xf32>
      %38 = arith.subf %8, %37 : vector<64x32xf32>
      %39 = math.exp %38 : vector<64x32xf32>
      %40 = arith.addf %arg8, %39 : vector<64x32xf32>
      %41 = arith.sitofp %16 : i32 to f32
      %42 = vector.broadcast %41 : f32 to vector<64x32xf32>
      %43 = arith.mulf %42, %39 : vector<64x32xf32>
      %44 = arith.addf %arg9, %43 : vector<64x32xf32>
      %c8_i32_25 = arith.constant 8 : i32
      %45 = arith.muli %arg7, %c8_i32_25 : i32
      %c1_i32_26 = arith.constant 1 : i32
      %46 = arith.addi %45, %c1_i32_26 : i32
      %47 = arith.index_cast %46 : i32 to index
      %c0_27 = arith.constant 0 : index
      %48 = memref.load %arg3[%47, %c0_27] : memref<16x2xi32, #tpu.memory_space<smem>>
      %49 = arith.index_cast %46 : i32 to index
      %c1_28 = arith.constant 1 : index
      %50 = memref.load %arg3[%49, %c1_28] : memref<16x2xi32, #tpu.memory_space<smem>>
      %51 = arith.index_cast %46 : i32 to index
      %c0_29 = arith.constant 0 : index
      %52 = memref.load %arg4[%51, %c0_29] : memref<16x2xf32, #tpu.memory_space<smem>>
      %53 = arith.index_cast %46 : i32 to index
      %c1_30 = arith.constant 1 : index
      %54 = memref.load %arg4[%53, %c1_30] : memref<16x2xf32, #tpu.memory_space<smem>>
      %c64_i32_31 = arith.constant 64 : i32
      %55 = arith.muli %48, %c64_i32_31 : i32
      %56 = tpu.assume_multiple %55, 8 : i32
      %57 = arith.index_cast %56 : i32 to index
      %c0_32 = arith.constant 0 : index
      %58 = vector.load %arg6[%57, %c0_32] : memref<384x32xf32, #tpu.memory_space<vmem>>, vector<64x32xf32>
      %c64_i32_33 = arith.constant 64 : i32
      %59 = arith.muli %50, %c64_i32_33 : i32
      %60 = tpu.assume_multiple %59, 8 : i32
      %61 = arith.index_cast %60 : i32 to index
      %c0_34 = arith.constant 0 : index
      %62 = vector.load %arg6[%61, %c0_34] : memref<384x32xf32, #tpu.memory_space<vmem>>, vector<64x32xf32>
      %63 = vector.broadcast %52 : f32 to vector<64x32xf32>
      %64 = arith.mulf %63, %58 : vector<64x32xf32>
      %65 = vector.broadcast %54 : f32 to vector<64x32xf32>
      %66 = arith.mulf %65, %62 : vector<64x32xf32>
      %67 = arith.addf %64, %66 : vector<64x32xf32>
      %68 = arith.subf %8, %67 : vector<64x32xf32>
      %69 = math.exp %68 : vector<64x32xf32>
      %70 = arith.addf %40, %69 : vector<64x32xf32>
      %71 = arith.sitofp %46 : i32 to f32
      %72 = vector.broadcast %71 : f32 to vector<64x32xf32>
      %73 = arith.mulf %72, %69 : vector<64x32xf32>
      %74 = arith.addf %44, %73 : vector<64x32xf32>
      %c8_i32_35 = arith.constant 8 : i32
      %75 = arith.muli %arg7, %c8_i32_35 : i32
      %c2_i32_36 = arith.constant 2 : i32
      %76 = arith.addi %75, %c2_i32_36 : i32
      %77 = arith.index_cast %76 : i32 to index
      %c0_37 = arith.constant 0 : index
      %78 = memref.load %arg3[%77, %c0_37] : memref<16x2xi32, #tpu.memory_space<smem>>
      %79 = arith.index_cast %76 : i32 to index
      %c1_38 = arith.constant 1 : index
      %80 = memref.load %arg3[%79, %c1_38] : memref<16x2xi32, #tpu.memory_space<smem>>
      %81 = arith.index_cast %76 : i32 to index
      %c0_39 = arith.constant 0 : index
      %82 = memref.load %arg4[%81, %c0_39] : memref<16x2xf32, #tpu.memory_space<smem>>
      %83 = arith.index_cast %76 : i32 to index
      %c1_40 = arith.constant 1 : index
      %84 = memref.load %arg4[%83, %c1_40] : memref<16x2xf32, #tpu.memory_space<smem>>
      %c64_i32_41 = arith.constant 64 : i32
      %85 = arith.muli %78, %c64_i32_41 : i32
      %86 = tpu.assume_multiple %85, 8 : i32
      %87 = arith.index_cast %86 : i32 to index
      %c0_42 = arith.constant 0 : index
      %88 = vector.load %arg6[%87, %c0_42] : memref<384x32xf32, #tpu.memory_space<vmem>>, vector<64x32xf32>
      %c64_i32_43 = arith.constant 64 : i32
      %89 = arith.muli %80, %c64_i32_43 : i32
      %90 = tpu.assume_multiple %89, 8 : i32
      %91 = arith.index_cast %90 : i32 to index
      %c0_44 = arith.constant 0 : index
      %92 = vector.load %arg6[%91, %c0_44] : memref<384x32xf32, #tpu.memory_space<vmem>>, vector<64x32xf32>
      %93 = vector.broadcast %82 : f32 to vector<64x32xf32>
      %94 = arith.mulf %93, %88 : vector<64x32xf32>
      %95 = vector.broadcast %84 : f32 to vector<64x32xf32>
      %96 = arith.mulf %95, %92 : vector<64x32xf32>
      %97 = arith.addf %94, %96 : vector<64x32xf32>
      %98 = arith.subf %8, %97 : vector<64x32xf32>
      %99 = math.exp %98 : vector<64x32xf32>
      %100 = arith.addf %70, %99 : vector<64x32xf32>
      %101 = arith.sitofp %76 : i32 to f32
      %102 = vector.broadcast %101 : f32 to vector<64x32xf32>
      %103 = arith.mulf %102, %99 : vector<64x32xf32>
      %104 = arith.addf %74, %103 : vector<64x32xf32>
      %c8_i32_45 = arith.constant 8 : i32
      %105 = arith.muli %arg7, %c8_i32_45 : i32
      %c3_i32 = arith.constant 3 : i32
      %106 = arith.addi %105, %c3_i32 : i32
      %107 = arith.index_cast %106 : i32 to index
      %c0_46 = arith.constant 0 : index
      %108 = memref.load %arg3[%107, %c0_46] : memref<16x2xi32, #tpu.memory_space<smem>>
      %109 = arith.index_cast %106 : i32 to index
      %c1_47 = arith.constant 1 : index
      %110 = memref.load %arg3[%109, %c1_47] : memref<16x2xi32, #tpu.memory_space<smem>>
      %111 = arith.index_cast %106 : i32 to index
      %c0_48 = arith.constant 0 : index
      %112 = memref.load %arg4[%111, %c0_48] : memref<16x2xf32, #tpu.memory_space<smem>>
      %113 = arith.index_cast %106 : i32 to index
      %c1_49 = arith.constant 1 : index
      %114 = memref.load %arg4[%113, %c1_49] : memref<16x2xf32, #tpu.memory_space<smem>>
      %c64_i32_50 = arith.constant 64 : i32
      %115 = arith.muli %108, %c64_i32_50 : i32
      %116 = tpu.assume_multiple %115, 8 : i32
      %117 = arith.index_cast %116 : i32 to index
      %c0_51 = arith.constant 0 : index
      %118 = vector.load %arg6[%117, %c0_51] : memref<384x32xf32, #tpu.memory_space<vmem>>, vector<64x32xf32>
      %c64_i32_52 = arith.constant 64 : i32
      %119 = arith.muli %110, %c64_i32_52 : i32
      %120 = tpu.assume_multiple %119, 8 : i32
      %121 = arith.index_cast %120 : i32 to index
      %c0_53 = arith.constant 0 : index
      %122 = vector.load %arg6[%121, %c0_53] : memref<384x32xf32, #tpu.memory_space<vmem>>, vector<64x32xf32>
      %123 = vector.broadcast %112 : f32 to vector<64x32xf32>
      %124 = arith.mulf %123, %118 : vector<64x32xf32>
      %125 = vector.broadcast %114 : f32 to vector<64x32xf32>
      %126 = arith.mulf %125, %122 : vector<64x32xf32>
      %127 = arith.addf %124, %126 : vector<64x32xf32>
      %128 = arith.subf %8, %127 : vector<64x32xf32>
      %129 = math.exp %128 : vector<64x32xf32>
      %130 = arith.addf %100, %129 : vector<64x32xf32>
      %131 = arith.sitofp %106 : i32 to f32
      %132 = vector.broadcast %131 : f32 to vector<64x32xf32>
      %133 = arith.mulf %132, %129 : vector<64x32xf32>
      %134 = arith.addf %104, %133 : vector<64x32xf32>
      %c8_i32_54 = arith.constant 8 : i32
      %135 = arith.muli %arg7, %c8_i32_54 : i32
      %c4_i32 = arith.constant 4 : i32
      %136 = arith.addi %135, %c4_i32 : i32
      %137 = arith.index_cast %136 : i32 to index
      %c0_55 = arith.constant 0 : index
      %138 = memref.load %arg3[%137, %c0_55] : memref<16x2xi32, #tpu.memory_space<smem>>
      %139 = arith.index_cast %136 : i32 to index
      %c1_56 = arith.constant 1 : index
      %140 = memref.load %arg3[%139, %c1_56] : memref<16x2xi32, #tpu.memory_space<smem>>
      %141 = arith.index_cast %136 : i32 to index
      %c0_57 = arith.constant 0 : index
      %142 = memref.load %arg4[%141, %c0_57] : memref<16x2xf32, #tpu.memory_space<smem>>
      %143 = arith.index_cast %136 : i32 to index
      %c1_58 = arith.constant 1 : index
      %144 = memref.load %arg4[%143, %c1_58] : memref<16x2xf32, #tpu.memory_space<smem>>
      %c64_i32_59 = arith.constant 64 : i32
      %145 = arith.muli %138, %c64_i32_59 : i32
      %146 = tpu.assume_multiple %145, 8 : i32
      %147 = arith.index_cast %146 : i32 to index
      %c0_60 = arith.constant 0 : index
      %148 = vector.load %arg6[%147, %c0_60] : memref<384x32xf32, #tpu.memory_space<vmem>>, vector<64x32xf32>
      %c64_i32_61 = arith.constant 64 : i32
      %149 = arith.muli %140, %c64_i32_61 : i32
      %150 = tpu.assume_multiple %149, 8 : i32
      %151 = arith.index_cast %150 : i32 to index
      %c0_62 = arith.constant 0 : index
      %152 = vector.load %arg6[%151, %c0_62] : memref<384x32xf32, #tpu.memory_space<vmem>>, vector<64x32xf32>
      %153 = vector.broadcast %142 : f32 to vector<64x32xf32>
      %154 = arith.mulf %153, %148 : vector<64x32xf32>
      %155 = vector.broadcast %144 : f32 to vector<64x32xf32>
      %156 = arith.mulf %155, %152 : vector<64x32xf32>
      %157 = arith.addf %154, %156 : vector<64x32xf32>
      %158 = arith.subf %8, %157 : vector<64x32xf32>
      %159 = math.exp %158 : vector<64x32xf32>
      %160 = arith.addf %130, %159 : vector<64x32xf32>
      %161 = arith.sitofp %136 : i32 to f32
      %162 = vector.broadcast %161 : f32 to vector<64x32xf32>
      %163 = arith.mulf %162, %159 : vector<64x32xf32>
      %164 = arith.addf %134, %163 : vector<64x32xf32>
      %c8_i32_63 = arith.constant 8 : i32
      %165 = arith.muli %arg7, %c8_i32_63 : i32
      %c5_i32 = arith.constant 5 : i32
      %166 = arith.addi %165, %c5_i32 : i32
      %167 = arith.index_cast %166 : i32 to index
      %c0_64 = arith.constant 0 : index
      %168 = memref.load %arg3[%167, %c0_64] : memref<16x2xi32, #tpu.memory_space<smem>>
      %169 = arith.index_cast %166 : i32 to index
      %c1_65 = arith.constant 1 : index
      %170 = memref.load %arg3[%169, %c1_65] : memref<16x2xi32, #tpu.memory_space<smem>>
      %171 = arith.index_cast %166 : i32 to index
      %c0_66 = arith.constant 0 : index
      %172 = memref.load %arg4[%171, %c0_66] : memref<16x2xf32, #tpu.memory_space<smem>>
      %173 = arith.index_cast %166 : i32 to index
      %c1_67 = arith.constant 1 : index
      %174 = memref.load %arg4[%173, %c1_67] : memref<16x2xf32, #tpu.memory_space<smem>>
      %c64_i32_68 = arith.constant 64 : i32
      %175 = arith.muli %168, %c64_i32_68 : i32
      %176 = tpu.assume_multiple %175, 8 : i32
      %177 = arith.index_cast %176 : i32 to index
      %c0_69 = arith.constant 0 : index
      %178 = vector.load %arg6[%177, %c0_69] : memref<384x32xf32, #tpu.memory_space<vmem>>, vector<64x32xf32>
      %c64_i32_70 = arith.constant 64 : i32
      %179 = arith.muli %170, %c64_i32_70 : i32
      %180 = tpu.assume_multiple %179, 8 : i32
      %181 = arith.index_cast %180 : i32 to index
      %c0_71 = arith.constant 0 : index
      %182 = vector.load %arg6[%181, %c0_71] : memref<384x32xf32, #tpu.memory_space<vmem>>, vector<64x32xf32>
      %183 = vector.broadcast %172 : f32 to vector<64x32xf32>
      %184 = arith.mulf %183, %178 : vector<64x32xf32>
      %185 = vector.broadcast %174 : f32 to vector<64x32xf32>
      %186 = arith.mulf %185, %182 : vector<64x32xf32>
      %187 = arith.addf %184, %186 : vector<64x32xf32>
      %188 = arith.subf %8, %187 : vector<64x32xf32>
      %189 = math.exp %188 : vector<64x32xf32>
      %190 = arith.addf %160, %189 : vector<64x32xf32>
      %191 = arith.sitofp %166 : i32 to f32
      %192 = vector.broadcast %191 : f32 to vector<64x32xf32>
      %193 = arith.mulf %192, %189 : vector<64x32xf32>
      %194 = arith.addf %164, %193 : vector<64x32xf32>
      %c8_i32_72 = arith.constant 8 : i32
      %195 = arith.muli %arg7, %c8_i32_72 : i32
      %c6_i32 = arith.constant 6 : i32
      %196 = arith.addi %195, %c6_i32 : i32
      %197 = arith.index_cast %196 : i32 to index
      %c0_73 = arith.constant 0 : index
      %198 = memref.load %arg3[%197, %c0_73] : memref<16x2xi32, #tpu.memory_space<smem>>
      %199 = arith.index_cast %196 : i32 to index
      %c1_74 = arith.constant 1 : index
      %200 = memref.load %arg3[%199, %c1_74] : memref<16x2xi32, #tpu.memory_space<smem>>
      %201 = arith.index_cast %196 : i32 to index
      %c0_75 = arith.constant 0 : index
      %202 = memref.load %arg4[%201, %c0_75] : memref<16x2xf32, #tpu.memory_space<smem>>
      %203 = arith.index_cast %196 : i32 to index
      %c1_76 = arith.constant 1 : index
      %204 = memref.load %arg4[%203, %c1_76] : memref<16x2xf32, #tpu.memory_space<smem>>
      %c64_i32_77 = arith.constant 64 : i32
      %205 = arith.muli %198, %c64_i32_77 : i32
      %206 = tpu.assume_multiple %205, 8 : i32
      %207 = arith.index_cast %206 : i32 to index
      %c0_78 = arith.constant 0 : index
      %208 = vector.load %arg6[%207, %c0_78] : memref<384x32xf32, #tpu.memory_space<vmem>>, vector<64x32xf32>
      %c64_i32_79 = arith.constant 64 : i32
      %209 = arith.muli %200, %c64_i32_79 : i32
      %210 = tpu.assume_multiple %209, 8 : i32
      %211 = arith.index_cast %210 : i32 to index
      %c0_80 = arith.constant 0 : index
      %212 = vector.load %arg6[%211, %c0_80] : memref<384x32xf32, #tpu.memory_space<vmem>>, vector<64x32xf32>
      %213 = vector.broadcast %202 : f32 to vector<64x32xf32>
      %214 = arith.mulf %213, %208 : vector<64x32xf32>
      %215 = vector.broadcast %204 : f32 to vector<64x32xf32>
      %216 = arith.mulf %215, %212 : vector<64x32xf32>
      %217 = arith.addf %214, %216 : vector<64x32xf32>
      %218 = arith.subf %8, %217 : vector<64x32xf32>
      %219 = math.exp %218 : vector<64x32xf32>
      %220 = arith.addf %190, %219 : vector<64x32xf32>
      %221 = arith.sitofp %196 : i32 to f32
      %222 = vector.broadcast %221 : f32 to vector<64x32xf32>
      %223 = arith.mulf %222, %219 : vector<64x32xf32>
      %224 = arith.addf %194, %223 : vector<64x32xf32>
      %c8_i32_81 = arith.constant 8 : i32
      %225 = arith.muli %arg7, %c8_i32_81 : i32
      %c7_i32 = arith.constant 7 : i32
      %226 = arith.addi %225, %c7_i32 : i32
      %227 = arith.index_cast %226 : i32 to index
      %c0_82 = arith.constant 0 : index
      %228 = memref.load %arg3[%227, %c0_82] : memref<16x2xi32, #tpu.memory_space<smem>>
      %229 = arith.index_cast %226 : i32 to index
      %c1_83 = arith.constant 1 : index
      %230 = memref.load %arg3[%229, %c1_83] : memref<16x2xi32, #tpu.memory_space<smem>>
      %231 = arith.index_cast %226 : i32 to index
      %c0_84 = arith.constant 0 : index
      %232 = memref.load %arg4[%231, %c0_84] : memref<16x2xf32, #tpu.memory_space<smem>>
      %233 = arith.index_cast %226 : i32 to index
      %c1_85 = arith.constant 1 : index
      %234 = memref.load %arg4[%233, %c1_85] : memref<16x2xf32, #tpu.memory_space<smem>>
      %c64_i32_86 = arith.constant 64 : i32
      %235 = arith.muli %228, %c64_i32_86 : i32
      %236 = tpu.assume_multiple %235, 8 : i32
      %237 = arith.index_cast %236 : i32 to index
      %c0_87 = arith.constant 0 : index
      %238 = vector.load %arg6[%237, %c0_87] : memref<384x32xf32, #tpu.memory_space<vmem>>, vector<64x32xf32>
      %c64_i32_88 = arith.constant 64 : i32
      %239 = arith.muli %230, %c64_i32_88 : i32
      %240 = tpu.assume_multiple %239, 8 : i32
      %241 = arith.index_cast %240 : i32 to index
      %c0_89 = arith.constant 0 : index
      %242 = vector.load %arg6[%241, %c0_89] : memref<384x32xf32, #tpu.memory_space<vmem>>, vector<64x32xf32>
      %243 = vector.broadcast %232 : f32 to vector<64x32xf32>
      %244 = arith.mulf %243, %238 : vector<64x32xf32>
      %245 = vector.broadcast %234 : f32 to vector<64x32xf32>
      %246 = arith.mulf %245, %242 : vector<64x32xf32>
      %247 = arith.addf %244, %246 : vector<64x32xf32>
      %248 = arith.subf %8, %247 : vector<64x32xf32>
      %249 = math.exp %248 : vector<64x32xf32>
      %250 = arith.addf %220, %249 : vector<64x32xf32>
      %251 = arith.sitofp %226 : i32 to f32
      %252 = vector.broadcast %251 : f32 to vector<64x32xf32>
      %253 = arith.mulf %252, %249 : vector<64x32xf32>
      %254 = arith.addf %224, %253 : vector<64x32xf32>
      scf.yield %250, %254 : vector<64x32xf32>, vector<64x32xf32>
    }
    %c2_i32_15 = arith.constant 2 : i32
    %13 = arith.divf %12#1, %12#0 : vector<64x32xf32>
    %c0_16 = arith.constant 0 : index
    %c0_17 = arith.constant 0 : index
    %14 = vector.load %arg5[%c0_16, %c0_17] : memref<64x32xf32, #tpu.memory_space<vmem>>, vector<64x32xf32>
    tpu.vector_store %arg5[%c0_16, %c0_17], %13 {strides = array<i32>} : memref<64x32xf32, #tpu.memory_space<vmem>>, vector<64x32xf32>,
    return
  }
}

</mosaic_0001>

<bundles_post_ra>
// kernel: tpu_custom_call.1
= control target key start
LH: loop header
LB: loop body
LE: loop exit
PB: predicated region body
PF: predicated region fallthrough
CT: control target
= control target key end

     0   :  { %10 = vsyncpa [#allocation4], 0  ;;  %s8322_s0 = inlined_call_operand.vmem [shape: f32[96,8], index: 0, kind: input, shape index: {}]   ;;  %s8323_s1 = inlined_call_operand.vmem [shape: f32[8,32], index: 1, kind: input, shape index: {}]   ;;  %s8324_s2 = inlined_call_operand.vmem [shape: f32[384,96], index: 2, kind: input, shape index: {}]   ;;  %s8325_s3 = inlined_call_operand.vmem [shape: s32[16,2], index: 3, kind: input, shape index: {}]   ;;  %s8326_s4 = inlined_call_operand.vmem [shape: f32[16,2], index: 4, kind: input, shape index: {}]   ;;  %s8327_s5 = inlined_call_operand.vmem [shape: f32[64,32], index: 5, kind: output, shape index: {}]  }
   0x1   :  { %s22_s20 = sshll.u32 %s8325_s3, 4  ;;  %s23_s20 = int_to_ptr.vmem [resolvable:$true] %s22_s20 }
   0x2   :  { %11 = vsyncpa [#allocation6], 0  ;;  %s33_s23 = sshll.u32 %s8326_s4, 4  ;;  %s4912_s24 = smov [#allocation3]   ;;  %s34_s23 = int_to_ptr.vmem [resolvable:$true] %s33_s23 }
   0x3   :  { %s4913_s25 = smov 128   ;;  %s4914_s26 = smov 8  }
   0x4   :  { %28 = dma.vmem_to_smem %s23_s20, 256, %s4912_s24, [#allocation4], %s4913_s25, %s4913_s25, %s4914_s26  }
   0x5   :  { %s4915_s27 = smov [#allocation5]  }
   0x6   :  { %39 = dma.vmem_to_smem %s34_s23, 256, %s4915_s27, [#allocation6], %s4913_s25, %s4913_s25, %s4914_s26  }
   0x7   :  { %4804 = dma.done.wait [#allocation4], 256  }
   0x8   :  { %4805 = vsyncadd [#allocation4], 4294967040 }
   0x9   :  { %4806 = dma.done.wait [#allocation6], 256  }
   0xa   :  { %4807 = vsyncadd [#allocation6], 4294967040 }
   0xb   :  { %48 = sfence }
   0xc   :  { %v61_v0 = vld [vmem:[%s8323_s1] sm:$0xff]  ;;  %vm62_vm0 = vcmask 64512   ;;  %v50_v2 = vld [vmem:[%s8322_s0 + $0x8] sm:$0xff]  ;;  %v51_v8 = vld [vmem:[%s8322_s0 + $0x10] sm:$0xff]  ;;  %vm634_vm1 = vcmask 785408   ;;  %vm8470_vm2 = vcmask 261120  }
   0xd   :  { %v49_v1 = vld [vmem:[%s8322_s0] sm:$0xff]  ;;  %v114_v3 = vand.u32 4294901760, %v61_v0  ;;  %v67_v5 = vsel %vm62_vm0, %v50_v2, 0  ;;  %v70_v13 = vsel %vm62_vm0, %v51_v8, 0  ;;  %v52_v21 = vld [vmem:[%s8322_s0 + $0x18] sm:$0xff]  ;;  %v54_v35 = vld [vmem:[%s8322_s0 + $0x28] sm:$0xff] }
   0xe   :  { %v64_v4 = vsel %vm62_vm0, %v49_v1, 0  ;;  %v4965_v7 = vand.u32 4294901760, %v67_v5  ;;  %v4973_v18 = vand.u32 4294901760, %v70_v13  ;;  %v73_v24 = vsel %vm62_vm0, %v52_v21, 0  ;;  %v53_v28 = vld [vmem:[%s8322_s0 + $0x20] sm:$0xff]  ;;  %v55_v42 = vld [vmem:[%s8322_s0 + $0x30] sm:$0xff] }
   0xf   :  { %v4963_v6 = vand.u32 4294901760, %v64_v4  ;;  %v229_v9 = vsub.f32 %v61_v0, %v114_v3  ;;  %378 = vmatpush.msra.mxu3 %v114_v3  ;;  %115 = vmatpush.msra.mxu0 %v114_v3  ;;  %v4981_v27 = vand.u32 4294901760, %v73_v24  ;;  %v76_v31 = vsel %vm62_vm0, %v53_v28, 0  ;;  %v56_v49 = vld [vmem:[%s8322_s0 + $0x38] sm:$0xff]  ;;  %v57_v56 = vld [vmem:[%s8322_s0 + $0x40] sm:$0xff]  ;;  %v58_v63 = vld [vmem:[%s8322_s0 + $0x48] sm:$0xff] }
  0x10   :  { %v125_v11 = vsub.f32 %v67_v5, %v4965_v7  ;;  %v133_v23 = vsub.f32 %v70_v13, %v4973_v18  ;;  %v4989_v34 = vand.u32 4294901760, %v76_v31  ;;  %v79_v38 = vsel %vm62_vm0, %v54_v35, 0  ;;  %v59_v8 = vld [vmem:[%s8322_s0 + $0x50] sm:$0xff] }
  0x11   :  { %v117_v10 = vsub.f32 %v64_v4, %v4963_v6  ;;  %300 = vmatpush.msra.mxu2 %v229_v9  ;;  %v230_v12 = vand.u32 4294901760, %v229_v9  ;;  %v141_v30 = vsub.f32 %v73_v24, %v4981_v27  ;;  %v4997_v41 = vand.u32 4294901760, %v79_v38 }
  0x12   :  { %v126_v17 = vand.u32 4294901760, %v125_v11  ;;  %v134_v26 = vand.u32 4294901760, %v133_v23  ;;  %v149_v37 = vsub.f32 %v76_v31, %v4989_v34  ;;  %v82_v45 = vsel %vm62_vm0, %v55_v42, 0 }
  0x13   :  { %303 = vmatmul.f32.vlgmr.msra.gmra.mxu2 %v117_v10  ;;  %v118_v14 = vand.u32 4294901760, %v117_v10  ;;  %v231_v15 = vsub.f32 %v229_v9, %v230_v12  ;;  %470 = vmatpush.msrb.mxu0 %v230_v12  ;;  %v142_v33 = vand.u32 4294901760, %v141_v30  ;;  %v157_v44 = vsub.f32 %v79_v38, %v4997_v41 }
  0x14   :  { %v127_v22 = vsub.f32 %v125_v11, %v126_v17  ;;  %v135_v29 = vsub.f32 %v133_v23, %v134_v26  ;;  %v150_v40 = vand.u32 4294901760, %v149_v37  ;;  %v5005_v48 = vand.u32 4294901760, %v82_v45 }
  0x15   :  { %382 = vmatmul.f32.vlgmr.msra.gmra.mxu3 %v118_v14  ;;  %v119_v16 = vsub.f32 %v117_v10, %v118_v14  ;;  %v232_v19 = vand.u32 4294901760, %v231_v15  ;;  %v143_v36 = vsub.f32 %v141_v30, %v142_v33  ;;  %v158_v47 = vand.u32 4294901760, %v157_v44  ;;  %v60_v15 = vld [vmem:[%s8322_s0 + $0x58] sm:$0xff] }
  0x16   :  { %v128_v25 = vand.u32 4294901760, %v127_v22  ;;  %v136_v32 = vand.u32 4294901760, %v135_v29  ;;  %v151_v43 = vsub.f32 %v149_v37, %v150_v40  ;;  %v165_v51 = vsub.f32 %v82_v45, %v5005_v48 }
  0x17   :  { %v120_v20 = vand.u32 4294901760, %v119_v16  ;;  %233 = vmatpush.msra.mxu1 %v232_v19  ;;  %v144_v39 = vand.u32 4294901760, %v143_v36  ;;  %v159_v50 = vsub.f32 %v157_v44, %v158_v47  ;;  %v85_v52 = vsel %vm62_vm0, %v56_v49, 0 }
  0x18   :  { %235 = vmatmul.f32.vlgmr.msra.gmra.mxu1 %v4963_v6  ;;  %v152_v46 = vand.u32 4294901760, %v151_v43  ;;  %v166_v54 = vand.u32 4294901760, %v165_v51  ;;  %v5013_v55 = vand.u32 4294901760, %v85_v52  ;;  %v88_v59 = vsel %vm62_vm0, %v57_v56, 0 }
  0x19   :  { %121 = vmatmul.f32.vlgmr.msra.gmra.mxu0 %v120_v20  ;;  %536 = vmatpush.msrb.mxu1 %v114_v3  ;;  %v160_v53 = vand.u32 4294901760, %v159_v50  ;;  %v5021_v62 = vand.u32 4294901760, %v88_v59  ;;  %v91_v2 = vsel %vm62_vm0, %v58_v63, 0  ;;  %v97_v19 = vsel %vm62_vm0, %v60_v15, 0 }
  0x1a   :  { %v167_v57 = vsub.f32 %v165_v51, %v166_v54  ;;  %v173_v58 = vsub.f32 %v85_v52, %v5013_v55  ;;  %v5029_v5 = vand.u32 4294901760, %v91_v2  ;;  %v204_v22 = vand.u32 4294901760, %v97_v19 }
  0x1b   :  { %308 = vmatmul.f32.gmra.mxu2 %v125_v11  ;;  %v181_v1 = vsub.f32 %v88_v59, %v5021_v62  ;;  %v94_v11 = vsel %vm62_vm0, %v59_v8, 0 }
  0x1c   :  { %v168_v60 = vand.u32 4294901760, %v167_v57  ;;  %v174_v61 = vand.u32 4294901760, %v173_v58  ;;  %v189_v10 = vsub.f32 %v91_v2, %v5029_v5  ;;  %v196_v14 = vand.u32 4294901760, %v94_v11 }
  0x1d   :  { %388 = vmatmul.f32.gmra.mxu3 %v126_v17  ;;  %v182_v4 = vand.u32 4294901760, %v181_v1  ;;  %v205_v24 = vsub.f32 %v97_v19, %v204_v22 }
  0x1e   :  { %v175_v0 = vsub.f32 %v173_v58, %v174_v61  ;;  %v190_v13 = vand.u32 4294901760, %v189_v10  ;;  %v197_v17 = vsub.f32 %v94_v11, %v196_v14 }
  0x1f   :  { %v183_v9 = vsub.f32 %v181_v1, %v182_v4 }
  0x20   :  { %239 = vmatmul.f32.gmra.mxu1 %v4965_v7  ;;  %v176_v3 = vand.u32 4294901760, %v175_v0  ;;  %v191_v16 = vsub.f32 %v189_v10, %v190_v13  ;;  %v198_v21 = vand.u32 4294901760, %v197_v17 }
  0x21   :  { %129 = vmatmul.f32.gmra.mxu0 %v128_v25  ;;  %v184_v12 = vand.u32 4294901760, %v183_v9 }
  0x22   :  { %v192_v20 = vand.u32 4294901760, %v191_v16 }
  0x23   :  { %313 = vmatmul.f32.gmra.mxu2 %v133_v23  ;;  %v199_v23 = vsub.f32 %v197_v17, %v198_v21 }
  0x25   :  { %394 = vmatmul.f32.gmra.mxu3 %v134_v26  ;;  %v200_v25 = vand.u32 4294901760, %v199_v23  ;;  %v206_v26 = vand.u32 4294901760, %v205_v24 }
  0x27   :  { %v207_v28 = vsub.f32 %v205_v24, %v206_v26 }
  0x28   :  { %243 = vmatmul.f32.gmra.mxu1 %v4973_v18 }
  0x29   :  { %137 = vmatmul.f32.gmra.mxu0 %v136_v32  ;;  %v208_v29 = vand.u32 4294901760, %v207_v28 }
  0x2b   :  { %318 = vmatmul.f32.gmra.mxu2 %v141_v30 }
  0x2d   :  { %400 = vmatmul.f32.gmra.mxu3 %v142_v33 }
  0x30   :  { %247 = vmatmul.f32.gmra.mxu1 %v4981_v27 }
  0x31   :  { %145 = vmatmul.f32.gmra.mxu0 %v144_v39 }
  0x33   :  { %323 = vmatmul.f32.gmra.mxu2 %v149_v37 }
  0x35   :  { %406 = vmatmul.f32.gmra.mxu3 %v150_v40 }
  0x38   :  { %251 = vmatmul.f32.gmra.mxu1 %v4989_v34 }
  0x39   :  { %153 = vmatmul.f32.gmra.mxu0 %v152_v46 }
  0x3b   :  { %328 = vmatmul.f32.gmra.mxu2 %v157_v44 }
  0x3d   :  { %412 = vmatmul.f32.gmra.mxu3 %v158_v47 }
  0x40   :  { %255 = vmatmul.f32.gmra.mxu1 %v4997_v41 }
  0x41   :  { %161 = vmatmul.f32.gmra.mxu0 %v160_v53 }
  0x43   :  { %333 = vmatmul.f32.gmra.mxu2 %v165_v51 }
  0x45   :  { %418 = vmatmul.f32.gmra.mxu3 %v166_v54 }
  0x48   :  { %259 = vmatmul.f32.gmra.mxu1 %v5005_v48 }
  0x49   :  { %169 = vmatmul.f32.gmra.mxu0 %v168_v60 }
  0x4b   :  { %338 = vmatmul.f32.gmra.mxu2 %v173_v58 }
  0x4d   :  { %424 = vmatmul.f32.gmra.mxu3 %v174_v61 }
  0x50   :  { %263 = vmatmul.f32.gmra.mxu1 %v5013_v55 }
  0x51   :  { %177 = vmatmul.f32.gmra.mxu0 %v176_v3 }
  0x53   :  { %343 = vmatmul.f32.gmra.mxu2 %v181_v1 }
  0x55   :  { %430 = vmatmul.f32.gmra.mxu3 %v182_v4 }
  0x58   :  { %267 = vmatmul.f32.gmra.mxu1 %v5021_v62 }
  0x59   :  { %185 = vmatmul.f32.gmra.mxu0 %v184_v12 }
  0x5b   :  { %348 = vmatmul.f32.gmra.mxu2 %v189_v10 }
  0x5d   :  { %436 = vmatmul.f32.gmra.mxu3 %v190_v13 }
  0x60   :  { %271 = vmatmul.f32.gmra.mxu1 %v5029_v5 }
  0x61   :  { %193 = vmatmul.f32.gmra.mxu0 %v192_v20 }
  0x63   :  { %353 = vmatmul.f32.gmra.mxu2 %v197_v17 }
  0x65   :  { %442 = vmatmul.f32.gmra.mxu3 %v198_v21 }
  0x68   :  { %275 = vmatmul.f32.gmra.mxu1 %v196_v14 }
  0x69   :  { %201 = vmatmul.f32.gmra.mxu0 %v200_v25 }
  0x6b   :  { %358 = vmatmul.f32.gmra.mxu2 %v205_v24 }
  0x6d   :  { %448 = vmatmul.f32.gmra.mxu3 %v206_v26 }
  0x70   :  { %279 = vmatmul.f32.gmra.mxu1 %v204_v22 }
  0x71   :  { %209 = vmatmul.f32.gmra.mxu0 %v208_v29 }
  0x78   :  { %538 = vmatmul.f32.vlgmr.msrb.gmra.mxu1 %v4963_v6 }
  0x79   :  { %472 = vmatmul.f32.vlgmr.msrb.gmra.mxu0 %v4963_v6 }
  0x80   :  { %542 = vmatmul.f32.gmra.mxu1 %v4965_v7 }
  0x81   :  { %476 = vmatmul.f32.gmra.mxu0 %v4965_v7 }
  0x88   :  { %546 = vmatmul.f32.gmra.mxu1 %v4973_v18 }
  0x89   :  { %480 = vmatmul.f32.gmra.mxu0 %v4973_v18 }
  0x90   :  { %550 = vmatmul.f32.gmra.mxu1 %v4981_v27 }
  0x91   :  { %484 = vmatmul.f32.gmra.mxu0 %v4981_v27 }
  0x95   :  { %v5053_v31 = vpop.f32.mrf.mxu1 }
  0x96   :  { %v5051_v30 = vpop.f32.mrf.mxu0  ;;  %v5091_v44 = vpop.f32.mrf.mxu2 }
  0x97   :  { %8471 = vst [vmem:[#allocation9_spill] sm:$0xff] %v5091_v44 }
  0x98   :  { %554 = vmatmul.f32.gmra.mxu1 %v4989_v34  ;;  %v5093_v45 = vpop.f32.mrf.mxu3 }
  0x99   :  { %488 = vmatmul.f32.gmra.mxu0 %v4989_v34  ;;  %8472 = vst [vmem:[#allocation10_spill] sm:$0xff] %v5093_v45 }
  0x9d   :  { %v5059_v32 = vpop.f32.mrf.mxu1 }
  0x9e   :  { %v5057_v6 = vpop.f32.mrf.mxu0 }
  0xa0   :  { %558 = vmatmul.f32.gmra.mxu1 %v4997_v41  ;;  %v5097_v49 = vpop.f32.mrf.mxu3 }
  0xa1   :  { %492 = vmatmul.f32.gmra.mxu0 %v4997_v41  ;;  %8473 = vst [vmem:[#allocation11_spill] sm:$0xff] %v5097_v49 }
  0xa5   :  { %v5065_v18 = vpop.f32.mrf.mxu1 }
  0xa6   :  { %v5063_v7 = vpop.f32.mrf.mxu0 }
  0xa8   :  { %562 = vmatmul.f32.gmra.mxu1 %v5005_v48 }
  0xa9   :  { %496 = vmatmul.f32.gmra.mxu0 %v5005_v48  ;;  %v5095_v48 = vpop.f32.mrf.mxu2 }
  0xad   :  { %v5071_v33 = vpop.f32.mrf.mxu1 }
  0xae   :  { %v5069_v27 = vpop.f32.mrf.mxu0 }
  0xb0   :  { %566 = vmatmul.f32.gmra.mxu1 %v5013_v55 }
  0xb1   :  { %500 = vmatmul.f32.gmra.mxu0 %v5013_v55  ;;  %v5099_v52 = vpop.f32.mrf.mxu2  ;;  %v5101_v55 = vpop.f32.mrf.mxu3 }
  0xb2   :  { %8474 = vst [vmem:[#allocation12_spill] sm:$0xff] %v5101_v55 }
  0xb5   :  { %v5077_v35 = vpop.f32.mrf.mxu1 }
  0xb6   :  { %v5075_v34 = vpop.f32.mrf.mxu0 }
  0xb8   :  { %570 = vmatmul.f32.gmra.mxu1 %v5021_v62 }
  0xb9   :  { %504 = vmatmul.f32.gmra.mxu0 %v5021_v62  ;;  %v5103_v56 = vpop.f32.mrf.mxu2  ;;  %v5109_v59 = vpop.f32.mrf.mxu3 }
  0xba   :  { %8477 = vst [vmem:[#allocation15_spill] sm:$0xff] %v5109_v59 }
  0xbd   :  { %v5083_v37 = vpop.f32.mrf.mxu1 }
  0xbe   :  { %v5081_v36 = vpop.f32.mrf.mxu0 }
  0xbf   :  { %v257_v44 = vadd.f32 %v5083_v37, %v5081_v36  ;;  %v241_v37 = vadd.f32 %v5059_v32, %v5057_v6  ;;  %v237_v6 = vadd.f32 %v5053_v31, %v5051_v30 }
  0xc0   :  { %574 = vmatmul.f32.gmra.mxu1 %v5029_v5 }
  0xc1   :  { %508 = vmatmul.f32.gmra.mxu0 %v5029_v5  ;;  %v324_v62 = vpop.f32.mrf.mxu2  ;;  %v5115_v63 = vpop.f32.mrf.mxu3  ;;  %v310_v32 = vadd.f32 %v5095_v48, %v241_v37  ;;  %v8487_v48 = vld [vmem:[#allocation9_spill] sm:$0xff] }
  0xc5   :  { %v5089_v39 = vpop.f32.mrf.mxu1 }
  0xc6   :  { %v5087_v38 = vpop.f32.mrf.mxu0 }
  0xc8   :  { %578 = vmatmul.f32.gmra.mxu1 %v196_v14 }
  0xc9   :  { %512 = vmatmul.f32.gmra.mxu0 %v196_v14  ;;  %v329_v2 = vpop.f32.mrf.mxu2  ;;  %v413_v3 = vpop.f32.mrf.mxu3 }
  0xcd   :  { %v264_v41 = vpop.f32.mrf.mxu1 }
  0xce   :  { %v178_v40 = vpop.f32.mrf.mxu0 }
  0xd0   :  { %582 = vmatmul.f32.gmra.mxu1 %v204_v22 }
  0xd1   :  { %516 = vmatmul.f32.gmra.mxu0 %v204_v22  ;;  %v334_v8 = vpop.f32.mrf.mxu2  ;;  %v419_v11 = vpop.f32.mrf.mxu3 }
  0xd5   :  { %v268_v43 = vpop.f32.mrf.mxu1 }
  0xd6   :  { %v186_v42 = vpop.f32.mrf.mxu0 }
  0xd9   :  { %v339_v12 = vpop.f32.mrf.mxu2  ;;  %v425_v15 = vpop.f32.mrf.mxu3 }
  0xdd   :  { %v272_v47 = vpop.f32.mrf.mxu1 }
  0xde   :  { %v194_v46 = vpop.f32.mrf.mxu0 }
  0xe1   :  { %v344_v19 = vpop.f32.mrf.mxu2  ;;  %v431_v20 = vpop.f32.mrf.mxu3 }
  0xe5   :  { %v276_v51 = vpop.f32.mrf.mxu1 }
  0xe6   :  { %v202_v50 = vpop.f32.mrf.mxu0 }
  0xe7   :  { %v277_v29 = vadd.f32 %v276_v51, %v202_v50 }
  0xe9   :  { %v349_v23 = vpop.f32.mrf.mxu2  ;;  %v437_v24 = vpop.f32.mrf.mxu3 }
  0xed   :  { %v280_v54 = vpop.f32.mrf.mxu1 }
  0xee   :  { %v210_v53 = vpop.f32.mrf.mxu0 }
  0xf1   :  { %v354_v28 = vpop.f32.mrf.mxu2 }
  0xf5   :  { %v5107_v58 = vpop.f32.mrf.mxu1 }
  0xf6   :  { %v5105_v57 = vpop.f32.mrf.mxu0  ;;  %8476 = vst [vmem:[#allocation14_spill] sm:$0xff] %v5107_v58  ;;  %v273_v58 = vadd.f32 %v272_v47, %v194_v46 }
  0xf7   :  { %8475 = vst [vmem:[#allocation13_spill] sm:$0xff] %v5105_v57  ;;  %v269_v57 = vadd.f32 %v268_v43, %v186_v42  ;;  %v253_v42 = vadd.f32 %v5077_v35, %v5075_v34  ;;  %v245_v35 = vadd.f32 %v5065_v18, %v5063_v7 }
  0xf8   :  { %v350_v45 = vadd.f32 %v349_v23, %v273_v58 }
  0xf9   :  { %v345_v55 = vadd.f32 %v344_v19, %v269_v57  ;;  %v359_v49 = vpop.f32.mrf.mxu2 }
  0xfa   :  { %v438_v50 = vadd.f32 %v437_v24, %v350_v45  ;;  %v325_v45 = vadd.f32 %v324_v62, %v253_v42  ;;  %v8493_v42 = vld [vmem:[#allocation10_spill] sm:$0xff] }
  0xfd   :  { %v5113_v61 = vpop.f32.mrf.mxu1 }
  0xfe   :  { %v5111_v60 = vpop.f32.mrf.mxu0  ;;  %8479 = vst [vmem:[#allocation17_spill] sm:$0xff] %v5113_v61 }
  0xff   :  { %8478 = vst [vmem:[#allocation16_spill] sm:$0xff] %v5111_v60  ;;  %v265_v60 = vadd.f32 %v264_v41, %v178_v40  ;;  %v432_v41 = vadd.f32 %v431_v20, %v345_v55 }
 0x101   :  { %v340_v59 = vadd.f32 %v339_v12, %v265_v60  ;;  %v8488_v12 = vld [vmem:[#allocation11_spill] sm:$0xff] }
 0x105   :  { %v5119_v1 = vpop.f32.mrf.mxu1 }
 0x106   :  { %v5117_v0 = vpop.f32.mrf.mxu0  ;;  %8481 = vst [vmem:[#allocation19_spill] sm:$0xff] %v5119_v1 }
 0x107   :  { %8480 = vst [vmem:[#allocation18_spill] sm:$0xff] %v5117_v0  ;;  %v355_v0 = vadd.f32 %v354_v28, %v277_v29 }
 0x10d   :  { %v5123_v5 = vpop.f32.mrf.mxu1 }
 0x10e   :  { %v5121_v4 = vpop.f32.mrf.mxu0  ;;  %8483 = vst [vmem:[#allocation21_spill] sm:$0xff] %v5123_v5  ;;  %v443_v5 = vpop.f32.mrf.mxu3 }
 0x10f   :  { %8482 = vst [vmem:[#allocation20_spill] sm:$0xff] %v5121_v4  ;;  %v281_v4 = vadd.f32 %v280_v54, %v210_v53  ;;  %v330_v53 = vadd.f32 %v329_v2, %v257_v44  ;;  %v426_v54 = vadd.f32 %v425_v15, %v340_v59 }
 0x115   :  { %v5127_v10 = vpop.f32.mrf.mxu1 }
 0x116   :  { %v5125_v9 = vpop.f32.mrf.mxu0  ;;  %8484 = vst [vmem:[#allocation22_spill] sm:$0xff] %v5127_v10  ;;  %v261_v10 = vadd.f32 %v5089_v39, %v5087_v38  ;;  %v249_v38 = vadd.f32 %v5071_v33, %v5069_v27  ;;  %v360_v39 = vadd.f32 %v359_v49, %v281_v4  ;;  %v449_v57 = vpop.f32.mrf.mxu3  ;;  %v414_v33 = vadd.f32 %v413_v3, %v330_v53  ;;  %v8489_v15 = vld [vmem:[#allocation20_spill] sm:$0xff]  ;;  %v8496_v53 = vld [vmem:[#allocation21_spill] sm:$0xff] }
 0x118   :  { %v335_v43 = vadd.f32 %v334_v8, %v261_v10  ;;  %v450_v55 = vadd.f32 %v449_v57, %v360_v39  ;;  %v320_v27 = vadd.f32 %v5103_v56, %v249_v38  ;;  %v315_v56 = vadd.f32 %v5099_v52, %v245_v35  ;;  %v8486_v10 = vld [vmem:[#allocation15_spill] sm:$0xff]  ;;  %v586_v52 = vld [vmem:[%s8324_s2] sm:$0xff] }
 0x11a   :  { %v420_v60 = vadd.f32 %v419_v11, %v335_v43  ;;  %v402_v11 = vadd.f32 %v8486_v10, %v320_v27  ;;  %v8501_v10 = vld [vmem:[#allocation14_spill] sm:$0xff] }
 0x11d   :  { %v5131_v14 = vpop.f32.mrf.mxu1  ;;  %v8492_v24 = vld [vmem:[#allocation22_spill] sm:$0xff] }
 0x11e   :  { %v5129_v13 = vpop.f32.mrf.mxu0  ;;  %8485 = vst [vmem:[#allocation23_spill] sm:$0xff] %v5131_v14  ;;  %v444_v14 = vadd.f32 %v443_v5, %v355_v0 }
 0x11f   :  { %v494_v7 = vadd.f32 %v5129_v13, %v414_v33  ;;  %v390_v13 = vadd.f32 %v8488_v12, %v310_v32  ;;  %v8499_v33 = vld [vmem:[#allocation17_spill] sm:$0xff] }
 0x125   :  { %v5133_v17 = vpop.f32.mrf.mxu1 }
 0x126   :  { %v497_v16 = vpop.f32.mrf.mxu0 }
 0x12d   :  { %v567_v22 = vpop.f32.mrf.mxu1 }
 0x12e   :  { %v501_v21 = vpop.f32.mrf.mxu0 }
 0x12f   :  { %v502_v0 = vadd.f32 %v501_v21, %v426_v54 }
 0x131   :  { %v568_v18 = vadd.f32 %v567_v22, %v502_v0  ;;  %v8491_v22 = vld [vmem:[#allocation12_spill] sm:$0xff] }
 0x132   :  { %v396_v23 = vadd.f32 %v8491_v22, %v315_v56  ;;  %v605_v56 = vld [vmem:[%s8324_s2 + $0x98] sm:$0xff] }
 0x133   :  { %v5178_v20 = vand.u32 4294901760, %v568_v18 }
 0x135   :  { %v571_v26 = vpop.f32.mrf.mxu1 }
 0x136   :  { %v505_v25 = vpop.f32.mrf.mxu0 }
 0x137   :  { %v506_v58 = vadd.f32 %v505_v25, %v432_v41 }
 0x139   :  { %v572_v44 = vadd.f32 %v571_v26, %v506_v58  ;;  %v5208_v58 = vsub.f32 %v568_v18, %v5178_v20  ;;  %v587_v18 = vld [vmem:[%s8324_s2 + $0x8] sm:$0xff] }
 0x13b   :  { %v5161_v30 = vand.u32 4294901760, %v572_v44 }
 0x13d   :  { %v575_v61 = vpop.f32.mrf.mxu1  ;;  %v5193_v29 = vsub.f32 %v572_v44, %v5161_v30 }
 0x13e   :  { %v509_v1 = vpop.f32.mrf.mxu0 }
 0x13f   :  { %v510_v51 = vadd.f32 %v509_v1, %v438_v50  ;;  %v498_v1 = vadd.f32 %v497_v16, %v420_v60  ;;  %v486_v16 = vadd.f32 %v8489_v15, %v402_v11  ;;  %v1216_v27 = vand.u32 4294901760, %v5193_v29 }
 0x140   :  { %v693_v15 = vsel %vm634_vm1, %v605_v56, 0 }
 0x141   :  { %v576_v34 = vadd.f32 %v575_v61, %v510_v51  ;;  %v408_v61 = vadd.f32 %v5115_v63, %v325_v45  ;;  %v564_v5 = vadd.f32 %v5133_v17, %v498_v1  ;;  %v305_v63 = vadd.f32 %v8487_v48, %v237_v6  ;;  %v8490_v17 = vld [vmem:[#allocation23_spill] sm:$0xff]  ;;  %v8495_v51 = vld [vmem:[#allocation18_spill] sm:$0xff] }
 0x142   :  { %v560_v19 = vadd.f32 %v8490_v17, %v494_v7  ;;  %v482_v38 = vadd.f32 %v8495_v51, %v396_v23  ;;  %v552_v54 = vadd.f32 %v8496_v53, %v486_v16  ;;  %v1222_v7 = vand.u32 4294901760, %v5208_v58 }
 0x143   :  { %v5155_v4 = vand.u32 4294901760, %v576_v34  ;;  %v490_v3 = vadd.f32 %v5125_v9, %v408_v61  ;;  %v604_v9 = vld [vmem:[%s8324_s2 + $0x90] sm:$0xff]  ;;  %v5185_v26 = vand.u32 4294901760, %v564_v5  ;;  %v384_v43 = vadd.f32 %v8493_v42, %v305_v63 }
 0x144   :  { %v5205_v57 = vand.u32 4294901760, %v560_v19  ;;  %v5234_v32 = vand.u32 4294901760, %v552_v54  ;;  %v1217_v63 = vsub.f32 %v5193_v29, %v1216_v27 }
 0x145   :  { %v579_v47 = vpop.f32.mrf.mxu1  ;;  %v5181_v21 = vsub.f32 %v576_v34, %v5155_v4  ;;  %v556_v25 = vadd.f32 %v8492_v24, %v490_v3  ;;  %v8498_v34 = vld [vmem:[#allocation13_spill] sm:$0xff] }
 0x146   :  { %v513_v46 = vpop.f32.mrf.mxu0  ;;  %v474_v35 = vadd.f32 %v8498_v34, %v384_v43  ;;  %v5237_v61 = vsub.f32 %v560_v19, %v5205_v57  ;;  %v5274_v16 = vsub.f32 %v552_v54, %v5234_v32  ;;  %v1223_v19 = vsub.f32 %v5208_v58, %v1222_v7 }
 0x147   :  { %v514_v40 = vadd.f32 %v513_v46, %v444_v14  ;;  %v636_v46 = vsel %vm634_vm1, %v586_v52, 0  ;;  %v5211_v37 = vand.u32 4294901760, %v556_v25  ;;  %v5290_v43 = vand.u32 4294901760, %v693_v15 }
 0x148   :  { %v5218_v60 = vand.u32 4294901760, %v636_v46  ;;  %v540_v11 = vadd.f32 %v8501_v10, %v474_v35  ;;  %v1234_v22 = vand.u32 4294901760, %v5237_v61  ;;  %v1246_v54 = vand.u32 4294901760, %v5274_v16 }
 0x149   :  { %v580_v36 = vadd.f32 %v579_v47, %v514_v40  ;;  %v690_v47 = vsel %vm634_vm1, %v604_v9, 0  ;;  %v8494_v40 = vld [vmem:[#allocation16_spill] sm:$0xff]  ;;  %v5250_v3 = vsub.f32 %v556_v25, %v5211_v37  ;;  %v639_v9 = vsel %vm634_vm1, %v587_v18, 0  ;;  %8502 = vst [vmem:[#allocation9_spill] sm:$0xff] %v5290_v43 }
 0x14a   :  { %v478_v41 = vadd.f32 %v8494_v40, %v390_v13  ;;  %v5220_v0 = vand.u32 4294901760, %v690_v47  ;;  %v5288_v42 = vand.u32 4294901760, %v639_v9  ;;  %v5292_v40 = vand.u32 4294901760, %v540_v11 }
 0x14b   :  { %v5148_v49 = vand.u32 4294901760, %v580_v36  ;;  %v1240_v23 = vand.u32 4294901760, %v5250_v3  ;;  %v1235_v53 = vsub.f32 %v5237_v61, %v1234_v22  ;;  %v1247_v56 = vsub.f32 %v5274_v16, %v1246_v54 }
 0x14c   :  { %8497 = vst [vmem:[#allocation15_spill] sm:$0xff] %v5220_v0  ;;  %v544_v44 = vadd.f32 %v8499_v33, %v478_v41  ;;  %v5318_v33 = vsub.f32 %v639_v9, %v5288_v42 }
 0x14d   :  { %v583_v2 = vpop.f32.mrf.mxu1  ;;  %v5164_v31 = vsub.f32 %v580_v36, %v5148_v49  ;;  %v1210_v36 = vand.u32 4294901760, %v5181_v21  ;;  %v1236_v18 = vand.u32 4294901760, %v1235_v53 }
 0x14e   :  { %v517_v59 = vpop.f32.mrf.mxu0  ;;  %v5265_v13 = vand.u32 4294901760, %v544_v44 }
 0x14f   :  { %v518_v62 = vadd.f32 %v517_v59, %v450_v55  ;;  %v1204_v50 = vand.u32 4294901760, %v5164_v31  ;;  %v5224_v55 = vsub.f32 %v564_v5, %v5185_v26  ;;  %v8500_v59 = vld [vmem:[#allocation19_spill] sm:$0xff]  ;;  %v5255_v5 = vsub.f32 %v636_v46, %v5218_v60 }
 0x150   :  { %v1218_v46 = vand.u32 4294901760, %v1217_v63  ;;  %v5300_v51 = vsub.f32 %v544_v44, %v5265_v13  ;;  %v5321_v44 = vsub.f32 %v693_v15, %v5290_v43 }
 0x151   :  { %v584_v8 = vadd.f32 %v583_v2, %v518_v62  ;;  %v1205_v1 = vsub.f32 %v5164_v31, %v1204_v50  ;;  %v548_v2 = vadd.f32 %v8500_v59, %v482_v38  ;;  %v1211_v62 = vsub.f32 %v5181_v21, %v1210_v36  ;;  %v588_v59 = vld [vmem:[%s8324_s2 + $0x10] sm:$0xff] }
 0x152   :  { %v1228_v12 = vand.u32 4294901760, %v5224_v55  ;;  %v8350_v24 = vand.u32 4294901760, %v5255_v5  ;;  %v1224_v38 = vand.u32 4294901760, %v1223_v19  ;;  %v1258_v10 = vand.u32 4294901760, %v5300_v51 }
 0x153   :  { %v5168_v14 = vand.u32 4294901760, %v584_v8  ;;  %v1206_v48 = vand.u32 4294901760, %v1205_v1  ;;  %v5267_v52 = vand.u32 4294901760, %v548_v2  ;;  %v1212_v17 = vand.u32 4294901760, %v1211_v62 }
 0x154   :  { %v1241_v1 = vsub.f32 %v5250_v3, %v1240_v23  ;;  %v642_v63 = vsel %vm634_vm1, %v588_v59, 0  ;;  %v8335_v19 = vand.u32 4294901760, %v5321_v44 }
 0x155   :  { %v5188_v28 = vsub.f32 %v584_v8, %v5168_v14  ;;  %784 = vmatpush.msra.mxu0 %v5168_v14  ;;  %4296 = vmatpush.msrb.mxu2 %v5168_v14  ;;  %v5258_v8 = vsub.f32 %v690_v47, %v5220_v0  ;;  %v1229_v47 = vsub.f32 %v5224_v55, %v1228_v12 }
 0x156   :  { %v5295_v41 = vsub.f32 %v548_v2, %v5267_v52  ;;  %v606_v2 = vld [vmem:[%s8324_s2 + $0xa0] sm:$0xff]  ;;  %v1242_v15 = vand.u32 4294901760, %v1241_v1  ;;  %v962_v1 = vsub.f32 %v5321_v44, %v8335_v19 }
 0x157   :  { %v1198_v39 = vand.u32 4294901760, %v5188_v28  ;;  %786 = vmatpush.msra.mxu0 %v5148_v49  ;;  %4297 = vmatpush.msrb.mxu2 %v5148_v49  ;;  %v8336_v25 = vand.u32 4294901760, %v5258_v8  ;;  %v1230_v35 = vand.u32 4294901760, %v1229_v47  ;;  %v696_v9 = vsel %vm634_vm1, %v606_v2, 0 }
 0x158   :  { %v1252_v62 = vand.u32 4294901760, %v5295_v41  ;;  %v5353_v53 = vand.u32 4294901760, %v696_v9 }
 0x159   :  { %788 = vmatpush.msra.mxu0 %v5155_v4  ;;  %4298 = vmatpush.msrb.mxu2 %v5155_v4  ;;  %v1199_v45 = vsub.f32 %v5188_v28, %v1198_v39  ;;  %v954_v34 = vsub.f32 %v5258_v8, %v8336_v25 }
 0x15a   :  { %8503 = vst [vmem:[#allocation11_spill] sm:$0xff] %v5353_v53 }
 0x15b   :  { %790 = vmatpush.msra.mxu0 %v5161_v30  ;;  %4299 = vmatpush.msrb.mxu2 %v5161_v30  ;;  %v1200_v6 = vand.u32 4294901760, %v1199_v45  ;;  %v810_v45 = vsub.f32 %v5255_v5, %v8350_v24 }
 0x15d   :  { %792 = vmatpush.msra.mxu0 %v5178_v20  ;;  %4300 = vmatpush.msrb.mxu2 %v5178_v20 }
 0x15e   :  { %1201 = vmatpush.msra.mxu1 %v1200_v6  ;;  %4308 = vmatpush.msrb.mxu3 %v1200_v6  ;;  %v5330_v6 = vsub.f32 %v540_v11, %v5292_v40  ;;  %v811_v11 = vand.u32 4294901760, %v810_v45  ;;  %v1248_v45 = vand.u32 4294901760, %v1247_v56  ;;  %v607_v56 = vld [vmem:[%s8324_s2 + $0xa8] sm:$0xff] }
 0x15f   :  { %794 = vmatpush.msra.mxu0 %v5185_v26  ;;  %4301 = vmatpush.msrb.mxu2 %v5185_v26 }
 0x160   :  { %1207 = vmatpush.msra.mxu1 %v1206_v48  ;;  %4309 = vmatpush.msrb.mxu3 %v1206_v48  ;;  %v955_v48 = vand.u32 4294901760, %v954_v34  ;;  %v1264_v47 = vand.u32 4294901760, %v5330_v6  ;;  %v1259_v34 = vsub.f32 %v5300_v51, %v1258_v10 }
 0x161   :  { %796 = vmatpush.msra.mxu0 %v5205_v57  ;;  %4302 = vmatpush.msrb.mxu2 %v5205_v57 }
 0x162   :  { %1213 = vmatpush.msra.mxu1 %v1212_v17  ;;  %4310 = vmatpush.msrb.mxu3 %v1212_v17  ;;  %v8348_v17 = vand.u32 4294901760, %v5318_v33  ;;  %v1265_v2 = vsub.f32 %v5330_v6, %v1264_v47 }
 0x163   :  { %798 = vmatpush.msra.mxu0 %v5211_v37  ;;  %4303 = vmatpush.msrb.mxu2 %v5211_v37 }
 0x164   :  { %1219 = vmatpush.msra.mxu1 %v1218_v46  ;;  %4311 = vmatpush.msrb.mxu3 %v1218_v46  ;;  %v1253_v46 = vsub.f32 %v5295_v41, %v1252_v62 }
 0x165   :  { %800 = vmatpush.msra.mxu0 %v5234_v32  ;;  %4304 = vmatpush.msrb.mxu2 %v5234_v32 }
 0x166   :  { %1225 = vmatpush.msra.mxu1 %v1224_v38  ;;  %4312 = vmatpush.msrb.mxu3 %v1224_v38  ;;  %v5351_v38 = vand.u32 4294901760, %v642_v63  ;;  %v1254_v59 = vand.u32 4294901760, %v1253_v46 }
 0x167   :  { %802 = vmatpush.msra.mxu0 %v5267_v52  ;;  %4305 = vmatpush.msrb.mxu2 %v5267_v52 }
 0x168   :  { %1231 = vmatpush.msra.mxu1 %v1230_v35  ;;  %4313 = vmatpush.msrb.mxu3 %v1230_v35  ;;  %v818_v35 = vsub.f32 %v5318_v33, %v8348_v17 }
 0x169   :  { %804 = vmatpush.msra.mxu0 %v5265_v13  ;;  %4306 = vmatpush.msrb.mxu2 %v5265_v13 }
 0x16a   :  { %1237 = vmatpush.msra.mxu1 %v1236_v18  ;;  %4314 = vmatpush.msrb.mxu3 %v1236_v18  ;;  %v589_v18 = vld [vmem:[%s8324_s2 + $0x18] sm:$0xff] }
 0x16b   :  { %806 = vmatpush.msra.mxu0 %v5292_v40  ;;  %4307 = vmatpush.msrb.mxu2 %v5292_v40 }
 0x16c   :  { %1243 = vmatpush.msra.mxu1 %v1242_v15  ;;  %4315 = vmatpush.msrb.mxu3 %v1242_v15 }
 0x16d   :  { %812 = vmatmul.f32.vlgmr.msra.gmra.mxu0 %v811_v11  ;;  %956 = vmatmul.f32.vlgmr.msrb.gmra.mxu2 %v955_v48  ;;  %v1260_v11 = vand.u32 4294901760, %v1259_v34  ;;  %v1266_v48 = vand.u32 4294901760, %v1265_v2  ;;  %v608_v34 = vld [vmem:[%s8324_s2 + $0xb0] sm:$0xff] }
 0x16e   :  { %1467 = vmatpush.msrb.mxu0 %v5188_v28  ;;  %2066 = vmatpush.msra.mxu2 %v1198_v39  ;;  %v5374_v28 = vsub.f32 %v642_v63, %v5351_v38  ;;  %v5377_v39 = vsub.f32 %v696_v9, %v5353_v53  ;;  %v645_v63 = vsel %vm634_vm1, %v589_v18, 0  ;;  %v699_v9 = vsel %vm634_vm1, %v607_v56, 0 }
 0x16f   :  { %1249 = vmatpush.msra.mxu1 %v1248_v45  ;;  %4316 = vmatpush.msrb.mxu3 %v1248_v45  ;;  %v590_v45 = vld [vmem:[%s8324_s2 + $0x20] sm:$0xff] }
 0x170   :  { %1470 = vmatpush.msrb.mxu0 %v5164_v31  ;;  %2070 = vmatpush.msra.mxu2 %v1204_v50  ;;  %v819_v31 = vand.u32 4294901760, %v818_v35  ;;  %v963_v50 = vand.u32 4294901760, %v962_v1  ;;  %v8347_v15 = vand.u32 4294901760, %v5374_v28  ;;  %v8333_v46 = vand.u32 4294901760, %v5377_v39 }
 0x171   :  { %1255 = vmatpush.msra.mxu1 %v1254_v59  ;;  %4317 = vmatpush.msrb.mxu3 %v1254_v59  ;;  %v702_v59 = vsel %vm634_vm1, %v608_v34, 0 }
 0x172   :  { %1473 = vmatpush.msrb.mxu0 %v5181_v21  ;;  %2074 = vmatpush.msra.mxu2 %v1210_v36  ;;  %v5395_v21 = vand.u32 4294901760, %v645_v63  ;;  %v5397_v36 = vand.u32 4294901760, %v699_v9  ;;  %v5445_v2 = vand.u32 4294901760, %v702_v59 }
 0x173   :  { %1261 = vmatpush.msra.mxu1 %v1260_v11  ;;  %4318 = vmatpush.msrb.mxu3 %v1260_v11 }
 0x174   :  { %1476 = vmatpush.msrb.mxu0 %v5193_v29  ;;  %2078 = vmatpush.msra.mxu2 %v1216_v27  ;;  %8504 = vst [vmem:[#allocation20_spill] sm:$0xff] %v5397_v36  ;;  %v826_v29 = vsub.f32 %v5374_v28, %v8347_v15  ;;  %v970_v27 = vsub.f32 %v5377_v39, %v8333_v46 }
 0x175   :  { %1267 = vmatpush.msra.mxu1 %v1266_v48  ;;  %4319 = vmatpush.msrb.mxu3 %v1266_v48  ;;  %v5421_v35 = vsub.f32 %v645_v63, %v5395_v21  ;;  %v5424_v1 = vsub.f32 %v699_v9, %v5397_v36  ;;  %8505 = vst [vmem:[#allocation23_spill] sm:$0xff] %v5445_v2 }
 0x176   :  { %820 = vmatmul.f32.gmra.mxu0 %v819_v31  ;;  %964 = vmatmul.f32.gmra.mxu2 %v963_v50 }
 0x177   :  { %1269 = vmatmul.f32.vlgmr.msra.gmra.mxu1 %v5218_v60  ;;  %1341 = vmatmul.f32.vlgmr.msrb.gmra.mxu3 %v5220_v0 }
 0x178   :  { %1479 = vmatpush.msrb.mxu0 %v5208_v58  ;;  %1747 = vmatpush.msrb.mxu1 %v5168_v14  ;;  %v827_v58 = vand.u32 4294901760, %v826_v29 }
 0x179   :  { %2082 = vmatpush.msra.mxu2 %v1222_v7  ;;  %2309 = vmatpush.msra.mxu3 %v5168_v14  ;;  %v648_v14 = vsel %vm634_vm1, %v590_v45, 0  ;;  %v971_v7 = vand.u32 4294901760, %v970_v27 }
 0x17a   :  { %1482 = vmatpush.msrb.mxu0 %v5224_v55  ;;  %1749 = vmatpush.msrb.mxu1 %v5148_v49  ;;  %v8332_v55 = vand.u32 4294901760, %v5424_v1 }
 0x17b   :  { %2086 = vmatpush.msra.mxu2 %v1228_v12  ;;  %2311 = vmatpush.msra.mxu3 %v5148_v49  ;;  %v8346_v49 = vand.u32 4294901760, %v5421_v35  ;;  %v5440_v12 = vand.u32 4294901760, %v648_v14 }
 0x17c   :  { %1485 = vmatpush.msrb.mxu0 %v5237_v61  ;;  %1751 = vmatpush.msrb.mxu1 %v5155_v4  ;;  %v609_v61 = vld [vmem:[%s8324_s2 + $0xb8] sm:$0xff] }
 0x17d   :  { %2090 = vmatpush.msra.mxu2 %v1234_v22  ;;  %2313 = vmatpush.msra.mxu3 %v5155_v4  ;;  %v591_v4 = vld [vmem:[%s8324_s2 + $0x28] sm:$0xff]  ;;  %v5464_v22 = vsub.f32 %v648_v14, %v5440_v12  ;;  %v705_v56 = vsel %vm634_vm1, %v609_v61, 0 }
 0x17e   :  { %1488 = vmatpush.msrb.mxu0 %v5250_v3  ;;  %1753 = vmatpush.msrb.mxu1 %v5161_v30  ;;  %v978_v3 = vsub.f32 %v5424_v1, %v8332_v55  ;;  %v651_v18 = vsel %vm634_vm1, %v591_v4, 0 }
 0x17f   :  { %2094 = vmatpush.msra.mxu2 %v1240_v23  ;;  %2315 = vmatpush.msra.mxu3 %v5161_v30  ;;  %v834_v30 = vsub.f32 %v5421_v35, %v8346_v49  ;;  %v5470_v23 = vsub.f32 %v702_v59, %v5445_v2  ;;  %v5486_v31 = vand.u32 4294901760, %v651_v18 }
 0x180   :  { %828 = vmatmul.f32.gmra.mxu0 %v827_v58  ;;  %972 = vmatmul.f32.gmra.mxu2 %v971_v7 }
 0x181   :  { %1273 = vmatmul.f32.gmra.mxu1 %v5288_v42  ;;  %1345 = vmatmul.f32.gmra.mxu3 %v5290_v43  ;;  %v8331_v11 = vand.u32 4294901760, %v5470_v23 }
 0x182   :  { %1491 = vmatpush.msrb.mxu0 %v5274_v16  ;;  %1755 = vmatpush.msrb.mxu1 %v5178_v20  ;;  %v979_v16 = vand.u32 4294901760, %v978_v3 }
 0x183   :  { %2098 = vmatpush.msra.mxu2 %v1246_v54  ;;  %2317 = vmatpush.msra.mxu3 %v5178_v20  ;;  %v835_v20 = vand.u32 4294901760, %v834_v30  ;;  %v8344_v54 = vand.u32 4294901760, %v5464_v22 }
 0x184   :  { %1494 = vmatpush.msrb.mxu0 %v5295_v41  ;;  %1757 = vmatpush.msrb.mxu1 %v5185_v26  ;;  %v5488_v41 = vand.u32 4294901760, %v705_v56 }
 0x185   :  { %2102 = vmatpush.msra.mxu2 %v1252_v62  ;;  %2319 = vmatpush.msra.mxu3 %v5185_v26  ;;  %v592_v26 = vld [vmem:[%s8324_s2 + $0x30] sm:$0xff] }
 0x186   :  { %1497 = vmatpush.msrb.mxu0 %v5300_v51  ;;  %1759 = vmatpush.msrb.mxu1 %v5205_v57  ;;  %8506 = vst [vmem:[#allocation12_spill] sm:$0xff] %v5488_v41  ;;  %v842_v51 = vsub.f32 %v5464_v22, %v8344_v54  ;;  %v5513_v62 = vsub.f32 %v705_v56, %v5488_v41  ;;  %v612_v56 = vld [vmem:[%s8324_s2 + $0xd0] sm:$0xff] }
 0x187   :  { %2106 = vmatpush.msra.mxu2 %v1258_v10  ;;  %2321 = vmatpush.msra.mxu3 %v5205_v57  ;;  %v610_v57 = vld [vmem:[%s8324_s2 + $0xc0] sm:$0xff]  ;;  %v654_v10 = vsel %vm634_vm1, %v592_v26, 0 }
 0x188   :  { %1500 = vmatpush.msrb.mxu0 %v5330_v6  ;;  %1761 = vmatpush.msrb.mxu1 %v5211_v37  ;;  %v986_v6 = vsub.f32 %v5470_v23, %v8331_v11  ;;  %v843_v50 = vand.u32 4294901760, %v842_v51  ;;  %v5521_v48 = vand.u32 4294901760, %v654_v10  ;;  %v8330_v29 = vand.u32 4294901760, %v5513_v62 }
 0x189   :  { %2110 = vmatpush.msra.mxu2 %v1264_v47  ;;  %2323 = vmatpush.msra.mxu3 %v5211_v37  ;;  %v5510_v37 = vsub.f32 %v651_v18, %v5486_v31  ;;  %v708_v47 = vsel %vm634_vm1, %v610_v57, 0  ;;  %v594_v18 = vld [vmem:[%s8324_s2 + $0x40] sm:$0xff] }
 0x18a   :  { %836 = vmatmul.f32.gmra.mxu0 %v835_v20  ;;  %980 = vmatmul.f32.gmra.mxu2 %v979_v16  ;;  %v987_v63 = vand.u32 4294901760, %v986_v6  ;;  %v5525_v27 = vand.u32 4294901760, %v708_v47  ;;  %v5538_v45 = vsub.f32 %v654_v10, %v5521_v48  ;;  %v994_v34 = vsub.f32 %v5513_v62, %v8330_v29 }
 0x18b   :  { %1277 = vmatmul.f32.gmra.mxu1 %v5351_v38  ;;  %1349 = vmatmul.f32.gmra.mxu3 %v5353_v53  ;;  %v8342_v9 = vand.u32 4294901760, %v5510_v37  ;;  %v660_v51 = vsel %vm634_vm1, %v594_v18, 0  ;;  %v714_v6 = vsel %vm634_vm1, %v612_v56, 0 }
 0x18c   :  { %1763 = vmatpush.msrb.mxu1 %v5234_v32  ;;  %2325 = vmatpush.msra.mxu3 %v5234_v32  ;;  %8507 = vst [vmem:[#allocation22_spill] sm:$0xff] %v5525_v27  ;;  %v593_v32 = vld [vmem:[%s8324_s2 + $0x38] sm:$0xff]  ;;  %v5547_v14 = vsub.f32 %v708_v47, %v5525_v27  ;;  %v8341_v7 = vand.u32 4294901760, %v5538_v45  ;;  %v995_v61 = vand.u32 4294901760, %v994_v34 }
 0x18d   :  { %v657_v58 = vsel %vm634_vm1, %v593_v32, 0  ;;  %v5583_v32 = vand.u32 4294901760, %v660_v51  ;;  %v613_v34 = vld [vmem:[%s8324_s2 + $0xd8] sm:$0xff] }
 0x18e   :  { %1765 = vmatpush.msrb.mxu1 %v5267_v52  ;;  %2327 = vmatpush.msra.mxu3 %v5267_v52  ;;  %v611_v52 = vld [vmem:[%s8324_s2 + $0xc8] sm:$0xff]  ;;  %v5554_v59 = vand.u32 4294901760, %v657_v58  ;;  %v8329_v30 = vand.u32 4294901760, %v5547_v14  ;;  %v858_v20 = vsub.f32 %v5538_v45, %v8341_v7  ;;  %v717_v56 = vsel %vm634_vm1, %v613_v34, 0 }
 0x190   :  { %1767 = vmatpush.msrb.mxu1 %v5265_v13  ;;  %2329 = vmatpush.msra.mxu3 %v5265_v13  ;;  %v850_v13 = vsub.f32 %v5510_v37, %v8342_v9  ;;  %v5569_v16 = vsub.f32 %v657_v58, %v5554_v59  ;;  %v1002_v26 = vsub.f32 %v5547_v14, %v8329_v30  ;;  %v859_v10 = vand.u32 4294901760, %v858_v20 }
 0x192   :  { %1769 = vmatpush.msrb.mxu1 %v5292_v40  ;;  %2331 = vmatpush.msra.mxu3 %v5292_v40  ;;  %v711_v40 = vsel %vm634_vm1, %v611_v52, 0  ;;  %v851_v4 = vand.u32 4294901760, %v850_v13  ;;  %v8339_v47 = vand.u32 4294901760, %v5569_v16  ;;  %v5585_v52 = vand.u32 4294901760, %v714_v6  ;;  %v595_v13 = vld [vmem:[%s8324_s2 + $0x48] sm:$0xff] }
 0x193   :  { %844 = vmatmul.f32.gmra.mxu0 %v843_v50  ;;  %988 = vmatmul.f32.gmra.mxu2 %v987_v63  ;;  %v5557_v3 = vand.u32 4294901760, %v711_v40  ;;  %v1003_v50 = vand.u32 4294901760, %v1002_v26  ;;  %v663_v18 = vsel %vm634_vm1, %v595_v13, 0  ;;  %v614_v13 = vld [vmem:[%s8324_s2 + $0xe0] sm:$0xff] }
 0x194   :  { %1281 = vmatmul.f32.gmra.mxu1 %v5395_v21  ;;  %1353 = vmatmul.f32.gmra.mxu3 %v5397_v36  ;;  %8509 = vst [vmem:[#allocation16_spill] sm:$0xff] %v5585_v52  ;;  %v866_v58 = vsub.f32 %v5569_v16, %v8339_v47  ;;  %v5609_v26 = vand.u32 4294901760, %v663_v18 }
 0x195   :  { %8508 = vst [vmem:[#allocation10_spill] sm:$0xff] %v5557_v3  ;;  %v5575_v57 = vsub.f32 %v711_v40, %v5557_v3 }
 0x196   :  { %v867_v20 = vand.u32 4294901760, %v866_v58  ;;  %v5622_v34 = vsub.f32 %v663_v18, %v5609_v26  ;;  %v720_v18 = vsel %vm634_vm1, %v614_v13, 0 }
 0x197   :  { %v8328_v63 = vand.u32 4294901760, %v5575_v57 }
 0x199   :  { %v1010_v40 = vsub.f32 %v5575_v57, %v8328_v63  ;;  %v5613_v63 = vand.u32 4294901760, %v717_v56 }
 0x19b   :  { %852 = vmatmul.f32.gmra.mxu0 %v851_v4  ;;  %996 = vmatmul.f32.gmra.mxu2 %v995_v61  ;;  %v5600_v4 = vsub.f32 %v660_v51, %v5583_v32  ;;  %v5603_v61 = vsub.f32 %v714_v6, %v5585_v52  ;;  %8510 = vst [vmem:[#allocation18_spill] sm:$0xff] %v5613_v63  ;;  %v596_v6 = vld [vmem:[%s8324_s2 + $0x50] sm:$0xff] }
 0x19c   :  { %1285 = vmatmul.f32.gmra.mxu1 %v5440_v12  ;;  %1357 = vmatmul.f32.gmra.mxu3 %v5445_v2  ;;  %v5631_v30 = vsub.f32 %v717_v56, %v5613_v63  ;;  %v666_v29 = vsel %vm634_vm1, %v596_v6, 0  ;;  %v597_v56 = vld [vmem:[%s8324_s2 + $0x58] sm:$0xff]  ;;  %v615_v6 = vld [vmem:[%s8324_s2 + $0xe8] sm:$0xff] }
 0x19d   :  { %v8334_v51 = vand.u32 4294901760, %v5603_v61  ;;  %v669_v25 = vsel %vm634_vm1, %v597_v56, 0  ;;  %v616_v56 = vld [vmem:[%s8324_s2 + $0xf0] sm:$0xff] }
 0x19e   :  { %v8340_v46 = vand.u32 4294901760, %v5631_v30  ;;  %v5667_v47 = vand.u32 4294901760, %v669_v25 }
 0x1a3   :  { %860 = vmatmul.f32.gmra.mxu0 %v859_v10  ;;  %1004 = vmatmul.f32.gmra.mxu2 %v1003_v50  ;;  %v1011_v10 = vand.u32 4294901760, %v1010_v40  ;;  %v8338_v50 = vand.u32 4294901760, %v5600_v4  ;;  %v1018_v40 = vsub.f32 %v5603_v61, %v8334_v51  ;;  %v5641_v51 = vand.u32 4294901760, %v720_v18 }
 0x1a4   :  { %1289 = vmatmul.f32.gmra.mxu1 %v5486_v31  ;;  %1361 = vmatmul.f32.gmra.mxu3 %v5488_v41 }
 0x1a5   :  { %v874_v58 = vsub.f32 %v5600_v4, %v8338_v50  ;;  %v1019_v55 = vand.u32 4294901760, %v1018_v40  ;;  %8511 = vst [vmem:[#allocation21_spill] sm:$0xff] %v5641_v51  ;;  %v5659_v40 = vsub.f32 %v720_v18, %v5641_v51  ;;  %v598_v18 = vld [vmem:[%s8324_s2 + $0x60] sm:$0xff] }
 0x1a6   :  { %v672_v9 = vsel %vm634_vm1, %v598_v18, 0  ;;  %v617_v18 = vld [vmem:[%s8324_s2 + $0xf8] sm:$0xff] }
 0x1a7   :  { %v875_v11 = vand.u32 4294901760, %v874_v58  ;;  %v1026_v58 = vsub.f32 %v5631_v30, %v8340_v46  ;;  %8512 = vst [vmem:[#allocation13_spill] sm:$0xff] %v5659_v40 }
 0x1ab   :  { %868 = vmatmul.f32.gmra.mxu0 %v867_v20  ;;  %1012 = vmatmul.f32.gmra.mxu2 %v1011_v10  ;;  %v8337_v20 = vand.u32 4294901760, %v5622_v34  ;;  %v5638_v10 = vand.u32 4294901760, %v666_v29 }
 0x1ac   :  { %1293 = vmatmul.f32.gmra.mxu1 %v5521_v48  ;;  %1365 = vmatmul.f32.gmra.mxu3 %v5525_v27 }
 0x1ad   :  { %v882_v13 = vsub.f32 %v5622_v34, %v8337_v20  ;;  %v5653_v19 = vsub.f32 %v666_v29, %v5638_v10  ;;  %v723_v20 = vsel %vm634_vm1, %v615_v6, 0 }
 0x1ae   :  { %v5669_v46 = vand.u32 4294901760, %v723_v20 }
 0x1af   :  { %v883_v50 = vand.u32 4294901760, %v882_v13  ;;  %v8343_v29 = vand.u32 4294901760, %v5653_v19 }
 0x1b0   :  { %8513 = vst [vmem:[#allocation17_spill] sm:$0xff] %v5669_v46  ;;  %v5687_v7 = vsub.f32 %v723_v20, %v5669_v46  ;;  %v599_v20 = vld [vmem:[%s8324_s2 + $0x68] sm:$0xff] }
 0x1b1   :  { %v890_v6 = vsub.f32 %v5653_v19, %v8343_v29  ;;  %v726_v29 = vsel %vm634_vm1, %v616_v56, 0  ;;  %v675_v17 = vsel %vm634_vm1, %v599_v20, 0  ;;  %v618_v20 = vld [vmem:[%s8324_s2 + $0x100] sm:$0xff] }
 0x1b2   :  { %8514 = vst [vmem:[#allocation19_spill] sm:$0xff] %v5687_v7  ;;  %v5697_v49 = vand.u32 4294901760, %v726_v29 }
 0x1b3   :  { %876 = vmatmul.f32.gmra.mxu0 %v875_v11  ;;  %1020 = vmatmul.f32.gmra.mxu2 %v1019_v55  ;;  %v1027_v11 = vand.u32 4294901760, %v1026_v58  ;;  %v8345_v55 = vand.u32 4294901760, %v5659_v40  ;;  %v5684_v58 = vsub.f32 %v669_v25, %v5667_v47  ;;  %v8353_v25 = vand.u32 4294901760, %v5687_v7 }
 0x1b4   :  { %1297 = vmatmul.f32.gmra.mxu1 %v5554_v59  ;;  %1369 = vmatmul.f32.gmra.mxu3 %v5557_v3  ;;  %8515 = vst [vmem:[#allocation14_spill] sm:$0xff] %v5697_v49  ;;  %v5715_v15 = vsub.f32 %v726_v29, %v5697_v49  ;;  %v600_v29 = vld [vmem:[%s8324_s2 + $0x70] sm:$0xff] }
 0x1b5   :  { %v1034_v13 = vsub.f32 %v5659_v40, %v8345_v55  ;;  %v8349_v55 = vand.u32 4294901760, %v5684_v58  ;;  %v678_v3 = vsel %vm634_vm1, %v600_v29, 0  ;;  %v619_v29 = vld [vmem:[%s8324_s2 + $0x108] sm:$0xff] }
 0x1b6   :  { %8516 = vst [vmem:[#allocation24_spill] sm:$0xff] %v5715_v15  ;;  %v5751_v41 = vand.u32 4294901760, %v678_v3 }
 0x1b7   :  { %v1035_v54 = vand.u32 4294901760, %v1034_v13  ;;  %v1042_v13 = vsub.f32 %v5687_v7, %v8353_v25 }
 0x1b9   :  { %v1043_v24 = vand.u32 4294901760, %v1042_v13 }
 0x1bb   :  { %884 = vmatmul.f32.gmra.mxu0 %v883_v50  ;;  %1028 = vmatmul.f32.gmra.mxu2 %v1027_v11  ;;  %v891_v50 = vand.u32 4294901760, %v890_v6  ;;  %v5693_v11 = vand.u32 4294901760, %v672_v9  ;;  %v898_v6 = vsub.f32 %v5684_v58, %v8349_v55 }
 0x1bc   :  { %1301 = vmatmul.f32.gmra.mxu1 %v5583_v32  ;;  %1373 = vmatmul.f32.gmra.mxu3 %v5585_v52  ;;  %v8363_v52 = vand.u32 4294901760, %v5715_v15 }
 0x1bd   :  { %v5706_v56 = vsub.f32 %v672_v9, %v5693_v11  ;;  %v729_v9 = vsel %vm634_vm1, %v617_v18, 0  ;;  %v899_v55 = vand.u32 4294901760, %v898_v6 }
 0x1be   :  { %v5725_v25 = vand.u32 4294901760, %v729_v9  ;;  %v1050_v6 = vsub.f32 %v5715_v15, %v8363_v52 }
 0x1c0   :  { %8517 = vst [vmem:[#allocation25_spill] sm:$0xff] %v5725_v25  ;;  %v5743_v13 = vsub.f32 %v729_v9, %v5725_v25  ;;  %v601_v9 = vld [vmem:[%s8324_s2 + $0x78] sm:$0xff] }
 0x1c1   :  { %v681_v2 = vsel %vm634_vm1, %v601_v9, 0  ;;  %v620_v9 = vld [vmem:[%s8324_s2 + $0x110] sm:$0xff] }
 0x1c2   :  { %8518 = vst [vmem:[#allocation26_spill] sm:$0xff] %v5743_v13 }
 0x1c3   :  { %892 = vmatmul.f32.gmra.mxu0 %v891_v50  ;;  %1036 = vmatmul.f32.gmra.mxu2 %v1035_v54  ;;  %v8358_v54 = vand.u32 4294901760, %v5706_v56  ;;  %v5722_v50 = vand.u32 4294901760, %v675_v17 }
 0x1c4   :  { %1305 = vmatmul.f32.gmra.mxu1 %v5609_v26  ;;  %1377 = vmatmul.f32.gmra.mxu3 %v5613_v63 }
 0x1c5   :  { %v906_v18 = vsub.f32 %v5706_v56, %v8358_v54  ;;  %v5737_v63 = vsub.f32 %v675_v17, %v5722_v50  ;;  %v732_v54 = vsel %vm634_vm1, %v618_v20, 0 }
 0x1c6   :  { %v5753_v52 = vand.u32 4294901760, %v732_v54 }
 0x1c7   :  { %v907_v27 = vand.u32 4294901760, %v906_v18  ;;  %v8368_v17 = vand.u32 4294901760, %v5737_v63 }
 0x1c8   :  { %8519 = vst [vmem:[#allocation27_spill] sm:$0xff] %v5753_v52 }
 0x1c9   :  { %v914_v20 = vsub.f32 %v5737_v63, %v8368_v17  ;;  %v735_v17 = vsel %vm634_vm1, %v619_v29, 0 }
 0x1ca   :  { %v5781_v53 = vand.u32 4294901760, %v735_v17 }
 0x1cb   :  { %900 = vmatmul.f32.gmra.mxu0 %v899_v55  ;;  %1044 = vmatmul.f32.gmra.mxu2 %v1043_v24  ;;  %v1051_v55 = vand.u32 4294901760, %v1050_v6  ;;  %v8371_v24 = vand.u32 4294901760, %v5743_v13  ;;  %v5768_v6 = vsub.f32 %v678_v3, %v5751_v41 }
 0x1cc   :  { %1309 = vmatmul.f32.gmra.mxu1 %v5638_v10  ;;  %1381 = vmatmul.f32.gmra.mxu3 %v5641_v51  ;;  %v5771_v51 = vsub.f32 %v732_v54, %v5753_v52  ;;  %8521 = vst [vmem:[#allocation29_spill] sm:$0xff] %v5781_v53  ;;  %v602_v54 = vld [vmem:[%s8324_s2 + $0x80] sm:$0xff] }
 0x1cd   :  { %v1058_v18 = vsub.f32 %v5743_v13, %v8371_v24  ;;  %v8378_v24 = vand.u32 4294901760, %v5768_v6  ;;  %v684_v43 = vsel %vm634_vm1, %v602_v54, 0  ;;  %v621_v54 = vld [vmem:[%s8324_s2 + $0x118] sm:$0xff] }
 0x1ce   :  { %8520 = vst [vmem:[#allocation28_spill] sm:$0xff] %v5771_v51  ;;  %v8383_v3 = vand.u32 4294901760, %v5771_v51 }
 0x1cf   :  { %v1059_v36 = vand.u32 4294901760, %v1058_v18 }
 0x1d0   :  { %v1066_v18 = vsub.f32 %v5771_v51, %v8383_v3 }
 0x1d2   :  { %v1067_v13 = vand.u32 4294901760, %v1066_v18 }
 0x1d3   :  { %908 = vmatmul.f32.gmra.mxu0 %v907_v27  ;;  %1052 = vmatmul.f32.gmra.mxu2 %v1051_v55  ;;  %v915_v27 = vand.u32 4294901760, %v914_v20  ;;  %v5777_v55 = vand.u32 4294901760, %v681_v2  ;;  %v922_v20 = vsub.f32 %v5768_v6, %v8378_v24 }
 0x1d4   :  { %1313 = vmatmul.f32.gmra.mxu1 %v5667_v47  ;;  %1385 = vmatmul.f32.gmra.mxu3 %v5669_v46  ;;  %v5799_v46 = vsub.f32 %v735_v17, %v5781_v53  ;;  %v603_v17 = vld [vmem:[%s8324_s2 + $0x88] sm:$0xff] }
 0x1d5   :  { %v5790_v29 = vsub.f32 %v681_v2, %v5777_v55  ;;  %v738_v2 = vsel %vm634_vm1, %v620_v9, 0  ;;  %v923_v24 = vand.u32 4294901760, %v922_v20  ;;  %v687_v51 = vsel %vm634_vm1, %v603_v17, 0 }
 0x1d6   :  { %8522 = vst [vmem:[#allocation30_spill] sm:$0xff] %v5799_v46  ;;  %v8393_v0 = vand.u32 4294901760, %v5799_v46  ;;  %v5809_v3 = vand.u32 4294901760, %v738_v2  ;;  %v5835_v7 = vand.u32 4294901760, %v687_v51 }
 0x1d8   :  { %8524 = vst [vmem:[#allocation32_spill] sm:$0xff] %v5809_v3  ;;  %v1074_v20 = vsub.f32 %v5799_v46, %v8393_v0  ;;  %v5827_v18 = vsub.f32 %v738_v2, %v5809_v3  ;;  %v622_v2 = vld [vmem:[%s8324_s2 + $0x120] sm:$0xff] }
 0x1da   :  { %8525 = vst [vmem:[#allocation33_spill] sm:$0xff] %v5827_v18 }
 0x1db   :  { %916 = vmatmul.f32.gmra.mxu0 %v915_v27  ;;  %1060 = vmatmul.f32.gmra.mxu2 %v1059_v36  ;;  %v8388_v36 = vand.u32 4294901760, %v5790_v29  ;;  %v5806_v27 = vand.u32 4294901760, %v684_v43 }
 0x1dc   :  { %1317 = vmatmul.f32.gmra.mxu1 %v5693_v11  ;;  %1389 = vmatmul.f32.gmra.mxu3 %v5697_v49 }
 0x1dd   :  { %8523 = vst [vmem:[#allocation31_spill] sm:$0xff] %v5806_v27  ;;  %v930_v9 = vsub.f32 %v5790_v29, %v8388_v36  ;;  %v5821_v49 = vsub.f32 %v684_v43, %v5806_v27  ;;  %v741_v36 = vsel %vm634_vm1, %v621_v54, 0 }
 0x1de   :  { %v5837_v0 = vand.u32 4294901760, %v741_v36 }
 0x1df   :  { %v931_v15 = vand.u32 4294901760, %v930_v9  ;;  %v8398_v43 = vand.u32 4294901760, %v5821_v49  ;;  %v5851_v9 = vsub.f32 %v687_v51, %v5835_v7  ;;  %v623_v51 = vld [vmem:[%s8324_s2 + $0x128] sm:$0xff] }
 0x1e0   :  { %8526 = vst [vmem:[#allocation34_spill] sm:$0xff] %v5837_v0 }
 0x1e1   :  { %v938_v17 = vsub.f32 %v5821_v49, %v8398_v43 }
 0x1e3   :  { %924 = vmatmul.f32.gmra.mxu0 %v923_v24  ;;  %1068 = vmatmul.f32.gmra.mxu2 %v1067_v13  ;;  %v1075_v24 = vand.u32 4294901760, %v1074_v20  ;;  %v8401_v13 = vand.u32 4294901760, %v5827_v18  ;;  %v5854_v20 = vsub.f32 %v741_v36, %v5837_v0 }
 0x1e4   :  { %1321 = vmatmul.f32.gmra.mxu1 %v5722_v50  ;;  %1393 = vmatmul.f32.gmra.mxu3 %v5725_v25  ;;  %v744_v25 = vsel %vm634_vm1, %v622_v2, 0 }
 0x1e5   :  { %v1082_v54 = vsub.f32 %v5827_v18, %v8401_v13  ;;  %8528 = vst [vmem:[#allocation36_spill] sm:$0xff] %v5854_v20  ;;  %v5861_v40 = vand.u32 4294901760, %v744_v25 }
 0x1e7   :  { %v1083_v43 = vand.u32 4294901760, %v1082_v54  ;;  %8529 = vst [vmem:[#allocation37_spill] sm:$0xff] %v5861_v40  ;;  %v5877_v54 = vsub.f32 %v744_v25, %v5861_v40  ;;  %v624_v25 = vld [vmem:[%s8324_s2 + $0x130] sm:$0xff] }
 0x1e9   :  { %8532 = vst [vmem:[#allocation40_spill] sm:$0xff] %v5877_v54  ;;  %v8412_v18 = vand.u32 4294901760, %v5877_v54 }
 0x1ea   :  { %v5842_v46 = vpop.f32.mrf.mxu0 }
 0x1eb   :  { %8527 = vst [vmem:[#allocation35_spill] sm:$0xff] %v5842_v46  ;;  %932 = vmatmul.f32.gmra.mxu0 %v931_v15  ;;  %1076 = vmatmul.f32.gmra.mxu2 %v1075_v24  ;;  %v939_v46 = vand.u32 4294901760, %v938_v17  ;;  %v8406_v15 = vand.u32 4294901760, %v5851_v9  ;;  %v8407_v24 = vand.u32 4294901760, %v5854_v20 }
 0x1ec   :  { %1325 = vmatmul.f32.gmra.mxu1 %v5751_v41  ;;  %1397 = vmatmul.f32.gmra.mxu3 %v5753_v52 }
 0x1ed   :  { %v946_v2 = vsub.f32 %v5851_v9, %v8406_v15  ;;  %v1090_v17 = vsub.f32 %v5854_v20, %v8407_v24 }
 0x1ef   :  { %v1091_v52 = vand.u32 4294901760, %v1090_v17 }
 0x1f0   :  { %v5863_v13 = vpop.f32.mrf.mxu2 }
 0x1f1   :  { %8530 = vst [vmem:[#allocation38_spill] sm:$0xff] %v5863_v13 }
 0x1f3   :  { %940 = vmatmul.f32.gmra.mxu0 %v939_v46  ;;  %1084 = vmatmul.f32.gmra.mxu2 %v1083_v43  ;;  %v5868_v36 = vpop.f32.mrf.mxu0  ;;  %v747_v46 = vsel %vm634_vm1, %v623_v51, 0  ;;  %v947_v43 = vand.u32 4294901760, %v946_v2  ;;  %v750_v2 = vsel %vm634_vm1, %v624_v25, 0 }
 0x1f4   :  { %8531 = vst [vmem:[#allocation39_spill] sm:$0xff] %v5868_v36  ;;  %1329 = vmatmul.f32.gmra.mxu1 %v5777_v55  ;;  %1401 = vmatmul.f32.gmra.mxu3 %v5781_v53  ;;  %v5881_v13 = vpop.f32.mrf.mxu1  ;;  %v5885_v15 = vand.u32 4294901760, %v747_v46  ;;  %v1098_v53 = vsub.f32 %v5877_v54, %v8412_v18 }
 0x1f5   :  { %8533 = vst [vmem:[#allocation41_spill] sm:$0xff] %v5881_v13 }
 0x1f6   :  { %8534 = vst [vmem:[#allocation42_spill] sm:$0xff] %v5885_v15  ;;  %v5896_v51 = vsub.f32 %v747_v46, %v5885_v15  ;;  %v625_v46 = vld [vmem:[%s8324_s2 + $0x138] sm:$0xff] }
 0x1f7   :  { %v753_v54 = vsel %vm634_vm1, %v625_v46, 0 }
 0x1f8   :  { %8536 = vst [vmem:[#allocation44_spill] sm:$0xff] %v5896_v51 }
 0x1f9   :  { %v965_v36 = vpop.f32.mrf.mxu2 }
 0x1fa   :  { %v5890_v24 = vpop.f32.mrf.mxu3 }
 0x1fb   :  { %8535 = vst [vmem:[#allocation43_spill] sm:$0xff] %v5890_v24  ;;  %948 = vmatmul.f32.gmra.mxu0 %v947_v43  ;;  %1092 = vmatmul.f32.gmra.mxu2 %v1091_v52  ;;  %v1099_v24 = vand.u32 4294901760, %v1098_v53  ;;  %v8419_v52 = vand.u32 4294901760, %v5896_v51  ;;  %v5906_v43 = vand.u32 4294901760, %v750_v2 }
 0x1fc   :  { %1333 = vmatmul.f32.gmra.mxu1 %v5806_v27  ;;  %1405 = vmatmul.f32.gmra.mxu3 %v5809_v3  ;;  %v5926_v27 = vand.u32 4294901760, %v753_v54 }
 0x1fd   :  { %v5901_v17 = vpop.f32.mrf.mxu0  ;;  %8539 = vst [vmem:[#allocation47_spill] sm:$0xff] %v5906_v43  ;;  %v1106_v25 = vsub.f32 %v5896_v51, %v8419_v52  ;;  %v5916_v3 = vsub.f32 %v750_v2, %v5906_v43  ;;  %v626_v2 = vld [vmem:[%s8324_s2 + $0x140] sm:$0xff] }
 0x1fe   :  { %8537 = vst [vmem:[#allocation45_spill] sm:$0xff] %v5901_v17  ;;  %v5903_v20 = vpop.f32.mrf.mxu1  ;;  %v5938_v46 = vsub.f32 %v753_v54, %v5926_v27 }
 0x1ff   :  { %8538 = vst [vmem:[#allocation46_spill] sm:$0xff] %v5903_v20  ;;  %v1107_v20 = vand.u32 4294901760, %v1106_v25  ;;  %v8424_v13 = vand.u32 4294901760, %v5916_v3  ;;  %v8546_v25 = vand.u32 4294901760, %v5255_v5 }
 0x200   :  { %8540 = vst [vmem:[#allocation48_spill] sm:$0xff] %v5916_v3 }
 0x201   :  { %8543 = vst [vmem:[#allocation51_spill] sm:$0xff] %v5926_v27 }
 0x202   :  { %8545 = vst [vmem:[#allocation53_spill] sm:$0xff] %v5938_v46 }
 0x203   :  { %1100 = vmatmul.f32.gmra.mxu2 %v1099_v24  ;;  %1503 = vmatmul.f32.vlgmr.msrb.gmra.mxu0 %v5255_v5  ;;  %v973_v18 = vpop.f32.mrf.mxu2  ;;  %v627_v5 = vld [vmem:[%s8324_s2 + $0x148] sm:$0xff] }
 0x204   :  { %1337 = vmatmul.f32.gmra.mxu1 %v5835_v7  ;;  %1409 = vmatmul.f32.gmra.mxu3 %v5837_v0  ;;  %v1346_v53 = vpop.f32.mrf.mxu3 }
 0x205   :  { %v5921_v17 = vadd.f32 %v1346_v53, %v965_v36  ;;  %v1114_v36 = vsub.f32 %v5916_v3, %v8424_v13  ;;  %v756_v53 = vsel %vm634_vm1, %v626_v2, 0  ;;  %v8551_v2 = vand.u32 4294901760, %v5318_v33 }
 0x207   :  { %8541 = vst [vmem:[#allocation49_spill] sm:$0xff] %v5921_v17  ;;  %v5923_v24 = vpop.f32.mrf.mxu0 }
 0x208   :  { %8542 = vst [vmem:[#allocation50_spill] sm:$0xff] %v5923_v24  ;;  %v5928_v52 = vpop.f32.mrf.mxu1  ;;  %v8429_v24 = vand.u32 4294901760, %v5938_v46 }
 0x209   :  { %8544 = vst [vmem:[#allocation52_spill] sm:$0xff] %v5928_v52  ;;  %v5947_v52 = vand.u32 4294901760, %v756_v53 }
 0x20b   :  { %1108 = vmatmul.f32.gmra.mxu2 %v1107_v20  ;;  %1508 = vmatmul.f32.gmra.mxu0 %v5318_v33  ;;  %v1115_v20 = vand.u32 4294901760, %v1114_v36  ;;  %8548 = vst [vmem:[#allocation55_spill] sm:$0xff] %v5947_v52  ;;  %v759_v36 = vsel %vm634_vm1, %v627_v5, 0  ;;  %v628_v33 = vld [vmem:[%s8324_s2 + $0x150] sm:$0xff] }
 0x20c   :  { %1413 = vmatmul.f32.gmra.mxu3 %v5861_v40  ;;  %1773 = vmatmul.f32.vlgmr.msrb.gmra.mxu1 %v8546_v25  ;;  %v5968_v3 = vand.u32 4294901760, %v759_v36 }
 0x20d   :  { %v981_v17 = vpop.f32.mrf.mxu2 }
 0x20e   :  { %v1350_v0 = vpop.f32.mrf.mxu3  ;;  %8552 = vst [vmem:[#allocation58_spill] sm:$0xff] %v5968_v3 }
 0x20f   :  { %v5944_v51 = vadd.f32 %v1350_v0, %v973_v18  ;;  %v1122_v0 = vsub.f32 %v5938_v46, %v8429_v24  ;;  %v5961_v18 = vsub.f32 %v756_v53, %v5947_v52 }
 0x210   :  { %v5949_v13 = vpop.f32.mrf.mxu0 }
 0x211   :  { %8547 = vst [vmem:[#allocation54_spill] sm:$0xff] %v5944_v51  ;;  %v5951_v54 = vpop.f32.mrf.mxu1  ;;  %v1123_v40 = vand.u32 4294901760, %v1122_v0  ;;  %v5984_v0 = vsub.f32 %v759_v36, %v5968_v3 }
 0x212   :  { %8549 = vst [vmem:[#allocation56_spill] sm:$0xff] %v5949_v13 }
 0x213   :  { %1116 = vmatmul.f32.gmra.mxu2 %v1115_v20  ;;  %1513 = vmatmul.f32.gmra.mxu0 %v5374_v28  ;;  %8550 = vst [vmem:[#allocation57_spill] sm:$0xff] %v5961_v18  ;;  %v8434_v20 = vand.u32 4294901760, %v5961_v18 }
 0x214   :  { %1417 = vmatmul.f32.gmra.mxu3 %v5885_v15  ;;  %1779 = vmatmul.f32.gmra.mxu1 %v8551_v2  ;;  %8555 = vst [vmem:[#allocation61_spill] sm:$0xff] %v5984_v0 }
 0x215   :  { %v1130_v5 = vsub.f32 %v5961_v18, %v8434_v20 }
 0x216   :  { %v989_v25 = vpop.f32.mrf.mxu2 }
 0x217   :  { %v1354_v51 = vpop.f32.mrf.mxu3  ;;  %v1131_v15 = vand.u32 4294901760, %v1130_v5 }
 0x218   :  { %v5970_v13 = vadd.f32 %v1354_v51, %v981_v17  ;;  %v5972_v24 = vpop.f32.mrf.mxu0  ;;  %v8556_v51 = vand.u32 4294901760, %v5374_v28  ;;  %v762_v17 = vsel %vm634_vm1, %v628_v33, 0  ;;  %v629_v28 = vld [vmem:[%s8324_s2 + $0x158] sm:$0xff] }
 0x219   :  { %8554 = vst [vmem:[#allocation60_spill] sm:$0xff] %v5972_v24  ;;  %v5974_v53 = vpop.f32.mrf.mxu1  ;;  %v5991_v46 = vand.u32 4294901760, %v762_v17 }
 0x21a   :  { %8553 = vst [vmem:[#allocation59_spill] sm:$0xff] %v5970_v13 }
 0x21b   :  { %1124 = vmatmul.f32.gmra.mxu2 %v1123_v40  ;;  %1518 = vmatmul.f32.gmra.mxu0 %v5421_v35  ;;  %v8439_v40 = vand.u32 4294901760, %v5984_v0  ;;  %8557 = vst [vmem:[#allocation62_spill] sm:$0xff] %v5991_v46  ;;  %v6007_v5 = vsub.f32 %v762_v17, %v5991_v46 }
 0x21c   :  { %1421 = vmatmul.f32.gmra.mxu3 %v5906_v43  ;;  %1785 = vmatmul.f32.gmra.mxu1 %v8556_v51 }
 0x21d   :  { %v1138_v33 = vsub.f32 %v5984_v0, %v8439_v40  ;;  %8560 = vst [vmem:[#allocation65_spill] sm:$0xff] %v6007_v5 }
 0x21e   :  { %v997_v2 = vpop.f32.mrf.mxu2 }
 0x21f   :  { %v1358_v13 = vpop.f32.mrf.mxu3  ;;  %v1139_v43 = vand.u32 4294901760, %v1138_v33 }
 0x220   :  { %v5993_v24 = vadd.f32 %v1358_v13, %v989_v25  ;;  %v5995_v20 = vpop.f32.mrf.mxu0  ;;  %v8561_v13 = vand.u32 4294901760, %v5421_v35  ;;  %v765_v25 = vsel %vm634_vm1, %v629_v28, 0  ;;  %v630_v35 = vld [vmem:[%s8324_s2 + $0x160] sm:$0xff] }
 0x221   :  { %8559 = vst [vmem:[#allocation64_spill] sm:$0xff] %v5995_v20  ;;  %v5997_v36 = vpop.f32.mrf.mxu1  ;;  %v6014_v18 = vand.u32 4294901760, %v765_v25 }
 0x222   :  { %8558 = vst [vmem:[#allocation63_spill] sm:$0xff] %v5993_v24 }
 0x223   :  { %1132 = vmatmul.f32.gmra.mxu2 %v1131_v15  ;;  %1523 = vmatmul.f32.gmra.mxu0 %v5464_v22  ;;  %v8444_v15 = vand.u32 4294901760, %v6007_v5  ;;  %8562 = vst [vmem:[#allocation66_spill] sm:$0xff] %v6014_v18  ;;  %v6030_v33 = vsub.f32 %v765_v25, %v6014_v18 }
 0x224   :  { %1425 = vmatmul.f32.gmra.mxu3 %v5926_v27  ;;  %1791 = vmatmul.f32.gmra.mxu1 %v8561_v13 }
 0x225   :  { %v1146_v28 = vsub.f32 %v6007_v5, %v8444_v15  ;;  %8565 = vst [vmem:[#allocation69_spill] sm:$0xff] %v6030_v33 }
 0x226   :  { %v1005_v51 = vpop.f32.mrf.mxu2 }
 0x227   :  { %v1362_v24 = vpop.f32.mrf.mxu3  ;;  %v1147_v27 = vand.u32 4294901760, %v1146_v28 }
 0x228   :  { %v6016_v20 = vadd.f32 %v1362_v24, %v997_v2  ;;  %v6018_v40 = vpop.f32.mrf.mxu0  ;;  %v8566_v24 = vand.u32 4294901760, %v5464_v22  ;;  %v768_v2 = vsel %vm634_vm1, %v630_v35, 0  ;;  %v631_v22 = vld [vmem:[%s8324_s2 + $0x168] sm:$0xff] }
 0x229   :  { %8564 = vst [vmem:[#allocation68_spill] sm:$0xff] %v6018_v40  ;;  %v6020_v17 = vpop.f32.mrf.mxu1  ;;  %v6037_v0 = vand.u32 4294901760, %v768_v2 }
 0x22a   :  { %8563 = vst [vmem:[#allocation67_spill] sm:$0xff] %v6016_v20 }
 0x22b   :  { %1140 = vmatmul.f32.gmra.mxu2 %v1139_v43  ;;  %1528 = vmatmul.f32.gmra.mxu0 %v5510_v37  ;;  %v8449_v43 = vand.u32 4294901760, %v6030_v33  ;;  %v6053_v28 = vsub.f32 %v768_v2, %v6037_v0 }
 0x22c   :  { %1429 = vmatmul.f32.gmra.mxu3 %v5947_v52  ;;  %1797 = vmatmul.f32.gmra.mxu1 %v8566_v24 }
 0x22d   :  { %v1154_v35 = vsub.f32 %v6030_v33, %v8449_v43  ;;  %8569 = vst [vmem:[#allocation72_spill] sm:$0xff] %v6053_v28 }
 0x22e   :  { %v1013_v13 = vpop.f32.mrf.mxu2 }
 0x22f   :  { %v1366_v20 = vpop.f32.mrf.mxu3  ;;  %v1155_v52 = vand.u32 4294901760, %v1154_v35 }
 0x230   :  { %v6039_v40 = vadd.f32 %v1366_v20, %v1005_v51  ;;  %v6041_v15 = vpop.f32.mrf.mxu0  ;;  %v8570_v20 = vand.u32 4294901760, %v5510_v37  ;;  %v771_v51 = vsel %vm634_vm1, %v631_v22, 0  ;;  %v632_v37 = vld [vmem:[%s8324_s2 + $0x170] sm:$0xff] }
 0x231   :  { %8568 = vst [vmem:[#allocation71_spill] sm:$0xff] %v6041_v15  ;;  %v6043_v25 = vpop.f32.mrf.mxu1  ;;  %v6060_v5 = vand.u32 4294901760, %v771_v51 }
 0x232   :  { %8567 = vst [vmem:[#allocation70_spill] sm:$0xff] %v6039_v40 }
 0x233   :  { %1148 = vmatmul.f32.gmra.mxu2 %v1147_v27  ;;  %1533 = vmatmul.f32.gmra.mxu0 %v5538_v45  ;;  %v8454_v27 = vand.u32 4294901760, %v6053_v28  ;;  %8571 = vst [vmem:[#allocation73_spill] sm:$0xff] %v6060_v5  ;;  %v6076_v35 = vsub.f32 %v771_v51, %v6060_v5 }
 0x234   :  { %1433 = vmatmul.f32.gmra.mxu3 %v5968_v3  ;;  %1803 = vmatmul.f32.gmra.mxu1 %v8570_v20 }
 0x235   :  { %v1162_v22 = vsub.f32 %v6053_v28, %v8454_v27  ;;  %8574 = vst [vmem:[#allocation76_spill] sm:$0xff] %v6076_v35 }
 0x236   :  { %v1021_v24 = vpop.f32.mrf.mxu2 }
 0x237   :  { %v1370_v40 = vpop.f32.mrf.mxu3  ;;  %v1163_v3 = vand.u32 4294901760, %v1162_v22 }
 0x238   :  { %v6062_v15 = vadd.f32 %v1370_v40, %v1013_v13  ;;  %v6064_v43 = vpop.f32.mrf.mxu0  ;;  %v8575_v40 = vand.u32 4294901760, %v5538_v45  ;;  %v774_v13 = vsel %vm634_vm1, %v632_v37, 0  ;;  %v633_v45 = vld [vmem:[%s8324_s2 + $0x178] sm:$0xff]  ;;  %s6693_s2 = smov 0  }
 0x239   :  { %8573 = vst [vmem:[#allocation75_spill] sm:$0xff] %v6064_v43  ;;  %v6066_v2 = vpop.f32.mrf.mxu1  ;;  %v6083_v33 = vand.u32 4294901760, %v774_v13 }
 0x23a   :  { %8572 = vst [vmem:[#allocation74_spill] sm:$0xff] %v6062_v15 }
 0x23b   :  { %1156 = vmatmul.f32.gmra.mxu2 %v1155_v52  ;;  %1538 = vmatmul.f32.gmra.mxu0 %v5569_v16  ;;  %v8459_v52 = vand.u32 4294901760, %v6076_v35  ;;  %v6099_v22 = vsub.f32 %v774_v13, %v6083_v33 }
 0x23c   :  { %1437 = vmatmul.f32.gmra.mxu3 %v5991_v46  ;;  %1809 = vmatmul.f32.gmra.mxu1 %v8575_v40 }
 0x23d   :  { %v1170_v37 = vsub.f32 %v6076_v35, %v8459_v52 }
 0x23e   :  { %v1029_v20 = vpop.f32.mrf.mxu2 }
 0x23f   :  { %v1374_v15 = vpop.f32.mrf.mxu3  ;;  %v1171_v46 = vand.u32 4294901760, %v1170_v37  ;;  %v8581_v37 = vand.u32 4294901760, %v5600_v4 }
 0x240   :  { %v6085_v43 = vadd.f32 %v1374_v15, %v1021_v24  ;;  %v6087_v27 = vpop.f32.mrf.mxu0  ;;  %v8578_v15 = vand.u32 4294901760, %v5569_v16  ;;  %v777_v24 = vsel %vm634_vm1, %v633_v45, 0 }
 0x241   :  { %8577 = vst [vmem:[#allocation78_spill] sm:$0xff] %v6087_v27  ;;  %v6089_v51 = vpop.f32.mrf.mxu1  ;;  %v6106_v28 = vand.u32 4294901760, %v777_v24 }
 0x242   :  { %8576 = vst [vmem:[#allocation77_spill] sm:$0xff] %v6085_v43 }
 0x243   :  { %1164 = vmatmul.f32.gmra.mxu2 %v1163_v3  ;;  %1543 = vmatmul.f32.gmra.mxu0 %v5600_v4  ;;  %v8464_v3 = vand.u32 4294901760, %v6099_v22  ;;  %8579 = vst [vmem:[#allocation79_spill] sm:$0xff] %v6106_v28  ;;  %v6119_v45 = vsub.f32 %v777_v24, %v6106_v28  ;;  %v8583_v4 = vand.u32 4294901760, %v5622_v34 }
 0x244   :  { %1441 = vmatmul.f32.gmra.mxu3 %v6014_v18  ;;  %1815 = vmatmul.f32.gmra.mxu1 %v8578_v15 }
 0x245   :  { %v1178_v16 = vsub.f32 %v6099_v22, %v8464_v3 }
 0x246   :  { %v1037_v40 = vpop.f32.mrf.mxu2 }
 0x247   :  { %v1378_v43 = vpop.f32.mrf.mxu3  ;;  %v1179_v15 = vand.u32 4294901760, %v1178_v16 }
 0x248   :  { %v6108_v27 = vadd.f32 %v1378_v43, %v1029_v20  ;;  %v6110_v52 = vpop.f32.mrf.mxu0 }
 0x249   :  { %v6112_v13 = vpop.f32.mrf.mxu1 }
 0x24a   :  { %8580 = vst [vmem:[#allocation80_spill] sm:$0xff] %v6108_v27  ;;  %v8465_v27 = vand.u32 4294901760, %v6119_v45 }
 0x24b   :  { %1172 = vmatmul.f32.gmra.mxu2 %v1171_v46  ;;  %1548 = vmatmul.f32.gmra.mxu0 %v5622_v34 }
 0x24c   :  { %1445 = vmatmul.f32.gmra.mxu3 %v6037_v0  ;;  %1821 = vmatmul.f32.gmra.mxu1 %v8581_v37  ;;  %v1186_v24 = vsub.f32 %v6119_v45, %v8465_v27 }
 0x24e   :  { %v1045_v43 = vpop.f32.mrf.mxu2 }
 0x24f   :  { %v1382_v20 = vpop.f32.mrf.mxu3 }
 0x250   :  { %v6125_v46 = vadd.f32 %v1382_v20, %v1037_v40  ;;  %v6127_v18 = vpop.f32.mrf.mxu0  ;;  %v1187_v40 = vand.u32 4294901760, %v1186_v24  ;;  %v8586_v24 = vand.u32 4294901760, %v5684_v58 }
 0x251   :  { %v6129_v35 = vpop.f32.mrf.mxu1 }
 0x252   :  { %8582 = vst [vmem:[#allocation81_spill] sm:$0xff] %v6125_v46 }
 0x253   :  { %1180 = vmatmul.f32.gmra.mxu2 %v1179_v15  ;;  %1553 = vmatmul.f32.gmra.mxu0 %v5653_v19  ;;  %v8584_v15 = vand.u32 4294901760, %v5653_v19 }
 0x254   :  { %1449 = vmatmul.f32.gmra.mxu3 %v6060_v5  ;;  %1827 = vmatmul.f32.gmra.mxu1 %v8583_v4 }
 0x256   :  { %v1053_v16 = vpop.f32.mrf.mxu2 }
 0x257   :  { %v1386_v37 = vpop.f32.mrf.mxu3 }
 0x258   :  { %v6138_v20 = vadd.f32 %v1386_v37, %v1045_v43  ;;  %v6140_v3 = vpop.f32.mrf.mxu0 }
 0x259   :  { %v6142_v46 = vpop.f32.mrf.mxu1 }
 0x25b   :  { %1188 = vmatmul.f32.gmra.mxu2 %v1187_v40  ;;  %1558 = vmatmul.f32.gmra.mxu0 %v5684_v58 }
 0x25c   :  { %1453 = vmatmul.f32.gmra.mxu3 %v6083_v33  ;;  %1833 = vmatmul.f32.gmra.mxu1 %v8584_v15 }
 0x25e   :  { %v1061_v27 = vpop.f32.mrf.mxu2 }
 0x25f   :  { %v1390_v34 = vpop.f32.mrf.mxu3 }
 0x260   :  { %v6148_v4 = vadd.f32 %v1390_v34, %v1053_v16  ;;  %v6150_v5 = vpop.f32.mrf.mxu0  ;;  %v8588_v34 = vand.u32 4294901760, %v5706_v56 }
 0x261   :  { %v6152_v43 = vpop.f32.mrf.mxu1 }
 0x262   :  { %8585 = vst [vmem:[#allocation82_spill] sm:$0xff] %v6148_v4 }
 0x263   :  { %1563 = vmatmul.f32.gmra.mxu0 %v5706_v56  ;;  %2112 = vmatmul.f32.vlgmr.msra.gmra.mxu2 %v5218_v60 }
 0x264   :  { %1457 = vmatmul.f32.gmra.mxu3 %v6106_v28  ;;  %1839 = vmatmul.f32.gmra.mxu1 %v8586_v24 }
 0x266   :  { %v1069_v37 = vpop.f32.mrf.mxu2 }
 0x267   :  { %v1394_v19 = vpop.f32.mrf.mxu3 }
 0x268   :  { %v6159_v40 = vadd.f32 %v1394_v19, %v1061_v27  ;;  %v6163_v16 = vpop.f32.mrf.mxu0  ;;  %v8590_v27 = vand.u32 4294901760, %v5737_v63 }
 0x269   :  { %v6161_v15 = vpop.f32.mrf.mxu1 }
 0x26a   :  { %8587 = vst [vmem:[#allocation83_spill] sm:$0xff] %v6159_v40 }
 0x26b   :  { %1568 = vmatmul.f32.gmra.mxu0 %v5737_v63  ;;  %2116 = vmatmul.f32.gmra.mxu2 %v5288_v42 }
 0x26c   :  { %1845 = vmatmul.f32.gmra.mxu1 %v8588_v34  ;;  %2333 = vmatmul.f32.vlgmr.msra.gmra.mxu3 %v5218_v60 }
 0x26e   :  { %v1077_v28 = vpop.f32.mrf.mxu2 }
 0x26f   :  { %v1398_v58 = vpop.f32.mrf.mxu3 }
 0x270   :  { %v6170_v24 = vadd.f32 %v1398_v58, %v1069_v37  ;;  %v6179_v19 = vpop.f32.mrf.mxu0  ;;  %v8592_v37 = vand.u32 4294901760, %v5768_v6 }
 0x271   :  { %v6172_v4 = vpop.f32.mrf.mxu1 }
 0x272   :  { %8589 = vst [vmem:[#allocation84_spill] sm:$0xff] %v6170_v24 }
 0x273   :  { %1573 = vmatmul.f32.gmra.mxu0 %v5768_v6  ;;  %2120 = vmatmul.f32.gmra.mxu2 %v5351_v38 }
 0x274   :  { %1851 = vmatmul.f32.gmra.mxu1 %v8590_v27  ;;  %2337 = vmatmul.f32.gmra.mxu3 %v5288_v42 }
 0x276   :  { %v1085_v56 = vpop.f32.mrf.mxu2 }
 0x277   :  { %v1402_v34 = vpop.f32.mrf.mxu3 }
 0x278   :  { %v6181_v60 = vadd.f32 %v1402_v34, %v1077_v28  ;;  %v6190_v58 = vpop.f32.mrf.mxu0  ;;  %v8594_v28 = vand.u32 4294901760, %v5790_v29 }
 0x279   :  { %v6183_v40 = vpop.f32.mrf.mxu1 }
 0x27a   :  { %8591 = vst [vmem:[#allocation85_spill] sm:$0xff] %v6181_v60 }
 0x27b   :  { %1578 = vmatmul.f32.gmra.mxu0 %v5790_v29  ;;  %2124 = vmatmul.f32.gmra.mxu2 %v5395_v21 }
 0x27c   :  { %1857 = vmatmul.f32.gmra.mxu1 %v8592_v37  ;;  %2341 = vmatmul.f32.gmra.mxu3 %v5351_v38 }
 0x27e   :  { %v1093_v63 = vpop.f32.mrf.mxu2 }
 0x27f   :  { %v1406_v42 = vpop.f32.mrf.mxu3 }
 0x280   :  { %v6192_v27 = vadd.f32 %v1406_v42, %v1085_v56  ;;  %v6203_v37 = vpop.f32.mrf.mxu0  ;;  %v8596_v56 = vand.u32 4294901760, %v5821_v49 }
 0x281   :  { %v6194_v24 = vpop.f32.mrf.mxu1 }
 0x282   :  { %8593 = vst [vmem:[#allocation86_spill] sm:$0xff] %v6192_v27 }
 0x283   :  { %1583 = vmatmul.f32.gmra.mxu0 %v5821_v49  ;;  %2128 = vmatmul.f32.gmra.mxu2 %v5440_v12 }
 0x284   :  { %1863 = vmatmul.f32.gmra.mxu1 %v8594_v28  ;;  %2345 = vmatmul.f32.gmra.mxu3 %v5395_v21 }
 0x286   :  { %v1101_v6 = vpop.f32.mrf.mxu2 }
 0x287   :  { %v1410_v34 = vpop.f32.mrf.mxu3 }
 0x288   :  { %v6201_v38 = vadd.f32 %v1410_v34, %v1093_v63  ;;  %v6214_v28 = vpop.f32.mrf.mxu0  ;;  %v8598_v63 = vand.u32 4294901760, %v5851_v9 }
 0x289   :  { %v6205_v60 = vpop.f32.mrf.mxu1 }
 0x28a   :  { %8595 = vst [vmem:[#allocation87_spill] sm:$0xff] %v6201_v38 }
 0x28b   :  { %1588 = vmatmul.f32.gmra.mxu0 %v5851_v9  ;;  %2132 = vmatmul.f32.gmra.mxu2 %v5486_v31 }
 0x28c   :  { %1869 = vmatmul.f32.gmra.mxu1 %v8596_v56  ;;  %2349 = vmatmul.f32.gmra.mxu3 %v5440_v12 }
 0x28e   :  { %v1109_v29 = vpop.f32.mrf.mxu2 }
 0x28f   :  { %v1414_v42 = vpop.f32.mrf.mxu3 }
 0x290   :  { %v6212_v21 = vadd.f32 %v1414_v42, %v1101_v6  ;;  %v8600_v6 = vand.u32 4294901760, %v5258_v8  ;;  %v6230_v42 = vpop.f32.mrf.mxu0 }
 0x291   :  { %v6221_v34 = vpop.f32.mrf.mxu1 }
 0x292   :  { %8597 = vst [vmem:[#allocation88_spill] sm:$0xff] %v6212_v21 }
 0x293   :  { %1593 = vmatmul.f32.gmra.mxu0 %v5258_v8  ;;  %2136 = vmatmul.f32.gmra.mxu2 %v5521_v48 }
 0x294   :  { %1875 = vmatmul.f32.gmra.mxu1 %v8598_v63  ;;  %2353 = vmatmul.f32.gmra.mxu3 %v5486_v31 }
 0x296   :  { %v1117_v49 = vpop.f32.mrf.mxu2 }
 0x297   :  { %v1418_v56 = vpop.f32.mrf.mxu3 }
 0x298   :  { %v6223_v12 = vadd.f32 %v1418_v56, %v1109_v29  ;;  %v8602_v29 = vand.u32 4294901760, %v5321_v44  ;;  %v6241_v56 = vpop.f32.mrf.mxu0 }
 0x299   :  { %v6232_v63 = vpop.f32.mrf.mxu1 }
 0x29a   :  { %8599 = vst [vmem:[#allocation89_spill] sm:$0xff] %v6223_v12 }
 0x29b   :  { %1598 = vmatmul.f32.gmra.mxu0 %v5321_v44  ;;  %2140 = vmatmul.f32.gmra.mxu2 %v5554_v59 }
 0x29c   :  { %1881 = vmatmul.f32.gmra.mxu1 %v8600_v6  ;;  %2357 = vmatmul.f32.gmra.mxu3 %v5521_v48 }
 0x29e   :  { %v1125_v9 = vpop.f32.mrf.mxu2 }
 0x29f   :  { %v1422_v31 = vpop.f32.mrf.mxu3 }
 0x2a0   :  { %v6234_v21 = vadd.f32 %v1422_v31, %v1117_v49  ;;  %v8604_v49 = vand.u32 4294901760, %v5377_v39 }
 0x2a1   :  { %v6245_v12 = vpop.f32.mrf.mxu1 }
 0x2a2   :  { %8601 = vst [vmem:[#allocation90_spill] sm:$0xff] %v6234_v21 }
 0x2a3   :  { %1603 = vmatmul.f32.gmra.mxu0 %v5377_v39  ;;  %2144 = vmatmul.f32.gmra.mxu2 %v5583_v32 }
 0x2a4   :  { %1887 = vmatmul.f32.gmra.mxu1 %v8602_v29  ;;  %2361 = vmatmul.f32.gmra.mxu3 %v5554_v59  ;;  %v6254_v29 = vpop.f32.mrf.mxu0 }
 0x2a6   :  { %v1133_v8 = vpop.f32.mrf.mxu2 }
 0x2a7   :  { %v1426_v48 = vpop.f32.mrf.mxu3 }
 0x2a8   :  { %v6243_v6 = vadd.f32 %v1426_v48, %v1125_v9  ;;  %v8606_v9 = vand.u32 4294901760, %v5424_v1 }
 0x2a9   :  { %v6256_v21 = vpop.f32.mrf.mxu1 }
 0x2aa   :  { %8603 = vst [vmem:[#allocation91_spill] sm:$0xff] %v6243_v6 }
 0x2ab   :  { %1608 = vmatmul.f32.gmra.mxu0 %v5424_v1  ;;  %2148 = vmatmul.f32.gmra.mxu2 %v5609_v26 }
 0x2ac   :  { %1893 = vmatmul.f32.gmra.mxu1 %v8604_v49  ;;  %2365 = vmatmul.f32.gmra.mxu3 %v5583_v32  ;;  %v6265_v49 = vpop.f32.mrf.mxu0 }
 0x2ae   :  { %v1141_v44 = vpop.f32.mrf.mxu2 }
 0x2af   :  { %v1430_v31 = vpop.f32.mrf.mxu3 }
 0x2b0   :  { %v6252_v59 = vadd.f32 %v1430_v31, %v1133_v8  ;;  %v8608_v8 = vand.u32 4294901760, %v5470_v23 }
 0x2b1   :  { %v6272_v31 = vpop.f32.mrf.mxu1 }
 0x2b2   :  { %8605 = vst [vmem:[#allocation92_spill] sm:$0xff] %v6252_v59  ;;  %v8622_v59 = vld [vmem:[#allocation41_spill] sm:$0xff] }
 0x2b3   :  { %1613 = vmatmul.f32.gmra.mxu0 %v5470_v23  ;;  %2152 = vmatmul.f32.gmra.mxu2 %v5638_v10 }
 0x2b4   :  { %1899 = vmatmul.f32.gmra.mxu1 %v8606_v9  ;;  %2369 = vmatmul.f32.gmra.mxu3 %v5609_v26 }
 0x2b6   :  { %v1149_v39 = vpop.f32.mrf.mxu2 }
 0x2b7   :  { %v1434_v48 = vpop.f32.mrf.mxu3 }
 0x2b8   :  { %v6263_v32 = vadd.f32 %v1434_v48, %v1141_v44  ;;  %v8610_v44 = vand.u32 4294901760, %v5513_v62  ;;  %v6281_v48 = vpop.f32.mrf.mxu0 }
 0x2ba   :  { %8607 = vst [vmem:[#allocation93_spill] sm:$0xff] %v6263_v32 }
 0x2bb   :  { %1618 = vmatmul.f32.gmra.mxu0 %v5513_v62  ;;  %2156 = vmatmul.f32.gmra.mxu2 %v5667_v47 }
 0x2bc   :  { %1905 = vmatmul.f32.gmra.mxu1 %v8608_v8  ;;  %2373 = vmatmul.f32.gmra.mxu3 %v5638_v10  ;;  %v6283_v8 = vpop.f32.mrf.mxu1 }
 0x2be   :  { %v1157_v1 = vpop.f32.mrf.mxu2 }
 0x2bf   :  { %v1438_v9 = vpop.f32.mrf.mxu3 }
 0x2c0   :  { %v6274_v26 = vadd.f32 %v1438_v9, %v1149_v39  ;;  %v8612_v39 = vand.u32 4294901760, %v5547_v14  ;;  %v6292_v9 = vpop.f32.mrf.mxu0 }
 0x2c2   :  { %8609 = vst [vmem:[#allocation94_spill] sm:$0xff] %v6274_v26 }
 0x2c3   :  { %1623 = vmatmul.f32.gmra.mxu0 %v5547_v14  ;;  %2160 = vmatmul.f32.gmra.mxu2 %v5693_v11 }
 0x2c4   :  { %1911 = vmatmul.f32.gmra.mxu1 %v8610_v44  ;;  %2377 = vmatmul.f32.gmra.mxu3 %v5667_v47  ;;  %v6296_v26 = vpop.f32.mrf.mxu1 }
 0x2c6   :  { %v1165_v23 = vpop.f32.mrf.mxu2 }
 0x2c7   :  { %v1442_v10 = vpop.f32.mrf.mxu3 }
 0x2c8   :  { %v6285_v32 = vadd.f32 %v1442_v10, %v1157_v1  ;;  %v8614_v1 = vand.u32 4294901760, %v5575_v57 }
 0x2ca   :  { %8611 = vst [vmem:[#allocation95_spill] sm:$0xff] %v6285_v32 }
 0x2cb   :  { %1628 = vmatmul.f32.gmra.mxu0 %v5575_v57  ;;  %2164 = vmatmul.f32.gmra.mxu2 %v5722_v50 }
 0x2cc   :  { %1917 = vmatmul.f32.gmra.mxu1 %v8612_v39  ;;  %2381 = vmatmul.f32.gmra.mxu3 %v5693_v11  ;;  %v6305_v39 = vpop.f32.mrf.mxu0  ;;  %v6307_v32 = vpop.f32.mrf.mxu1 }
 0x2ce   :  { %v1173_v62 = vpop.f32.mrf.mxu2 }
 0x2cf   :  { %v1446_v47 = vpop.f32.mrf.mxu3 }
 0x2d0   :  { %v6294_v44 = vadd.f32 %v1446_v47, %v1165_v23  ;;  %v8616_v23 = vand.u32 4294901760, %v5603_v61 }
 0x2d2   :  { %8613 = vst [vmem:[#allocation96_spill] sm:$0xff] %v6294_v44 }
 0x2d3   :  { %1633 = vmatmul.f32.gmra.mxu0 %v5603_v61  ;;  %2168 = vmatmul.f32.gmra.mxu2 %v5751_v41 }
 0x2d4   :  { %1923 = vmatmul.f32.gmra.mxu1 %v8614_v1  ;;  %2385 = vmatmul.f32.gmra.mxu3 %v5722_v50  ;;  %v6316_v1 = vpop.f32.mrf.mxu0  ;;  %v6323_v44 = vpop.f32.mrf.mxu1 }
 0x2d6   :  { %v1181_v14 = vpop.f32.mrf.mxu2 }
 0x2d7   :  { %v1450_v10 = vpop.f32.mrf.mxu3 }
 0x2d8   :  { %v6303_v11 = vadd.f32 %v1450_v10, %v1173_v62  ;;  %v8618_v62 = vld [vmem:[#allocation13_spill] sm:$0xff]  ;;  %v8619_v10 = vld [vmem:[#allocation31_spill] sm:$0xff] }
 0x2da   :  { %8615 = vst [vmem:[#allocation97_spill] sm:$0xff] %v6303_v11  ;;  %v8620_v11 = vand.u32 4294901760, %v5631_v30 }
 0x2db   :  { %1638 = vmatmul.f32.gmra.mxu0 %v5631_v30  ;;  %2172 = vmatmul.f32.gmra.mxu2 %v5777_v55 }
 0x2dc   :  { %1929 = vmatmul.f32.gmra.mxu1 %v8616_v23  ;;  %2389 = vmatmul.f32.gmra.mxu3 %v5751_v41  ;;  %v8621_v41 = vld [vmem:[#allocation35_spill] sm:$0xff] }
 0x2dd   :  { %v1271_v6 = vadd.f32 %v8622_v59, %v8621_v41  ;;  %v6338_v59 = vpop.f32.mrf.mxu1 }
 0x2de   :  { %v1189_v57 = vpop.f32.mrf.mxu2 }
 0x2df   :  { %v1454_v47 = vpop.f32.mrf.mxu3 }
 0x2e0   :  { %v6314_v50 = vadd.f32 %v1454_v47, %v1181_v14  ;;  %v1505_v47 = vadd.f32 %v6203_v37, %v1271_v6  ;;  %v8626_v37 = vld [vmem:[#allocation39_spill] sm:$0xff]  ;;  %v8627_v6 = vld [vmem:[#allocation46_spill] sm:$0xff] }
 0x2e2   :  { %8617 = vst [vmem:[#allocation98_spill] sm:$0xff] %v6314_v50  ;;  %v8624_v50 = vld [vmem:[#allocation19_spill] sm:$0xff]  ;;  %v1775_v30 = vadd.f32 %v6205_v60, %v1505_v47  ;;  %v8628_v60 = vld [vmem:[#allocation24_spill] sm:$0xff] }
 0x2e3   :  { %1643 = vmatmul.f32.gmra.mxu0 %v8618_v62  ;;  %2176 = vmatmul.f32.gmra.mxu2 %v8619_v10 }
 0x2e4   :  { %1935 = vmatmul.f32.gmra.mxu1 %v8620_v11  ;;  %2393 = vmatmul.f32.gmra.mxu3 %v5777_v55  ;;  %v8625_v11 = vand.u32 4294901760, %v8618_v62  ;;  %v6336_v55 = vpop.f32.mrf.mxu0  ;;  %v8629_v62 = vld [vmem:[#allocation15_spill] sm:$0xff] }
 0x2e6   :  { %v2113_v61 = vpop.f32.mrf.mxu2 }
 0x2e7   :  { %v1458_v23 = vpop.f32.mrf.mxu3  ;;  %v2114_v38 = vadd.f32 %v2113_v61, %v1775_v30  ;;  %v8630_v61 = vand.u32 4294901760, %v8624_v50 }
 0x2e8   :  { %v6327_v14 = vadd.f32 %v1458_v23, %v1189_v57  ;;  %v1275_v23 = vadd.f32 %v8627_v6, %v8626_v37 }
 0x2ea   :  { %8623 = vst [vmem:[#allocation13_spill] sm:$0xff] %v6327_v14  ;;  %v1510_v14 = vadd.f32 %v6214_v28, %v1275_v23  ;;  %v8632_v28 = vld [vmem:[#allocation52_spill] sm:$0xff]  ;;  %v6354_v23 = vpop.f32.mrf.mxu1 }
 0x2eb   :  { %1648 = vmatmul.f32.gmra.mxu0 %v8624_v50  ;;  %2180 = vmatmul.f32.gmra.mxu2 %v5835_v7  ;;  %v8634_v50 = vld [vmem:[#allocation9_spill] sm:$0xff] }
 0x2ec   :  { %1941 = vmatmul.f32.gmra.mxu1 %v8625_v11  ;;  %2397 = vmatmul.f32.gmra.mxu3 %v8619_v10  ;;  %v1781_v10 = vadd.f32 %v6221_v34, %v1510_v14  ;;  %v6350_v11 = vpop.f32.mrf.mxu0  ;;  %v8633_v34 = vld [vmem:[#allocation26_spill] sm:$0xff] }
 0x2ee   :  { %v2117_v27 = vpop.f32.mrf.mxu2 }
 0x2ef   :  { %v2334_v57 = vpop.f32.mrf.mxu3  ;;  %v2118_v47 = vadd.f32 %v2117_v27, %v1781_v10  ;;  %v8635_v27 = vand.u32 4294901760, %v8628_v60 }
 0x2f0   :  { %v2335_v41 = vadd.f32 %v2334_v57, %v2114_v38  ;;  %v8631_v57 = vld [vmem:[#allocation45_spill] sm:$0xff] }
 0x2f1   :  { %v1279_v37 = vadd.f32 %v8632_v28, %v8631_v57 }
 0x2f2   :  { %2526 = vst.msk [vmem:[#allocation2] sm:$0xff] %vm8470_vm2, %v2335_v41 }
 0x2f3   :  { %1653 = vmatmul.f32.gmra.mxu0 %v8628_v60  ;;  %2184 = vmatmul.f32.gmra.mxu2 %v8629_v62  ;;  %v1515_v41 = vadd.f32 %v6230_v42, %v1279_v37  ;;  %v6370_v37 = vpop.f32.mrf.mxu1  ;;  %v8638_v60 = vld [vmem:[#allocation11_spill] sm:$0xff] }
 0x2f4   :  { %1947 = vmatmul.f32.gmra.mxu1 %v8630_v61  ;;  %2401 = vmatmul.f32.gmra.mxu3 %v5835_v7  ;;  %v6366_v57 = vpop.f32.mrf.mxu0 }
 0x2f5   :  { %v1787_v7 = vadd.f32 %v6232_v63, %v1515_v41  ;;  %v8637_v63 = vld [vmem:[#allocation28_spill] sm:$0xff] }
 0x2f6   :  { %v2121_v30 = vpop.f32.mrf.mxu2 }
 0x2f7   :  { %v2338_v38 = vpop.f32.mrf.mxu3  ;;  %v2122_v14 = vadd.f32 %v2121_v30, %v1787_v7  ;;  %v8639_v30 = vand.u32 4294901760, %v8633_v34  ;;  %v8640_v7 = vld [vmem:[#allocation56_spill] sm:$0xff] }
 0x2f8   :  { %v2339_v6 = vadd.f32 %v2338_v38, %v2118_v47  ;;  %v8636_v47 = vld [vmem:[#allocation50_spill] sm:$0xff] }
 0x2f9   :  { %v1283_v38 = vadd.f32 %v5951_v54, %v8636_v47  ;;  %v8641_v47 = vld [vmem:[#allocation30_spill] sm:$0xff] }
 0x2fa   :  { %2527 = vst.msk [vmem:[#allocation2 + $0x8] sm:$0xff] %vm8470_vm2, %v2339_v6 }
 0x2fb   :  { %1658 = vmatmul.f32.gmra.mxu0 %v8633_v34  ;;  %2188 = vmatmul.f32.gmra.mxu2 %v8634_v50  ;;  %v1520_v28 = vadd.f32 %v6241_v56, %v1283_v38  ;;  %v1287_v56 = vadd.f32 %v5974_v53, %v8640_v7 }
 0x2fc   :  { %1953 = vmatmul.f32.gmra.mxu1 %v8635_v27  ;;  %2405 = vmatmul.f32.gmra.mxu3 %v8629_v62 }
 0x2fd   :  { %v1793_v62 = vadd.f32 %v6245_v12, %v1520_v28  ;;  %v8642_v12 = vld [vmem:[#allocation20_spill] sm:$0xff] }
 0x2fe   :  { %v2125_v10 = vpop.f32.mrf.mxu2 }
 0x2ff   :  { %v2342_v61 = vpop.f32.mrf.mxu3  ;;  %v2126_v54 = vadd.f32 %v2125_v10, %v1793_v62  ;;  %v6390_v10 = vpop.f32.mrf.mxu1 }
 0x300   :  { %v2343_v42 = vadd.f32 %v2342_v61, %v2122_v14  ;;  %v1525_v14 = vadd.f32 %v6254_v29, %v1287_v56  ;;  %v6382_v61 = vpop.f32.mrf.mxu0  ;;  %v8648_v56 = vld [vmem:[#allocation64_spill] sm:$0xff] }
 0x302   :  { %2528 = vst.msk [vmem:[#allocation2 + $0x10] sm:$0xff] %vm8470_vm2, %v2343_v42  ;;  %v1799_v34 = vadd.f32 %v6256_v21, %v1525_v14  ;;  %v8644_v42 = vld [vmem:[#allocation60_spill] sm:$0xff]  ;;  %v8646_v21 = vld [vmem:[#allocation23_spill] sm:$0xff] }
 0x303   :  { %1663 = vmatmul.f32.gmra.mxu0 %v8637_v63  ;;  %2192 = vmatmul.f32.gmra.mxu2 %v8638_v60  ;;  %v1291_v28 = vadd.f32 %v5997_v36, %v8644_v42  ;;  %v8652_v42 = vld [vmem:[#allocation68_spill] sm:$0xff] }
 0x304   :  { %1959 = vmatmul.f32.gmra.mxu1 %v8639_v30  ;;  %2409 = vmatmul.f32.gmra.mxu3 %v8634_v50  ;;  %v8643_v50 = vand.u32 4294901760, %v8637_v63 }
 0x305   :  { %v1530_v30 = vadd.f32 %v6265_v49, %v1291_v28 }
 0x306   :  { %v2129_v6 = vpop.f32.mrf.mxu2 }
 0x307   :  { %v2346_v41 = vpop.f32.mrf.mxu3  ;;  %v2130_v53 = vadd.f32 %v2129_v6, %v1799_v34  ;;  %v1805_v63 = vadd.f32 %v6272_v31, %v1530_v30  ;;  %v6404_v7 = vpop.f32.mrf.mxu1  ;;  %v8649_v31 = vld [vmem:[#allocation36_spill] sm:$0xff] }
 0x308   :  { %v2347_v27 = vadd.f32 %v2346_v41, %v2126_v54  ;;  %v8645_v54 = vld [vmem:[#allocation33_spill] sm:$0xff]  ;;  %v6402_v6 = vpop.f32.mrf.mxu0 }
 0x30a   :  { %2529 = vst.msk [vmem:[#allocation2 + $0x18] sm:$0xff] %vm8470_vm2, %v2347_v27  ;;  %v1295_v27 = vadd.f32 %v6020_v17, %v8648_v56 }
 0x30b   :  { %1668 = vmatmul.f32.gmra.mxu0 %v8641_v47  ;;  %2196 = vmatmul.f32.gmra.mxu2 %v8642_v12 }
 0x30c   :  { %1965 = vmatmul.f32.gmra.mxu1 %v8643_v50  ;;  %2413 = vmatmul.f32.gmra.mxu3 %v8638_v60  ;;  %v8647_v60 = vand.u32 4294901760, %v8641_v47  ;;  %v1535_v34 = vadd.f32 %v6281_v48, %v1295_v27  ;;  %v8650_v47 = vld [vmem:[#allocation12_spill] sm:$0xff]  ;;  %v8651_v50 = vand.u32 4294901760, %v8645_v54  ;;  %v1299_v48 = vadd.f32 %v6043_v25, %v8652_v42 }
 0x30e   :  { %v2133_v38 = vpop.f32.mrf.mxu2  ;;  %v1540_v30 = vadd.f32 %v6292_v9, %v1299_v48  ;;  %v8661_v48 = vld [vmem:[#allocation48_spill] sm:$0xff] }
 0x30f   :  { %v2350_v29 = vpop.f32.mrf.mxu3  ;;  %v2134_v41 = vadd.f32 %v2133_v38, %v1805_v63  ;;  %v8655_v63 = vand.u32 4294901760, %v8649_v31 }
 0x310   :  { %v2351_v62 = vadd.f32 %v2350_v29, %v2130_v53  ;;  %v6416_v29 = vpop.f32.mrf.mxu0 }
 0x312   :  { %2530 = vst.msk [vmem:[#allocation2 + $0x20] sm:$0xff] %vm8470_vm2, %v2351_v62  ;;  %v6420_v62 = vpop.f32.mrf.mxu1 }
 0x313   :  { %1673 = vmatmul.f32.gmra.mxu0 %v8645_v54  ;;  %2200 = vmatmul.f32.gmra.mxu2 %v8646_v21  ;;  %v8654_v54 = vld [vmem:[#allocation22_spill] sm:$0xff] }
 0x314   :  { %1971 = vmatmul.f32.gmra.mxu1 %v8647_v60  ;;  %2417 = vmatmul.f32.gmra.mxu3 %v8642_v12  ;;  %v1811_v12 = vadd.f32 %v6283_v8, %v1535_v34  ;;  %v8653_v8 = vld [vmem:[#allocation40_spill] sm:$0xff]  ;;  %v8658_v34 = vld [vmem:[#allocation10_spill] sm:$0xff] }
 0x316   :  { %v2137_v36 = vpop.f32.mrf.mxu2 }
 0x317   :  { %v2354_v49 = vpop.f32.mrf.mxu3  ;;  %v2138_v53 = vadd.f32 %v2137_v36, %v1811_v12  ;;  %v8656_v36 = vld [vmem:[#allocation71_spill] sm:$0xff] }
 0x318   :  { %v2355_v14 = vadd.f32 %v2354_v49, %v2134_v41  ;;  %v1303_v49 = vadd.f32 %v6066_v2, %v8656_v36  ;;  %v6432_v56 = vpop.f32.mrf.mxu0 }
 0x31a   :  { %2531 = vst.msk [vmem:[#allocation2 + $0x28] sm:$0xff] %vm8470_vm2, %v2355_v14  ;;  %v1545_v27 = vadd.f32 %v6305_v39, %v1303_v49  ;;  %v6436_v14 = vpop.f32.mrf.mxu1  ;;  %v8667_v49 = vand.u32 4294901760, %v8661_v48 }
 0x31b   :  { %1678 = vmatmul.f32.gmra.mxu0 %v8649_v31  ;;  %2204 = vmatmul.f32.gmra.mxu2 %v8650_v47 }
 0x31c   :  { %1977 = vmatmul.f32.gmra.mxu1 %v8651_v50  ;;  %2421 = vmatmul.f32.gmra.mxu3 %v8646_v21  ;;  %v1817_v21 = vadd.f32 %v6296_v26, %v1540_v30  ;;  %v8657_v26 = vld [vmem:[#allocation44_spill] sm:$0xff]  ;;  %v1823_v31 = vadd.f32 %v6307_v32, %v1545_v27 }
 0x31d   :  { %v8662_v32 = vld [vmem:[#allocation16_spill] sm:$0xff]  ;;  %v8663_v30 = vand.u32 4294901760, %v8657_v26 }
 0x31e   :  { %v2141_v38 = vpop.f32.mrf.mxu2 }
 0x31f   :  { %v2358_v17 = vpop.f32.mrf.mxu3  ;;  %v2142_v60 = vadd.f32 %v2141_v38, %v1817_v21  ;;  %v8664_v21 = vld [vmem:[#allocation78_spill] sm:$0xff] }
 0x320   :  { %v2359_v28 = vadd.f32 %v2358_v17, %v2138_v53  ;;  %v8660_v53 = vld [vmem:[#allocation75_spill] sm:$0xff]  ;;  %v6448_v42 = vpop.f32.mrf.mxu0 }
 0x321   :  { %v1307_v39 = vadd.f32 %v6089_v51, %v8660_v53 }
 0x322   :  { %2532 = vst.msk [vmem:[#allocation2 + $0x30] sm:$0xff] %vm8470_vm2, %v2359_v28 }
 0x323   :  { %1683 = vmatmul.f32.gmra.mxu0 %v8653_v8  ;;  %2208 = vmatmul.f32.gmra.mxu2 %v8654_v54  ;;  %v1550_v17 = vadd.f32 %v6316_v1, %v1307_v39 }
 0x324   :  { %1983 = vmatmul.f32.gmra.mxu1 %v8655_v63  ;;  %2425 = vmatmul.f32.gmra.mxu3 %v8650_v47  ;;  %v8659_v47 = vand.u32 4294901760, %v8653_v8  ;;  %v6456_v8 = vpop.f32.mrf.mxu1  ;;  %v1311_v63 = vadd.f32 %v6112_v13, %v8664_v21 }
 0x325   :  { %v1829_v28 = vadd.f32 %v6323_v44, %v1550_v17  ;;  %v8666_v44 = vld [vmem:[#allocation18_spill] sm:$0xff] }
 0x326   :  { %v2145_v25 = vpop.f32.mrf.mxu2 }
 0x327   :  { %v2362_v41 = vpop.f32.mrf.mxu3  ;;  %v2146_v2 = vadd.f32 %v2145_v25, %v1823_v31  ;;  %v1555_v25 = vadd.f32 %v6336_v55, %v1311_v63 }
 0x328   :  { %v2363_v9 = vadd.f32 %v2362_v41, %v2142_v60  ;;  %v8665_v41 = vld [vmem:[#allocation53_spill] sm:$0xff] }
 0x329   :  { %v1835_v36 = vadd.f32 %v6338_v59, %v1555_v25  ;;  %v8668_v59 = vld [vmem:[#allocation57_spill] sm:$0xff] }
 0x32a   :  { %2533 = vst.msk [vmem:[#allocation2 + $0x38] sm:$0xff] %vm8470_vm2, %v2363_v9  ;;  %v6468_v9 = vpop.f32.mrf.mxu0 }
 0x32b   :  { %1688 = vmatmul.f32.gmra.mxu0 %v8657_v26  ;;  %2212 = vmatmul.f32.gmra.mxu2 %v8658_v34 }
 0x32c   :  { %1989 = vmatmul.f32.gmra.mxu1 %v8659_v47  ;;  %2429 = vmatmul.f32.gmra.mxu3 %v8654_v54  ;;  %v6470_v26 = vpop.f32.mrf.mxu1 }
 0x32e   :  { %v2149_v12 = vpop.f32.mrf.mxu2 }
 0x32f   :  { %v2366_v50 = vpop.f32.mrf.mxu3  ;;  %v2150_v51 = vadd.f32 %v2149_v12, %v1829_v28 }
 0x330   :  { %v2367_v38 = vadd.f32 %v2366_v50, %v2146_v2  ;;  %v8669_v2 = vld [vmem:[#allocation21_spill] sm:$0xff]  ;;  %v8670_v50 = vand.u32 4294901760, %v8665_v41 }
 0x332   :  { %2534 = vst.msk [vmem:[#allocation2 + $0x40] sm:$0xff] %vm8470_vm2, %v2367_v38  ;;  %v6482_v38 = vpop.f32.mrf.mxu0 }
 0x333   :  { %1693 = vmatmul.f32.gmra.mxu0 %v8661_v48  ;;  %2216 = vmatmul.f32.gmra.mxu2 %v8662_v32 }
 0x334   :  { %1995 = vmatmul.f32.gmra.mxu1 %v8663_v30  ;;  %2433 = vmatmul.f32.gmra.mxu3 %v8658_v34  ;;  %v1315_v34 = vadd.f32 %v6129_v35, %v6110_v52  ;;  %v1319_v52 = vadd.f32 %v6142_v46, %v6127_v18  ;;  %v6486_v17 = vpop.f32.mrf.mxu1  ;;  %v8673_v30 = vand.u32 4294901760, %v8668_v59 }
 0x336   :  { %v2153_v54 = vpop.f32.mrf.mxu2  ;;  %v1560_v47 = vadd.f32 %v6350_v11, %v1315_v34  ;;  %v1565_v48 = vadd.f32 %v6366_v57, %v1319_v52  ;;  %v1335_v52 = vadd.f32 %v6183_v40, %v6179_v19  ;;  %v1339_v19 = vadd.f32 %v6194_v24, %v6190_v58 }
 0x337   :  { %v2370_v1 = vpop.f32.mrf.mxu3  ;;  %v2154_v27 = vadd.f32 %v2153_v54, %v1835_v36  ;;  %v1323_v54 = vadd.f32 %v6152_v43, %v6140_v3 }
 0x338   :  { %v2371_v60 = vadd.f32 %v2370_v1, %v2150_v51  ;;  %v1841_v12 = vadd.f32 %v6354_v23, %v1560_v47  ;;  %v8671_v23 = vld [vmem:[#allocation61_spill] sm:$0xff]  ;;  %v1847_v28 = vadd.f32 %v6370_v37, %v1565_v48  ;;  %v1331_v47 = vadd.f32 %v6172_v4, %v6163_v16 }
 0x339   :  { %v1570_v21 = vadd.f32 %v6382_v61, %v1323_v54  ;;  %v8674_v37 = vld [vmem:[#allocation65_spill] sm:$0xff]  ;;  %v1327_v61 = vadd.f32 %v6161_v15, %v6150_v5  ;;  %v1585_v48 = vadd.f32 %v6432_v56, %v1335_v52  ;;  %v1590_v54 = vadd.f32 %v6448_v42, %v1339_v19 }
 0x33a   :  { %2535 = vst.msk [vmem:[#allocation2 + $0x48] sm:$0xff] %vm8470_vm2, %v2371_v60  ;;  %v6498_v1 = vpop.f32.mrf.mxu0  ;;  %v8675_v60 = vld [vmem:[#allocation14_spill] sm:$0xff]  ;;  %v8679_v34 = vand.u32 4294901760, %v8674_v37 }
 0x33b   :  { %1698 = vmatmul.f32.gmra.mxu0 %v8665_v41  ;;  %2220 = vmatmul.f32.gmra.mxu2 %v8666_v44  ;;  %v1853_v25 = vadd.f32 %v6390_v10, %v1570_v21  ;;  %v8676_v41 = vand.u32 4294901760, %v8671_v23  ;;  %v8678_v10 = vld [vmem:[#allocation25_spill] sm:$0xff] }
 0x33c   :  { %2001 = vmatmul.f32.gmra.mxu1 %v8667_v49  ;;  %2437 = vmatmul.f32.gmra.mxu3 %v8662_v32  ;;  %v8672_v32 = vld [vmem:[#allocation17_spill] sm:$0xff]  ;;  %v6502_v63 = vpop.f32.mrf.mxu1  ;;  %v1575_v49 = vadd.f32 %v6402_v6, %v1327_v61 }
 0x33e   :  { %v2157_v13 = vpop.f32.mrf.mxu2 }
 0x33f   :  { %v2374_v55 = vpop.f32.mrf.mxu3  ;;  %v2158_v53 = vadd.f32 %v2157_v13, %v1841_v12  ;;  %v8677_v13 = vld [vmem:[#allocation69_spill] sm:$0xff]  ;;  %v8680_v12 = vld [vmem:[#allocation72_spill] sm:$0xff] }
 0x340   :  { %v2375_v31 = vadd.f32 %v2374_v55, %v2154_v27  ;;  %v1859_v55 = vadd.f32 %v6404_v7, %v1575_v49  ;;  %v8681_v7 = vld [vmem:[#allocation27_spill] sm:$0xff] }
 0x342   :  { %2536 = vst.msk [vmem:[#allocation2 + $0x50] sm:$0xff] %vm8470_vm2, %v2375_v31  ;;  %v6514_v27 = vpop.f32.mrf.mxu0 }
 0x343   :  { %1703 = vmatmul.f32.gmra.mxu0 %v8668_v59  ;;  %2224 = vmatmul.f32.gmra.mxu2 %v8669_v2 }
 0x344   :  { %2007 = vmatmul.f32.gmra.mxu1 %v8670_v50  ;;  %2441 = vmatmul.f32.gmra.mxu3 %v8666_v44  ;;  %v6522_v31 = vpop.f32.mrf.mxu1 }
 0x346   :  { %v2161_v39 = vpop.f32.mrf.mxu2 }
 0x347   :  { %v2378_v35 = vpop.f32.mrf.mxu3  ;;  %v2162_v51 = vadd.f32 %v2161_v39, %v1847_v28  ;;  %v8685_v28 = vand.u32 4294901760, %v8680_v12 }
 0x348   :  { %v2379_v11 = vadd.f32 %v2378_v35, %v2158_v53  ;;  %v8682_v53 = vand.u32 4294901760, %v8677_v13 }
 0x34a   :  { %2537 = vst.msk [vmem:[#allocation2 + $0x58] sm:$0xff] %vm8470_vm2, %v2379_v11  ;;  %v6534_v39 = vpop.f32.mrf.mxu0 }
 0x34b   :  { %1708 = vmatmul.f32.gmra.mxu0 %v8671_v23  ;;  %2228 = vmatmul.f32.gmra.mxu2 %v8672_v32  ;;  %v8684_v23 = vld [vmem:[#allocation29_spill] sm:$0xff] }
 0x34c   :  { %2013 = vmatmul.f32.gmra.mxu1 %v8673_v30  ;;  %2445 = vmatmul.f32.gmra.mxu3 %v8669_v2  ;;  %v1580_v2 = vadd.f32 %v6416_v29, %v1331_v47  ;;  %v6536_v16 = vpop.f32.mrf.mxu1 }
 0x34e   :  { %v2165_v18 = vpop.f32.mrf.mxu2  ;;  %v1865_v50 = vadd.f32 %v6420_v62, %v1580_v2  ;;  %v8683_v62 = vld [vmem:[#allocation76_spill] sm:$0xff] }
 0x34f   :  { %v2382_v46 = vpop.f32.mrf.mxu3  ;;  %v2166_v3 = vadd.f32 %v2165_v18, %v1853_v25  ;;  %v8687_v21 = vand.u32 4294901760, %v8683_v62  ;;  %v8689_v25 = vld [vmem:[#allocation43_spill] sm:$0xff] }
 0x350   :  { %v2383_v57 = vadd.f32 %v2382_v46, %v2162_v51 }
 0x352   :  { %2538 = vst.msk [vmem:[#allocation2 + $0x60] sm:$0xff] %vm8470_vm2, %v2383_v57  ;;  %v6548_v18 = vpop.f32.mrf.mxu0  ;;  %v1877_v57 = vadd.f32 %v6456_v8, %v1590_v54  ;;  %v8690_v8 = vld [vmem:[#allocation34_spill] sm:$0xff] }
 0x353   :  { %1713 = vmatmul.f32.gmra.mxu0 %v8674_v37  ;;  %2232 = vmatmul.f32.gmra.mxu2 %v8675_v60 }
 0x354   :  { %2019 = vmatmul.f32.gmra.mxu1 %v8676_v41  ;;  %2449 = vmatmul.f32.gmra.mxu3 %v8672_v32  ;;  %v1871_v32 = vadd.f32 %v6436_v14, %v1585_v48  ;;  %v6552_v46 = vpop.f32.mrf.mxu1  ;;  %v8686_v14 = vld [vmem:[#allocation32_spill] sm:$0xff] }
 0x356   :  { %v2169_v43 = vpop.f32.mrf.mxu2 }
 0x357   :  { %v2386_v44 = vpop.f32.mrf.mxu3  ;;  %v2170_v5 = vadd.f32 %v2169_v43, %v1859_v55 }
 0x358   :  { %v2387_v36 = vadd.f32 %v2386_v44, %v2166_v3 }
 0x35a   :  { %2539 = vst.msk [vmem:[#allocation2 + $0x68] sm:$0xff] %vm8470_vm2, %v2387_v36  ;;  %v6564_v3 = vpop.f32.mrf.mxu0  ;;  %v8691_v36 = vand.u32 4294901760, %v6099_v22 }
 0x35b   :  { %1718 = vmatmul.f32.gmra.mxu0 %v8677_v13  ;;  %2236 = vmatmul.f32.gmra.mxu2 %v8678_v10 }
 0x35c   :  { %2025 = vmatmul.f32.gmra.mxu1 %v8679_v34  ;;  %2453 = vmatmul.f32.gmra.mxu3 %v8675_v60  ;;  %v8688_v60 = vld [vmem:[#allocation38_spill] sm:$0xff]  ;;  %v6568_v44 = vpop.f32.mrf.mxu1 }
 0x35d   :  { %v1343_v41 = vadd.f32 %v8689_v25, %v8688_v60 }
 0x35e   :  { %v2173_v15 = vpop.f32.mrf.mxu2 }
 0x35f   :  { %v2390_v6 = vpop.f32.mrf.mxu3  ;;  %v2174_v35 = vadd.f32 %v2173_v15, %v1865_v50  ;;  %v1595_v43 = vadd.f32 %v6468_v9, %v1343_v41  ;;  %v8692_v9 = vld [vmem:[#allocation49_spill] sm:$0xff]  ;;  %v8696_v50 = vld [vmem:[#allocation42_spill] sm:$0xff] }
 0x360   :  { %v2391_v59 = vadd.f32 %v2390_v6, %v2170_v5  ;;  %v1600_v34 = vadd.f32 %v6482_v38, %v8692_v9  ;;  %v8693_v15 = vld [vmem:[#allocation37_spill] sm:$0xff]  ;;  %v8705_v9 = vld [vmem:[#allocation74_spill] sm:$0xff] }
 0x361   :  { %v1883_v61 = vadd.f32 %v6470_v26, %v1595_v43  ;;  %v8703_v43 = vld [vmem:[#allocation70_spill] sm:$0xff] }
 0x362   :  { %2540 = vst.msk [vmem:[#allocation2 + $0x70] sm:$0xff] %vm8470_vm2, %v2391_v59  ;;  %v6579_v5 = vpop.f32.mrf.mxu0  ;;  %v1889_v26 = vadd.f32 %v6486_v17, %v1600_v34 }
 0x363   :  { %1723 = vmatmul.f32.gmra.mxu0 %v8680_v12  ;;  %2240 = vmatmul.f32.gmra.mxu2 %v8681_v7  ;;  %v1630_v34 = vadd.f32 %v6579_v5, %v8705_v9 }
 0x364   :  { %2031 = vmatmul.f32.gmra.mxu1 %v8682_v53  ;;  %2457 = vmatmul.f32.gmra.mxu3 %v8678_v10  ;;  %v1924_v6 = vpop.f32.mrf.mxu1 }
 0x366   :  { %v2177_v4 = vpop.f32.mrf.mxu2 }
 0x367   :  { %v2394_v29 = vpop.f32.mrf.mxu3  ;;  %v2178_v30 = vadd.f32 %v2177_v4, %v1871_v32 }
 0x368   :  { %v2395_v11 = vadd.f32 %v2394_v29, %v2174_v35 }
 0x36a   :  { %2541 = vst.msk [vmem:[#allocation2 + $0x78] sm:$0xff] %vm8470_vm2, %v2395_v11  ;;  %v8697_v11 = vld [vmem:[#allocation59_spill] sm:$0xff] }
 0x36b   :  { %1728 = vmatmul.f32.gmra.mxu0 %v8683_v62  ;;  %2244 = vmatmul.f32.gmra.mxu2 %v8684_v23  ;;  %v1610_v48 = vadd.f32 %v6514_v27, %v8697_v11  ;;  %v8700_v27 = vld [vmem:[#allocation51_spill] sm:$0xff] }
 0x36c   :  { %2037 = vmatmul.f32.gmra.mxu1 %v8685_v28  ;;  %2461 = vmatmul.f32.gmra.mxu3 %v8681_v7  ;;  %v8695_v7 = vld [vmem:[#allocation54_spill] sm:$0xff]  ;;  %v1930_v4 = vpop.f32.mrf.mxu1 }
 0x36d   :  { %v1605_v38 = vadd.f32 %v6498_v1, %v8695_v7  ;;  %v8698_v1 = vld [vmem:[#allocation47_spill] sm:$0xff]  ;;  %v1901_v62 = vadd.f32 %v6522_v31, %v1610_v48 }
 0x36e   :  { %v2181_v51 = vpop.f32.mrf.mxu2 }
 0x36f   :  { %v2398_v40 = vpop.f32.mrf.mxu3  ;;  %v2182_v37 = vadd.f32 %v2181_v51, %v1877_v57  ;;  %v1895_v53 = vadd.f32 %v6502_v63, %v1605_v38  ;;  %v8708_v38 = vld [vmem:[#allocation66_spill] sm:$0xff] }
 0x370   :  { %v2399_v56 = vadd.f32 %v2398_v40, %v2178_v30  ;;  %v8699_v40 = vld [vmem:[#allocation63_spill] sm:$0xff] }
 0x371   :  { %v1615_v19 = vadd.f32 %v6534_v39, %v8699_v40  ;;  %v8702_v39 = vld [vmem:[#allocation55_spill] sm:$0xff]  ;;  %v8711_v40 = vld [vmem:[#allocation73_spill] sm:$0xff] }
 0x372   :  { %2542 = vst.msk [vmem:[#allocation2 + $0x80] sm:$0xff] %vm8470_vm2, %v2399_v56 }
 0x373   :  { %1733 = vmatmul.f32.gmra.mxu0 %v6099_v22  ;;  %2248 = vmatmul.f32.gmra.mxu2 %v8686_v14  ;;  %v8694_v22 = vand.u32 4294901760, %v6119_v45  ;;  %v1907_v56 = vadd.f32 %v6536_v16, %v1615_v19 }
 0x374   :  { %2043 = vmatmul.f32.gmra.mxu1 %v8687_v21  ;;  %2465 = vmatmul.f32.gmra.mxu3 %v8684_v23  ;;  %v1936_v51 = vpop.f32.mrf.mxu1 }
 0x376   :  { %v2185_v24 = vpop.f32.mrf.mxu2 }
 0x377   :  { %v2402_v58 = vpop.f32.mrf.mxu3  ;;  %v2186_v49 = vadd.f32 %v2185_v24, %v1883_v61 }
 0x378   :  { %v2403_v42 = vadd.f32 %v2402_v58, %v2182_v37  ;;  %v8701_v37 = vld [vmem:[#allocation67_spill] sm:$0xff] }
 0x379   :  { %v1620_v24 = vadd.f32 %v6548_v18, %v8701_v37  ;;  %v8704_v18 = vld [vmem:[#allocation58_spill] sm:$0xff] }
 0x37a   :  { %2543 = vst.msk [vmem:[#allocation2 + $0x88] sm:$0xff] %vm8470_vm2, %v2403_v42 }
 0x37b   :  { %1738 = vmatmul.f32.gmra.mxu0 %v6119_v45  ;;  %2252 = vmatmul.f32.gmra.mxu2 %v8690_v8  ;;  %v1634_v45 = vpop.f32.mrf.mxu0  ;;  %v1913_v60 = vadd.f32 %v6552_v46, %v1620_v24 }
 0x37c   :  { %2049 = vmatmul.f32.gmra.mxu1 %v8691_v36  ;;  %2469 = vmatmul.f32.gmra.mxu3 %v8686_v14  ;;  %v1942_v58 = vpop.f32.mrf.mxu1 }
 0x37e   :  { %v2189_v13 = vpop.f32.mrf.mxu2 }
 0x37f   :  { %v2406_v10 = vpop.f32.mrf.mxu3  ;;  %v2190_v47 = vadd.f32 %v2189_v13, %v1889_v26 }
 0x380   :  { %v2407_v55 = vadd.f32 %v2406_v10, %v2186_v49 }
 0x382   :  { %2544 = vst.msk [vmem:[#allocation2 + $0x90] sm:$0xff] %vm8470_vm2, %v2407_v55 }
 0x383   :  { %2256 = vmatmul.f32.gmra.mxu2 %v8693_v15  ;;  %v1639_v32 = vpop.f32.mrf.mxu0 }
 0x384   :  { %2055 = vmatmul.f32.gmra.mxu1 %v8694_v22  ;;  %2473 = vmatmul.f32.gmra.mxu3 %v8690_v8  ;;  %v1625_v8 = vadd.f32 %v6564_v3, %v8703_v43  ;;  %v1948_v49 = vpop.f32.mrf.mxu1  ;;  %v8706_v3 = vld [vmem:[#allocation62_spill] sm:$0xff] }
 0x386   :  { %v2193_v59 = vpop.f32.mrf.mxu2  ;;  %v1919_v36 = vadd.f32 %v6568_v44, %v1625_v8 }
 0x387   :  { %v2410_v2 = vpop.f32.mrf.mxu3  ;;  %v2194_v17 = vadd.f32 %v2193_v59, %v1895_v53 }
 0x388   :  { %v2411_v12 = vadd.f32 %v2410_v2, %v2190_v47 }
 0x38a   :  { %2545 = vst.msk [vmem:[#allocation2 + $0x98] sm:$0xff] %vm8470_vm2, %v2411_v12  ;;  %v8707_v12 = vld [vmem:[#allocation77_spill] sm:$0xff] }
 0x38b   :  { %2260 = vmatmul.f32.gmra.mxu2 %v8696_v50  ;;  %v1644_v21 = vpop.f32.mrf.mxu0  ;;  %v1635_v7 = vadd.f32 %v1634_v45, %v8707_v12 }
 0x38c   :  { %2477 = vmatmul.f32.gmra.mxu3 %v8693_v15  ;;  %v1925_v15 = vadd.f32 %v1924_v6, %v1630_v34  ;;  %v1954_v47 = vpop.f32.mrf.mxu1 }
 0x38d   :  { %v1931_v5 = vadd.f32 %v1930_v4, %v1635_v7 }
 0x38e   :  { %v2197_v35 = vpop.f32.mrf.mxu2 }
 0x38f   :  { %v2414_v29 = vpop.f32.mrf.mxu3  ;;  %v2198_v63 = vadd.f32 %v2197_v35, %v1901_v62 }
 0x390   :  { %v2415_v52 = vadd.f32 %v2414_v29, %v2194_v17 }
 0x392   :  { %2546 = vst.msk [vmem:[#allocation2 + $0xa0] sm:$0xff] %vm8470_vm2, %v2415_v52  ;;  %v8709_v52 = vld [vmem:[#allocation80_spill] sm:$0xff] }
 0x393   :  { %2264 = vmatmul.f32.gmra.mxu2 %v8698_v1  ;;  %v1649_v61 = vpop.f32.mrf.mxu0  ;;  %v1640_v11 = vadd.f32 %v1639_v32, %v8709_v52 }
 0x394   :  { %2481 = vmatmul.f32.gmra.mxu3 %v8696_v50  ;;  %v1960_v29 = vpop.f32.mrf.mxu1 }
 0x395   :  { %v1937_v45 = vadd.f32 %v1936_v51, %v1640_v11 }
 0x396   :  { %v2201_v23 = vpop.f32.mrf.mxu2 }
 0x397   :  { %v2418_v28 = vpop.f32.mrf.mxu3  ;;  %v2202_v31 = vadd.f32 %v2201_v23, %v1907_v56  ;;  %v8710_v23 = vld [vmem:[#allocation81_spill] sm:$0xff] }
 0x398   :  { %v2419_v30 = vadd.f32 %v2418_v28, %v2198_v63  ;;  %v1645_v28 = vadd.f32 %v1644_v21, %v8710_v23 }
 0x39a   :  { %2547 = vst.msk [vmem:[#allocation2 + $0xa8] sm:$0xff] %vm8470_vm2, %v2419_v30  ;;  %v1943_v32 = vadd.f32 %v1942_v58, %v1645_v28 }
 0x39b   :  { %2268 = vmatmul.f32.gmra.mxu2 %v8700_v27  ;;  %v1654_v26 = vpop.f32.mrf.mxu0 }
 0x39c   :  { %2485 = vmatmul.f32.gmra.mxu3 %v8698_v1  ;;  %v1966_v30 = vpop.f32.mrf.mxu1 }
 0x39e   :  { %v2205_v54 = vpop.f32.mrf.mxu2 }
 0x39f   :  { %v2422_v14 = vpop.f32.mrf.mxu3  ;;  %v2206_v16 = vadd.f32 %v2205_v54, %v1913_v60  ;;  %v8713_v60 = vld [vmem:[#allocation79_spill] sm:$0xff] }
 0x3a0   :  { %v2423_v57 = vadd.f32 %v2422_v14, %v2202_v31  ;;  %v1650_v31 = vadd.f32 %v1649_v61, %v6138_v20  ;;  %v8714_v61 = vld [vmem:[#allocation83_spill] sm:$0xff] }
 0x3a2   :  { %2548 = vst.msk [vmem:[#allocation2 + $0xb0] sm:$0xff] %vm8470_vm2, %v2423_v57  ;;  %v1949_v14 = vadd.f32 %v1948_v49, %v1650_v31 }
 0x3a3   :  { %2272 = vmatmul.f32.gmra.mxu2 %v8702_v39  ;;  %v1659_v6 = vpop.f32.mrf.mxu0 }
 0x3a4   :  { %2489 = vmatmul.f32.gmra.mxu3 %v8700_v27  ;;  %v1972_v57 = vpop.f32.mrf.mxu1 }
 0x3a6   :  { %v2209_v25 = vpop.f32.mrf.mxu2 }
 0x3a7   :  { %v2426_v41 = vpop.f32.mrf.mxu3  ;;  %v2210_v46 = vadd.f32 %v2209_v25, %v1919_v36 }
 0x3a8   :  { %v2427_v42 = vadd.f32 %v2426_v41, %v2206_v16 }
 0x3aa   :  { %2549 = vst.msk [vmem:[#allocation2 + $0xb8] sm:$0xff] %vm8470_vm2, %v2427_v42 }
 0x3ab   :  { %2276 = vmatmul.f32.gmra.mxu2 %v8704_v18  ;;  %v1664_v63 = vpop.f32.mrf.mxu0 }
 0x3ac   :  { %2493 = vmatmul.f32.gmra.mxu3 %v8702_v39  ;;  %v1978_v42 = vpop.f32.mrf.mxu1 }
 0x3ae   :  { %v2213_v13 = vpop.f32.mrf.mxu2 }
 0x3af   :  { %v2430_v10 = vpop.f32.mrf.mxu3  ;;  %v2214_v22 = vadd.f32 %v2213_v13, %v1925_v15 }
 0x3b0   :  { %v2431_v55 = vadd.f32 %v2430_v10, %v2210_v46 }
 0x3b2   :  { %2550 = vst.msk [vmem:[#allocation2 + $0xc0] sm:$0xff] %vm8470_vm2, %v2431_v55 }
 0x3b3   :  { %2280 = vmatmul.f32.gmra.mxu2 %v8706_v3  ;;  %v1669_v54 = vpop.f32.mrf.mxu0 }
 0x3b4   :  { %2497 = vmatmul.f32.gmra.mxu3 %v8704_v18  ;;  %v1660_v18 = vadd.f32 %v1659_v6, %v8714_v61  ;;  %v1984_v9 = vpop.f32.mrf.mxu1  ;;  %v8717_v6 = vld [vmem:[#allocation86_spill] sm:$0xff] }
 0x3b6   :  { %v2217_v44 = vpop.f32.mrf.mxu2  ;;  %v1961_v36 = vadd.f32 %v1960_v29, %v1660_v18 }
 0x3b7   :  { %v2434_v59 = vpop.f32.mrf.mxu3  ;;  %v2218_v50 = vadd.f32 %v2217_v44, %v1931_v5 }
 0x3b8   :  { %v2435_v2 = vadd.f32 %v2434_v59, %v2214_v22  ;;  %v8716_v59 = vld [vmem:[#allocation85_spill] sm:$0xff] }
 0x3ba   :  { %2551 = vst.msk [vmem:[#allocation2 + $0xc8] sm:$0xff] %vm8470_vm2, %v2435_v2  ;;  %v1670_v2 = vadd.f32 %v1669_v54, %v8716_v59 }
 0x3bb   :  { %2284 = vmatmul.f32.gmra.mxu2 %v8708_v38  ;;  %v1674_v16 = vpop.f32.mrf.mxu0 }
 0x3bc   :  { %2501 = vmatmul.f32.gmra.mxu3 %v8706_v3  ;;  %v1990_v12 = vpop.f32.mrf.mxu1  ;;  %v1973_v7 = vadd.f32 %v1972_v57, %v1670_v2 }
 0x3be   :  { %v2221_v53 = vpop.f32.mrf.mxu2 }
 0x3bf   :  { %v2438_v17 = vpop.f32.mrf.mxu3  ;;  %v2222_v48 = vadd.f32 %v2221_v53, %v1937_v45 }
 0x3c0   :  { %v2439_v35 = vadd.f32 %v2438_v17, %v2218_v50  ;;  %v1675_v17 = vadd.f32 %v1674_v16, %v8717_v6 }
 0x3c2   :  { %2552 = vst.msk [vmem:[#allocation2 + $0xd0] sm:$0xff] %vm8470_vm2, %v2439_v35  ;;  %v1979_v29 = vadd.f32 %v1978_v42, %v1675_v17 }
 0x3c3   :  { %2288 = vmatmul.f32.gmra.mxu2 %v6037_v0  ;;  %v1679_v13 = vpop.f32.mrf.mxu0 }
 0x3c4   :  { %2505 = vmatmul.f32.gmra.mxu3 %v8708_v38  ;;  %v1996_v52 = vpop.f32.mrf.mxu1 }
 0x3c6   :  { %v2225_v1 = vpop.f32.mrf.mxu2 }
 0x3c7   :  { %v2442_v4 = vpop.f32.mrf.mxu3  ;;  %v2226_v19 = vadd.f32 %v2225_v1, %v1943_v32 }
 0x3c8   :  { %v2443_v62 = vadd.f32 %v2442_v4, %v2222_v48  ;;  %v8718_v4 = vld [vmem:[#allocation87_spill] sm:$0xff] }
 0x3ca   :  { %2553 = vst.msk [vmem:[#allocation2 + $0xd8] sm:$0xff] %vm8470_vm2, %v2443_v62  ;;  %v1680_v62 = vadd.f32 %v1679_v13, %v8718_v4 }
 0x3cb   :  { %2292 = vmatmul.f32.gmra.mxu2 %v8711_v40 }
 0x3cc   :  { %2509 = vmatmul.f32.gmra.mxu3 %v6037_v0  ;;  %v8712_v0 = vld [vmem:[#allocation82_spill] sm:$0xff] }
 0x3cd   :  { %v1655_v39 = vadd.f32 %v1654_v26, %v8712_v0 }
 0x3ce   :  { %v2229_v27 = vpop.f32.mrf.mxu2 }
 0x3cf   :  { %v2446_v51 = vpop.f32.mrf.mxu3  ;;  %v2230_v21 = vadd.f32 %v2229_v27, %v1949_v14  ;;  %v1955_v20 = vadd.f32 %v1954_v47, %v1655_v39  ;;  %v1684_v47 = vpop.f32.mrf.mxu0  ;;  %v8719_v27 = vld [vmem:[#allocation88_spill] sm:$0xff] }
 0x3d0   :  { %v2447_v56 = vadd.f32 %v2446_v51, %v2226_v19  ;;  %v1685_v51 = vadd.f32 %v1684_v47, %v8719_v27 }
 0x3d2   :  { %2554 = vst.msk [vmem:[#allocation2 + $0xe0] sm:$0xff] %vm8470_vm2, %v2447_v56  ;;  %v1991_v56 = vadd.f32 %v1990_v12, %v1685_v51 }
 0x3d3   :  { %2296 = vmatmul.f32.gmra.mxu2 %v6083_v33 }
 0x3d4   :  { %2513 = vmatmul.f32.gmra.mxu3 %v8711_v40  ;;  %v2002_v40 = vpop.f32.mrf.mxu1 }
 0x3d6   :  { %v2233_v37 = vpop.f32.mrf.mxu2 }
 0x3d7   :  { %v2450_v24 = vpop.f32.mrf.mxu3  ;;  %v2234_v25 = vadd.f32 %v2233_v37, %v1955_v20  ;;  %v1689_v35 = vpop.f32.mrf.mxu0 }
 0x3d8   :  { %v2451_v58 = vadd.f32 %v2450_v24, %v2230_v21  ;;  %v8720_v24 = vld [vmem:[#allocation89_spill] sm:$0xff] }
 0x3da   :  { %2555 = vst.msk [vmem:[#allocation2 + $0xe8] sm:$0xff] %vm8470_vm2, %v2451_v58  ;;  %v1690_v58 = vadd.f32 %v1689_v35, %v8720_v24 }
 0x3db   :  { %2300 = vmatmul.f32.gmra.mxu2 %v8713_v60 }
 0x3dc   :  { %2517 = vmatmul.f32.gmra.mxu3 %v6083_v33  ;;  %v8715_v33 = vld [vmem:[#allocation84_spill] sm:$0xff]  ;;  %v2008_v37 = vpop.f32.mrf.mxu1  ;;  %v1997_v0 = vadd.f32 %v1996_v52, %v1690_v58 }
 0x3dd   :  { %v1665_v34 = vadd.f32 %v1664_v63, %v8715_v33  ;;  %v1985_v63 = vadd.f32 %v1984_v9, %v1680_v62 }
 0x3de   :  { %v2237_v41 = vpop.f32.mrf.mxu2 }
 0x3df   :  { %v2454_v43 = vpop.f32.mrf.mxu3  ;;  %v2238_v49 = vadd.f32 %v2237_v41, %v1961_v36  ;;  %v1967_v3 = vadd.f32 %v1966_v30, %v1665_v34  ;;  %v1694_v23 = vpop.f32.mrf.mxu0  ;;  %v8721_v41 = vld [vmem:[#allocation90_spill] sm:$0xff] }
 0x3e0   :  { %v2455_v8 = vadd.f32 %v2454_v43, %v2234_v25  ;;  %v1695_v42 = vadd.f32 %v1694_v23, %v8721_v41 }
 0x3e2   :  { %2556 = vst.msk [vmem:[#allocation2 + $0xf0] sm:$0xff] %vm8470_vm2, %v2455_v8  ;;  %v2003_v8 = vadd.f32 %v2002_v40, %v1695_v42 }
 0x3e4   :  { %2521 = vmatmul.f32.gmra.mxu3 %v8713_v60  ;;  %v2014_v43 = vpop.f32.mrf.mxu1 }
 0x3e6   :  { %v2241_v46 = vpop.f32.mrf.mxu2 }
 0x3e7   :  { %v2458_v10 = vpop.f32.mrf.mxu3  ;;  %v2242_v15 = vadd.f32 %v2241_v46, %v1967_v3  ;;  %v1699_v14 = vpop.f32.mrf.mxu0  ;;  %v8722_v46 = vld [vmem:[#allocation91_spill] sm:$0xff] }
 0x3e8   :  { %v2459_v55 = vadd.f32 %v2458_v10, %v2238_v49  ;;  %v1700_v13 = vadd.f32 %v1699_v14, %v8722_v46 }
 0x3ea   :  { %2557 = vst.msk [vmem:[#allocation2 + $0xf8] sm:$0xff] %vm8470_vm2, %v2459_v55  ;;  %v2009_v55 = vadd.f32 %v2008_v37, %v1700_v13 }
 0x3ec   :  { %v2020_v9 = vpop.f32.mrf.mxu1 }
 0x3ee   :  { %v2245_v26 = vpop.f32.mrf.mxu2 }
 0x3ef   :  { %v2462_v22 = vpop.f32.mrf.mxu3  ;;  %v2246_v38 = vadd.f32 %v2245_v26, %v1973_v7  ;;  %v1704_v25 = vpop.f32.mrf.mxu0  ;;  %v8723_v26 = vld [vmem:[#allocation92_spill] sm:$0xff] }
 0x3f0   :  { %v2463_v44 = vadd.f32 %v2462_v22, %v2242_v15  ;;  %v1705_v22 = vadd.f32 %v1704_v25, %v8723_v26 }
 0x3f2   :  { %2558 = vst.msk [vmem:[#allocation2 + $0x100] sm:$0xff] %vm8470_vm2, %v2463_v44  ;;  %v2015_v44 = vadd.f32 %v2014_v43, %v1705_v22 }
 0x3f4   :  { %v2026_v12 = vpop.f32.mrf.mxu1 }
 0x3f6   :  { %v2249_v5 = vpop.f32.mrf.mxu2 }
 0x3f7   :  { %v2466_v50 = vpop.f32.mrf.mxu3  ;;  %v2250_v11 = vadd.f32 %v2249_v5, %v1979_v29  ;;  %v1709_v10 = vpop.f32.mrf.mxu0  ;;  %v8724_v5 = vld [vmem:[#allocation93_spill] sm:$0xff] }
 0x3f8   :  { %v2467_v53 = vadd.f32 %v2466_v50, %v2246_v38  ;;  %v1710_v50 = vadd.f32 %v1709_v10, %v8724_v5  ;;  %v6689_v5 = vmov inf  }
 0x3fa   :  { %2559 = vst.msk [vmem:[#allocation2 + $0x108] sm:$0xff] %vm8470_vm2, %v2467_v53  ;;  %v2021_v53 = vadd.f32 %v2020_v9, %v1710_v50  ;;  %v6691_v50 = vmov inf  }
 0x3fe   :  { %v2253_v45 = vpop.f32.mrf.mxu2 }
 0x3ff   :  { %v2470_v48 = vpop.f32.mrf.mxu3  ;;  %v2254_v28 = vadd.f32 %v2253_v45, %v1985_v63  ;;  %v1714_v47 = vpop.f32.mrf.mxu0  ;;  %v8725_v45 = vld [vmem:[#allocation94_spill] sm:$0xff] }
 0x400   :  { %v2471_v1 = vadd.f32 %v2470_v48, %v2250_v11  ;;  %v2032_v11 = vpop.f32.mrf.mxu1  ;;  %v1715_v48 = vadd.f32 %v1714_v47, %v8725_v45  ;;  %v6677_v47 = vmov inf  }
 0x402   :  { %2560 = vst.msk [vmem:[#allocation2 + $0x110] sm:$0xff] %vm8470_vm2, %v2471_v1  ;;  %v2027_v1 = vadd.f32 %v2026_v12, %v1715_v48  ;;  %v6683_v12 = vmov inf  }
 0x406   :  { %v2257_v30 = vpop.f32.mrf.mxu2 }
 0x407   :  { %v2474_v32 = vpop.f32.mrf.mxu3  ;;  %v2258_v31 = vadd.f32 %v2257_v30, %v1991_v56  ;;  %v1719_v35 = vpop.f32.mrf.mxu0  ;;  %v8726_v30 = vld [vmem:[#allocation95_spill] sm:$0xff] }
 0x408   :  { %v2475_v19 = vadd.f32 %v2474_v32, %v2254_v28  ;;  %v1720_v40 = vadd.f32 %v1719_v35, %v8726_v30  ;;  %v2038_v32 = vpop.f32.mrf.mxu1 }
 0x40a   :  { %2561 = vst.msk [vmem:[#allocation2 + $0x118] sm:$0xff] %vm8470_vm2, %v2475_v19  ;;  %v2033_v19 = vadd.f32 %v2032_v11, %v1720_v40 }
 0x40e   :  { %v2261_v54 = vpop.f32.mrf.mxu2 }
 0x40f   :  { %v2478_v57 = vpop.f32.mrf.mxu3  ;;  %v2262_v39 = vadd.f32 %v2261_v54, %v1997_v0  ;;  %v1724_v28 = vpop.f32.mrf.mxu0  ;;  %v8727_v54 = vld [vmem:[#allocation96_spill] sm:$0xff] }
 0x410   :  { %v2479_v21 = vadd.f32 %v2478_v57, %v2258_v31  ;;  %v1725_v14 = vadd.f32 %v1724_v28, %v8727_v54  ;;  %v2044_v37 = vpop.f32.mrf.mxu1 }
 0x412   :  { %2562 = vst.msk [vmem:[#allocation2 + $0x120] sm:$0xff] %vm8470_vm2, %v2479_v21  ;;  %v2039_v21 = vadd.f32 %v2038_v32, %v1725_v14 }
 0x416   :  { %v2265_v60 = vpop.f32.mrf.mxu2 }
 0x417   :  { %v2482_v20 = vpop.f32.mrf.mxu3  ;;  %v2266_v61 = vadd.f32 %v2265_v60, %v2003_v8  ;;  %v1729_v57 = vpop.f32.mrf.mxu0  ;;  %v8728_v60 = vld [vmem:[#allocation97_spill] sm:$0xff] }
 0x418   :  { %v2483_v16 = vadd.f32 %v2482_v20, %v2262_v39  ;;  %v1730_v20 = vadd.f32 %v1729_v57, %v8728_v60  ;;  %v2050_v42 = vpop.f32.mrf.mxu1 }
 0x41a   :  { %2563 = vst.msk [vmem:[#allocation2 + $0x128] sm:$0xff] %vm8470_vm2, %v2483_v16  ;;  %v2045_v16 = vadd.f32 %v2044_v37, %v1730_v20 }
 0x41e   :  { %v2269_v18 = vpop.f32.mrf.mxu2 }
 0x41f   :  { %v2486_v36 = vpop.f32.mrf.mxu3  ;;  %v2270_v33 = vadd.f32 %v2269_v18, %v2009_v55  ;;  %v1734_v25 = vpop.f32.mrf.mxu0  ;;  %v8729_v18 = vld [vmem:[#allocation98_spill] sm:$0xff] }
 0x420   :  { %v2487_v49 = vadd.f32 %v2486_v36, %v2266_v61  ;;  %v1735_v36 = vadd.f32 %v1734_v25, %v8729_v18  ;;  %v2056_v9 = vpop.f32.mrf.mxu1 }
 0x422   :  { %2564 = vst.msk [vmem:[#allocation2 + $0x130] sm:$0xff] %vm8470_vm2, %v2487_v49  ;;  %v2051_v49 = vadd.f32 %v2050_v42, %v1735_v36 }
 0x426   :  { %v2273_v34 = vpop.f32.mrf.mxu2 }
 0x427   :  { %v2490_v3 = vpop.f32.mrf.mxu3  ;;  %v2274_v59 = vadd.f32 %v2273_v34, %v2015_v44  ;;  %v1739_v13 = vpop.f32.mrf.mxu0 }
 0x428   :  { %v2491_v15 = vadd.f32 %v2490_v3, %v2270_v33  ;;  %v8730_v33 = vld [vmem:[#allocation13_spill] sm:$0xff] }
 0x429   :  { %v1740_v34 = vadd.f32 %v1739_v13, %v8730_v33 }
 0x42a   :  { %2565 = vst.msk [vmem:[#allocation2 + $0x138] sm:$0xff] %vm8470_vm2, %v2491_v15 }
 0x42b   :  { %v2057_v15 = vadd.f32 %v2056_v9, %v1740_v34 }
 0x42e   :  { %v2277_v2 = vpop.f32.mrf.mxu2 }
 0x42f   :  { %v2494_v7 = vpop.f32.mrf.mxu3  ;;  %v2278_v6 = vadd.f32 %v2277_v2, %v2021_v53  ;;  %v6681_v2 = vmov inf  }
 0x430   :  { %v2495_v38 = vadd.f32 %v2494_v7, %v2274_v59  ;;  %v6679_v59 = vmov inf   ;;  %v6685_v7 = vmov inf  }
 0x432   :  { %2566 = vst.msk [vmem:[#allocation2 + $0x140] sm:$0xff] %vm8470_vm2, %v2495_v38  ;;  %v6687_v38 = vmov inf  }
 0x436   :  { %v2281_v17 = vpop.f32.mrf.mxu2 }
 0x437   :  { %v2498_v29 = vpop.f32.mrf.mxu3  ;;  %v2282_v4 = vadd.f32 %v2281_v17, %v2027_v1 }
 0x438   :  { %v2499_v52 = vadd.f32 %v2498_v29, %v2278_v6 }
 0x43a   :  { %2567 = vst.msk [vmem:[#allocation2 + $0x148] sm:$0xff] %vm8470_vm2, %v2499_v52 }
 0x43e   :  { %v2285_v62 = vpop.f32.mrf.mxu2 }
 0x43f   :  { %v2502_v63 = vpop.f32.mrf.mxu3  ;;  %v2286_v27 = vadd.f32 %v2285_v62, %v2033_v19 }
 0x440   :  { %v2503_v23 = vadd.f32 %v2502_v63, %v2282_v4 }
 0x442   :  { %2568 = vst.msk [vmem:[#allocation2 + $0x150] sm:$0xff] %vm8470_vm2, %v2503_v23 }
 0x446   :  { %v2289_v51 = vpop.f32.mrf.mxu2 }
 0x447   :  { %v2506_v56 = vpop.f32.mrf.mxu3  ;;  %v2290_v24 = vadd.f32 %v2289_v51, %v2039_v21 }
 0x448   :  { %v2507_v31 = vadd.f32 %v2506_v56, %v2286_v27 }
 0x44a   :  { %2569 = vst.msk [vmem:[#allocation2 + $0x158] sm:$0xff] %vm8470_vm2, %v2507_v31 }
 0x44e   :  { %v2293_v58 = vpop.f32.mrf.mxu2 }
 0x44f   :  { %v2510_v0 = vpop.f32.mrf.mxu3  ;;  %v2294_v41 = vadd.f32 %v2293_v58, %v2045_v16 }
 0x450   :  { %v2511_v39 = vadd.f32 %v2510_v0, %v2290_v24 }
 0x452   :  { %2570 = vst.msk [vmem:[#allocation2 + $0x160] sm:$0xff] %vm8470_vm2, %v2511_v39 }
 0x456   :  { %v2297_v61 = vpop.f32.mrf.mxu2 }
 0x457   :  { %v2514_v43 = vpop.f32.mrf.mxu3  ;;  %v2298_v46 = vadd.f32 %v2297_v61, %v2051_v49 }
 0x458   :  { %v2515_v8 = vadd.f32 %v2514_v43, %v2294_v41 }
 0x45a   :  { %2571 = vst.msk [vmem:[#allocation2 + $0x168] sm:$0xff] %vm8470_vm2, %v2515_v8 }
 0x45e   :  { %v2301_v3 = vpop.f32.mrf.mxu2 }
 0x45f   :  { %v2518_v10 = vpop.f32.mrf.mxu3  ;;  %v2302_v26 = vadd.f32 %v2301_v3, %v2057_v15 }
 0x460   :  { %v2519_v55 = vadd.f32 %v2518_v10, %v2298_v46 }
 0x462   :  { %2572 = vst.msk [vmem:[#allocation2 + $0x170] sm:$0xff] %vm8470_vm2, %v2519_v55 }
 0x467   :  { %v2522_v22 = vpop.f32.mrf.mxu3 }
 0x468   :  { %v2523_v44 = vadd.f32 %v2522_v22, %v2302_v26 }
 0x46a   :  { %2573 = vst.msk [vmem:[#allocation2 + $0x178] sm:$0xff] %vm8470_vm2, %v2523_v44 }
 0x46b LB: > { %s6723_s7 = sshll.u32 %s4842_s2, 10  ;;  %s2579_s2 = sadd.s32 1, %s4842_s2   ;;  %s4842_s2 = sphi %s6693_s2, %s2579_s2   ;;  %v4838_v50 = vphi %v6691_v50, %v8746_v50   ;;  %v4834_v5 = vphi %v6689_v5, %v8745_v5   ;;  %v4830_v38 = vphi %v6687_v38, %v8744_v38   ;;  %v4826_v7 = vphi %v6685_v7, %v8743_v7   ;;  %v4822_v12 = vphi %v6683_v12, %v8742_v12   ;;  %v4818_v2 = vphi %v6681_v2, %v8741_v2   ;;  %v4814_v59 = vphi %v6679_v59, %v8740_v59   ;;  %v4810_v47 = vphi %v6677_v47, %v8739_v47  }
 0x46c   : > { %s2590_s1 = sld [smem:[#allocation3 + %s6723_s7]]  ;;  %s2591_s8 = sadd.s32 1, %s6723_s7 }
 0x46d   : > { %s2592_s9 = sld [smem:[#allocation3 + %s2591_s8]]  ;;  %s6728_s10 = sadd.s32 128, %s6723_s7 }
 0x46e   : > { %s2593_s11 = sld [smem:[#allocation5 + %s6723_s7]]  ;;  %s2652_s12 = sadd.s32 1, %s6728_s10 }
 0x46f   : > { %s2594_s13 = sld [smem:[#allocation5 + %s2591_s8]]  ;;  %s6738_s16 = sadd.s32 256, %s6723_s7 }
 0x470   : > { %s6733_s14 = sld [smem:[#allocation3 + %s6728_s10]]  ;;  %s2713_s22 = sadd.s32 1, %s6738_s16 }
 0x471   : > { %s6735_s15 = sld [smem:[#allocation3 + %s2652_s12]]  ;;  %s6758_s27 = sadd.s32 384, %s6723_s7 }
 0x472   : > { %s4204_s17 = sshll.u32 %s2590_s1, 6  ;;  %s6741_s18 = sld [smem:[#allocation5 + %s6728_s10]] }
 0x473   : > { %s4205_s19 = sshll.u32 %s2592_s9, 6  ;;  %s2596_s20 = scalar_lea.vmem [#allocation2], %s4204_s17 }
 0x474   : > { %v2597_v53 = vld [vmem:[%s2596_s20] sm:$0xff]  ;;  %v2598_v6 = vld [vmem:[%s2596_s20 + $0x8] sm:$0xff]  ;;  %v2599_v17 = vld [vmem:[%s2596_s20 + $0x10] sm:$0xff]  ;;  %v2615_v35 = vstv %s2593_s11  ;;  %s6744_s21 = sld [smem:[#allocation3 + %s6738_s16]]  ;;  %s2606_s23 = scalar_lea.vmem [#allocation2], %s4205_s19 }
 0x475   : > { %v2600_v29 = vld [vmem:[%s2596_s20 + $0x18] sm:$0xff]  ;;  %v2601_v52 = vld [vmem:[%s2596_s20 + $0x20] sm:$0xff]  ;;  %v2602_v11 = vld [vmem:[%s2596_s20 + $0x28] sm:$0xff]  ;;  %v2616_v45 = vmul.f32 %v2615_v35, %v2597_v53  ;;  %v2624_v48 = vstv %s2594_s13  ;;  %v2617_v63 = vmul.f32 %v2615_v35, %v2598_v6  ;;  %v2618_v23 = vmul.f32 %v2615_v35, %v2599_v17  ;;  %s6747_s24 = sld [smem:[#allocation5 + %s2652_s12]]  ;;  %s2774_s29 = sadd.s32 1, %s6758_s27 }
 0x476   : > { %v2603_v1 = vld [vmem:[%s2596_s20 + $0x30] sm:$0xff]  ;;  %v2604_v4 = vld [vmem:[%s2596_s20 + $0x38] sm:$0xff]  ;;  %v2607_v62 = vld [vmem:[%s2606_s23] sm:$0xff]  ;;  %v2619_v28 = vmul.f32 %v2615_v35, %v2600_v29  ;;  %s4207_s25 = sshll.u32 %s6733_s14, 6  ;;  %v2620_v19 = vmul.f32 %v2615_v35, %v2601_v52  ;;  %v2621_v27 = vmul.f32 %v2615_v35, %v2602_v11  ;;  %s6753_s26 = sld [smem:[#allocation3 + %s2713_s22]] }
 0x477   : > { %v2608_v30 = vld [vmem:[%s2606_s23 + $0x8] sm:$0xff]  ;;  %v2609_v40 = vld [vmem:[%s2606_s23 + $0x10] sm:$0xff]  ;;  %v2610_v32 = vld [vmem:[%s2606_s23 + $0x18] sm:$0xff]  ;;  %v2622_v51 = vmul.f32 %v2615_v35, %v2603_v1  ;;  %v2625_v56 = vmul.f32 %v2624_v48, %v2607_v62  ;;  %s4208_s0 = sshll.u32 %s6735_s15, 6  ;;  %v2623_v57 = vmul.f32 %v2615_v35, %v2604_v4  ;;  %s2657_s28 = scalar_lea.vmem [#allocation2], %s4207_s25 }
 0x478   : > { %v2611_v31 = vld [vmem:[%s2606_s23 + $0x20] sm:$0xff]  ;;  %v2612_v54 = vld [vmem:[%s2606_s23 + $0x28] sm:$0xff]  ;;  %v2613_v14 = vld [vmem:[%s2606_s23 + $0x30] sm:$0xff]  ;;  %v2626_v21 = vmul.f32 %v2624_v48, %v2608_v30  ;;  %v2627_v37 = vmul.f32 %v2624_v48, %v2609_v40  ;;  %v2628_v24 = vmul.f32 %v2624_v48, %v2610_v32  ;;  %v2676_v13 = vstv %s6741_s18  ;;  %s6778_s3 = sld [smem:[#allocation5 + %s6738_s16]]  ;;  %s2667_s30 = scalar_lea.vmem [#allocation2], %s4208_s0 }
 0x479   : > { %v2614_v58 = vld [vmem:[%s2606_s23 + $0x38] sm:$0xff]  ;;  %v2629_v0 = vmul.f32 %v2624_v48, %v2611_v31  ;;  %v2630_v39 = vmul.f32 %v2624_v48, %v2612_v54  ;;  %v2631_v60 = vmul.f32 %v2624_v48, %v2613_v14  ;;  %v6755_v20 = vadd.f32 %v2625_v56, %v2616_v45  ;;  %v2658_v43 = vld [vmem:[%s2657_s28] sm:$0xff]  ;;  %v2659_v36 = vld [vmem:[%s2657_s28 + $0x8] sm:$0xff]  ;;  %s6793_s4 = sld [smem:[#allocation5 + %s2713_s22]]  ;;  %s6812_s10 = sadd.s32 512, %s6723_s7 }
 0x47a   : > { %v2632_v16 = vmul.f32 %v2624_v48, %v2614_v58  ;;  %v6760_v25 = vadd.f32 %v2626_v21, %v2617_v63  ;;  %v6762_v41 = vadd.f32 %v2627_v37, %v2618_v23  ;;  %v6764_v42 = vadd.f32 %v2628_v24, %v2619_v28  ;;  %v2660_v49 = vld [vmem:[%s2657_s28 + $0x10] sm:$0xff]  ;;  %v2661_v46 = vld [vmem:[%s2657_s28 + $0x18] sm:$0xff]  ;;  %v2662_v9 = vld [vmem:[%s2657_s28 + $0x20] sm:$0xff]  ;;  %s4210_s6 = sshll.u32 %s6744_s21, 6  ;;  %s6803_s1 = sld [smem:[#allocation3 + %s6758_s27]] }
 0x47b   : > { %v6766_v8 = vadd.f32 %v2629_v0, %v2620_v19  ;;  %v6768_v61 = vadd.f32 %v2630_v39, %v2621_v27  ;;  %v6770_v18 = vadd.f32 %v2631_v60, %v2622_v51  ;;  %v2641_v55 = vmin.f32 %v4838_v50, %v6755_v20  ;;  %v2663_v33 = vld [vmem:[%s2657_s28 + $0x28] sm:$0xff]  ;;  %v2664_v34 = vld [vmem:[%s2657_s28 + $0x30] sm:$0xff]  ;;  %v2665_v44 = vld [vmem:[%s2657_s28 + $0x38] sm:$0xff]  ;;  %s6807_s8 = sld [smem:[#allocation3 + %s2774_s29]]  ;;  %s2718_s11 = scalar_lea.vmem [#allocation2], %s4210_s6 }
 0x47c   : > { %v6773_v10 = vadd.f32 %v2632_v16, %v2623_v57  ;;  %v2642_v3 = vmin.f32 %v4834_v5, %v6760_v25  ;;  %v2643_v15 = vmin.f32 %v4830_v38, %v6762_v41  ;;  %v2644_v26 = vmin.f32 %v4826_v7, %v6764_v42  ;;  %v2668_v50 = vld [vmem:[%s2667_s30] sm:$0xff]  ;;  %v2669_v53 = vld [vmem:[%s2667_s30 + $0x8] sm:$0xff]  ;;  %v2671_v6 = vld [vmem:[%s2667_s30 + $0x18] sm:$0xff]  ;;  %s4211_s9 = sshll.u32 %s6753_s26, 6  ;;  %s6817_s12 = sld [smem:[#allocation5 + %s6758_s27]] }
 0x47d   : > { %v2645_v22 = vmin.f32 %v4822_v12, %v6766_v8  ;;  %v2646_v38 = vmin.f32 %v4818_v2, %v6768_v61  ;;  %v2647_v5 = vmin.f32 %v4814_v59, %v6770_v18  ;;  %v2670_v12 = vld [vmem:[%s2667_s30 + $0x10] sm:$0xff]  ;;  %v2672_v17 = vld [vmem:[%s2667_s30 + $0x20] sm:$0xff]  ;;  %v2677_v35 = vmul.f32 %v2676_v13, %v2658_v43  ;;  %v2673_v29 = vld [vmem:[%s2667_s30 + $0x28] sm:$0xff]  ;;  %s6825_s13 = sld [smem:[#allocation5 + %s2774_s29]]  ;;  %s2835_s14 = sadd.s32 1, %s6812_s10 }
 0x47e   : > { %v2648_v7 = vmin.f32 %v4810_v47, %v6773_v10  ;;  %v2674_v52 = vld [vmem:[%s2667_s30 + $0x30] sm:$0xff]  ;;  %v2675_v11 = vld [vmem:[%s2667_s30 + $0x38] sm:$0xff]  ;;  %v2678_v45 = vmul.f32 %v2676_v13, %v2659_v36  ;;  %v2679_v48 = vmul.f32 %v2676_v13, %v2660_v49  ;;  %v2680_v2 = vmul.f32 %v2676_v13, %v2661_v46  ;;  %v2719_v14 = vld [vmem:[%s2718_s11] sm:$0xff]  ;;  %s2728_s15 = scalar_lea.vmem [#allocation2], %s4211_s9  ;;  %s6840_s17 = sld [smem:[#allocation3 + %s6812_s10]] }
 0x47f   : > { %v2681_v1 = vmul.f32 %v2676_v13, %v2662_v9  ;;  %v2682_v47 = vmul.f32 %v2676_v13, %v2663_v33  ;;  %v2683_v59 = vmul.f32 %v2676_v13, %v2664_v34  ;;  %v2684_v4 = vmul.f32 %v2676_v13, %v2665_v44  ;;  %v2720_v57 = vld [vmem:[%s2718_s11 + $0x8] sm:$0xff]  ;;  %v2721_v0 = vld [vmem:[%s2718_s11 + $0x10] sm:$0xff]  ;;  %v2722_v39 = vld [vmem:[%s2718_s11 + $0x18] sm:$0xff]  ;;  %s6849_s18 = sld [smem:[#allocation5 + %s6812_s10]]  ;;  %s6861_s22 = sadd.s32 640, %s6723_s7 }
 0x480   : > { %v2685_v62 = vstv %s6747_s24  ;;  %v2723_v60 = vld [vmem:[%s2718_s11 + $0x20] sm:$0xff]  ;;  %v2724_v25 = vld [vmem:[%s2718_s11 + $0x28] sm:$0xff]  ;;  %v2725_v41 = vld [vmem:[%s2718_s11 + $0x30] sm:$0xff]  ;;  %s4213_s16 = sshll.u32 %s6803_s1, 6  ;;  %s6854_s20 = sld [smem:[#allocation5 + %s2835_s14]] }
 0x481   : > { %v2686_v63 = vmul.f32 %v2685_v62, %v2668_v50  ;;  %v2687_v23 = vmul.f32 %v2685_v62, %v2669_v53  ;;  %v2688_v28 = vmul.f32 %v2685_v62, %v2670_v12  ;;  %v2689_v30 = vmul.f32 %v2685_v62, %v2671_v6  ;;  %v2726_v42 = vld [vmem:[%s2718_s11 + $0x38] sm:$0xff]  ;;  %v2729_v36 = vld [vmem:[%s2728_s15] sm:$0xff]  ;;  %v2730_v49 = vld [vmem:[%s2728_s15 + $0x8] sm:$0xff]  ;;  %s4214_s19 = sshll.u32 %s6807_s8, 6  ;;  %s6858_s21 = sld [smem:[#allocation3 + %s2835_s14]] }
 0x482   : > { %v2690_v40 = vmul.f32 %v2685_v62, %v2672_v17  ;;  %v2691_v32 = vmul.f32 %v2685_v62, %v2673_v29  ;;  %v2692_v19 = vmul.f32 %v2685_v62, %v2674_v52  ;;  %v2693_v27 = vmul.f32 %v2685_v62, %v2675_v11  ;;  %v2731_v46 = vld [vmem:[%s2728_s15 + $0x10] sm:$0xff]  ;;  %v2733_v9 = vld [vmem:[%s2728_s15 + $0x20] sm:$0xff]  ;;  %s2779_s23 = scalar_lea.vmem [#allocation2], %s4213_s16  ;;  %s2896_s24 = sadd.s32 1, %s6861_s22 }
 0x483   : > { %v2694_v51 = vadd.f32 %v2686_v63, %v2677_v35  ;;  %v2695_v56 = vadd.f32 %v2687_v23, %v2678_v45  ;;  %v2696_v31 = vadd.f32 %v2688_v28, %v2679_v48  ;;  %v2697_v54 = vadd.f32 %v2689_v30, %v2680_v2  ;;  %v2781_v62 = vld [vmem:[%s2779_s23 + $0x8] sm:$0xff]  ;;  %v2782_v63 = vld [vmem:[%s2779_s23 + $0x10] sm:$0xff]  ;;  %v2783_v23 = vld [vmem:[%s2779_s23 + $0x18] sm:$0xff]  ;;  %s2789_s25 = scalar_lea.vmem [#allocation2], %s4214_s19  ;;  %s6902_s26 = sld [smem:[#allocation3 + %s6861_s22]] }
 0x484   : > { %v2698_v21 = vadd.f32 %v2690_v40, %v2681_v1  ;;  %v2699_v37 = vadd.f32 %v2691_v32, %v2682_v47  ;;  %v2700_v24 = vadd.f32 %v2692_v19, %v2683_v59  ;;  %v2701_v58 = vadd.f32 %v2693_v27, %v2684_v4  ;;  %v2780_v4 = vld [vmem:[%s2779_s23] sm:$0xff]  ;;  %v2785_v27 = vld [vmem:[%s2779_s23 + $0x28] sm:$0xff]  ;;  %s4216_s0 = sshll.u32 %s6840_s17, 6  ;;  %s6914_s27 = sld [smem:[#allocation3 + %s2896_s24]] }
 0x485   : > { %v6819_v20 = vmin.f32 %v2641_v55, %v2694_v51  ;;  %v6821_v16 = vmin.f32 %v2642_v3, %v2695_v56  ;;  %v6828_v43 = vmin.f32 %v2643_v15, %v2696_v31  ;;  %v6830_v8 = vmin.f32 %v2644_v26, %v2697_v54  ;;  %v2732_v55 = vld [vmem:[%s2728_s15 + $0x18] sm:$0xff]  ;;  %v2734_v3 = vld [vmem:[%s2728_s15 + $0x28] sm:$0xff]  ;;  %v2735_v15 = vld [vmem:[%s2728_s15 + $0x30] sm:$0xff]  ;;  %s2840_s29 = scalar_lea.vmem [#allocation2], %s4216_s0  ;;  %s6923_s30 = sld [smem:[#allocation5 + %s6861_s22]] }
 0x486   : > { %v6832_v61 = vmin.f32 %v2645_v22, %v2698_v21  ;;  %v6834_v18 = vmin.f32 %v2646_v38, %v2699_v37  ;;  %v6842_v13 = vmin.f32 %v2647_v5, %v2700_v24  ;;  %v6844_v10 = vmin.f32 %v2648_v7, %v2701_v58  ;;  %v2736_v26 = vld [vmem:[%s2728_s15 + $0x38] sm:$0xff]  ;;  %v2784_v19 = vld [vmem:[%s2779_s23 + $0x20] sm:$0xff]  ;;  %v2786_v51 = vld [vmem:[%s2779_s23 + $0x30] sm:$0xff]  ;;  %s7003_s15 = sadd.s32 896, %s6723_s7  ;;  %p2576_p0 = scmp.ge.s32.totalorder %s2579_s2, 2  }
 0x487   : > { %v2737_v33 = vstv %s6778_s3  ;;  %v2746_v34 = vstv %s6793_s4  ;;  %v2790_v21 = vld [vmem:[%s2789_s25] sm:$0xff]  ;;  %v2791_v37 = vld [vmem:[%s2789_s25 + $0x8] sm:$0xff]  ;;  %s4217_s28 = sshll.u32 %s6858_s21, 6  ;;  %s6918_s3 = sadd.s32 768, %s6723_s7 }
 0x488   : > { %v2738_v22 = vmul.f32 %v2737_v33, %v2719_v14  ;;  %v2739_v44 = vmul.f32 %v2737_v33, %v2720_v57  ;;  %v2740_v50 = vmul.f32 %v2737_v33, %v2721_v0  ;;  %v2741_v53 = vmul.f32 %v2737_v33, %v2722_v39  ;;  %v2787_v57 = vld [vmem:[%s2779_s23 + $0x38] sm:$0xff]  ;;  %s6927_s4 = sld [smem:[#allocation5 + %s2896_s24]]  ;;  %s2957_s6 = sadd.s32 1, %s6918_s3 }
 0x489   : > { %v2742_v38 = vmul.f32 %v2737_v33, %v2723_v60  ;;  %v2743_v5 = vmul.f32 %v2737_v33, %v2724_v25  ;;  %v2744_v7 = vmul.f32 %v2737_v33, %v2725_v41  ;;  %v2745_v12 = vmul.f32 %v2737_v33, %v2726_v42  ;;  %v2792_v60 = vld [vmem:[%s2789_s25 + $0x10] sm:$0xff]  ;;  %s2850_s1 = scalar_lea.vmem [#allocation2], %s4217_s28  ;;  %s4219_s8 = sshll.u32 %s6902_s26, 6 }
 0x48a   : > { %v2747_v6 = vmul.f32 %v2746_v34, %v2729_v36  ;;  %v2748_v17 = vmul.f32 %v2746_v34, %v2730_v49  ;;  %v2749_v35 = vmul.f32 %v2746_v34, %v2731_v46  ;;  %v2750_v29 = vmul.f32 %v2746_v34, %v2732_v55  ;;  %v2796_v36 = vld [vmem:[%s2789_s25 + $0x30] sm:$0xff]  ;;  %v2797_v49 = vld [vmem:[%s2789_s25 + $0x38] sm:$0xff]  ;;  %s6942_s9 = sld [smem:[#allocation3 + %s6918_s3]]  ;;  %s4220_s11 = sshll.u32 %s6914_s27, 6 }
 0x48b   : > { %v2751_v52 = vmul.f32 %v2746_v34, %v2733_v9  ;;  %v2752_v11 = vmul.f32 %v2746_v34, %v2734_v3  ;;  %v2753_v45 = vmul.f32 %v2746_v34, %v2735_v15  ;;  %v2754_v48 = vmul.f32 %v2746_v34, %v2736_v26  ;;  %s6965_s10 = sld [smem:[#allocation5 + %s6918_s3]]  ;;  %s2901_s14 = scalar_lea.vmem [#allocation2], %s4219_s8 }
 0x48c   : > { %v6863_v2 = vadd.f32 %v2747_v6, %v2738_v22  ;;  %v6865_v1 = vadd.f32 %v2748_v17, %v2739_v44  ;;  %v6867_v47 = vadd.f32 %v2749_v35, %v2740_v50  ;;  %v6869_v59 = vadd.f32 %v2750_v29, %v2741_v53  ;;  %v2841_v6 = vld [vmem:[%s2840_s29] sm:$0xff]  ;;  %s2911_s7 = scalar_lea.vmem [#allocation2], %s4220_s11  ;;  %s7033_s17 = sld [smem:[#allocation3 + %s7003_s15]] }
 0x48d   : > { %v6873_v28 = vadd.f32 %v2751_v52, %v2742_v38  ;;  %v6875_v30 = vadd.f32 %v2752_v11, %v2743_v5  ;;  %v6877_v40 = vadd.f32 %v2753_v45, %v2744_v7  ;;  %v6879_v32 = vadd.f32 %v2754_v48, %v2745_v12  ;;  %v2842_v11 = vld [vmem:[%s2840_s29 + $0x8] sm:$0xff]  ;;  %v2843_v45 = vld [vmem:[%s2840_s29 + $0x10] sm:$0xff]  ;;  %v2844_v48 = vld [vmem:[%s2840_s29 + $0x18] sm:$0xff]  ;;  %s7071_s24 = sld [smem:[#allocation5 + %s7003_s15]]  ;;  %s7183_s2 = smov (%p2576_p0), 0  }
 0x48e   : > { %v2763_v56 = vmin.f32 %v6819_v20, %v6863_v2  ;;  %v2764_v31 = vmin.f32 %v6821_v16, %v6865_v1  ;;  %v2765_v54 = vmin.f32 %v6828_v43, %v6867_v47  ;;  %v2766_v14 = vmin.f32 %v6830_v8, %v6869_v59  ;;  %v2793_v20 = vld [vmem:[%s2789_s25 + $0x18] sm:$0xff]  ;;  %v2794_v16 = vld [vmem:[%s2789_s25 + $0x20] sm:$0xff]  ;;  %v2795_v8 = vld [vmem:[%s2789_s25 + $0x28] sm:$0xff] }
 0x48f   : > { %v2767_v24 = vmin.f32 %v6832_v61, %v6873_v28  ;;  %v2768_v58 = vmin.f32 %v6834_v18, %v6875_v30  ;;  %v2769_v0 = vmin.f32 %v6842_v13, %v6877_v40  ;;  %v2770_v39 = vmin.f32 %v6844_v10, %v6879_v32  ;;  %v2853_v61 = vld [vmem:[%s2850_s1 + $0x10] sm:$0xff]  ;;  %v2854_v28 = vld [vmem:[%s2850_s1 + $0x18] sm:$0xff]  ;;  %v2856_v18 = vld [vmem:[%s2850_s1 + $0x28] sm:$0xff] }
 0x490   : > { %v2798_v25 = vstv %s6817_s12  ;;  %v2807_v41 = vstv %s6825_s13  ;;  %v6907_v42 = vstv %s6849_s18  ;;  %v6910_v43 = vstv %s6854_s20  ;;  %s6974_s12 = sld [smem:[#allocation5 + %s2957_s6]]  ;;  %s4222_s16 = sshll.u32 %s6942_s9, 6 }
 0x491   : > { %v2799_v46 = vmul.f32 %v2798_v25, %v2780_v4  ;;  %v2800_v55 = vmul.f32 %v2798_v25, %v2781_v62  ;;  %v2801_v9 = vmul.f32 %v2798_v25, %v2782_v63  ;;  %v2802_v33 = vmul.f32 %v2798_v25, %v2783_v23  ;;  %v2845_v4 = vld [vmem:[%s2840_s29 + $0x20] sm:$0xff]  ;;  %v2846_v62 = vld [vmem:[%s2840_s29 + $0x28] sm:$0xff]  ;;  %v2847_v63 = vld [vmem:[%s2840_s29 + $0x30] sm:$0xff]  ;;  %s6982_s13 = sld [smem:[#allocation3 + %s2957_s6]]  ;;  %s3018_s18 = sadd.s32 1, %s7003_s15 }
 0x492   : > { %v2803_v34 = vmul.f32 %v2798_v25, %v2784_v19  ;;  %v2804_v3 = vmul.f32 %v2798_v25, %v2785_v27  ;;  %v2805_v15 = vmul.f32 %v2798_v25, %v2786_v51  ;;  %v2806_v26 = vmul.f32 %v2798_v25, %v2787_v57  ;;  %v2848_v57 = vld [vmem:[%s2840_s29 + $0x38] sm:$0xff]  ;;  %v2857_v30 = vld [vmem:[%s2850_s1 + $0x30] sm:$0xff]  ;;  %s7047_s20 = sld [smem:[#allocation3 + %s3018_s18]]  ;;  %s2962_s21 = scalar_lea.vmem [#allocation2], %s4222_s16 }
 0x493   : > { %v2808_v22 = vmul.f32 %v2807_v41, %v2790_v21  ;;  %v2809_v44 = vmul.f32 %v2807_v41, %v2791_v37  ;;  %v2810_v50 = vmul.f32 %v2807_v41, %v2792_v60  ;;  %v2811_v53 = vmul.f32 %v2807_v41, %v2793_v20  ;;  %v2851_v21 = vld [vmem:[%s2850_s1] sm:$0xff]  ;;  %v2852_v37 = vld [vmem:[%s2850_s1 + $0x8] sm:$0xff]  ;;  %s4225_s23 = sshll.u32 %s7033_s17, 6  ;;  %s7079_s25 = sld [smem:[#allocation5 + %s3018_s18]] }
 0x494   : > { %v2812_v38 = vmul.f32 %v2807_v41, %v2794_v16  ;;  %v2813_v5 = vmul.f32 %v2807_v41, %v2795_v8  ;;  %v2814_v7 = vmul.f32 %v2807_v41, %v2796_v36  ;;  %v2815_v12 = vmul.f32 %v2807_v41, %v2797_v49  ;;  %s3023_s26 = scalar_lea.vmem [#allocation2], %s4225_s23 }
 0x495   : > { %v2816_v17 = vadd.f32 %v2808_v22, %v2799_v46  ;;  %v2817_v35 = vadd.f32 %v2809_v44, %v2800_v55  ;;  %v2818_v29 = vadd.f32 %v2810_v50, %v2801_v9  ;;  %v2819_v52 = vadd.f32 %v2811_v53, %v2802_v33  ;;  %v2905_v22 = vld [vmem:[%s2901_s14 + $0x18] sm:$0xff] }
 0x496   : > { %v2820_v2 = vadd.f32 %v2812_v38, %v2803_v34  ;;  %v2821_v1 = vadd.f32 %v2813_v5, %v2804_v3  ;;  %v2822_v47 = vadd.f32 %v2814_v7, %v2805_v15  ;;  %v2823_v59 = vadd.f32 %v2815_v12, %v2806_v26  ;;  %v2902_v3 = vld [vmem:[%s2901_s14] sm:$0xff]  ;;  %v2903_v15 = vld [vmem:[%s2901_s14 + $0x8] sm:$0xff]  ;;  %v2904_v26 = vld [vmem:[%s2901_s14 + $0x10] sm:$0xff] }
 0x497   : > { %v6930_v23 = vmin.f32 %v2763_v56, %v2816_v17  ;;  %v6932_v19 = vmin.f32 %v2764_v31, %v2817_v35  ;;  %v6934_v27 = vmin.f32 %v2765_v54, %v2818_v29  ;;  %v6936_v51 = vmin.f32 %v2766_v14, %v2819_v52  ;;  %v2906_v38 = vld [vmem:[%s2901_s14 + $0x20] sm:$0xff]  ;;  %v2907_v5 = vld [vmem:[%s2901_s14 + $0x28] sm:$0xff]  ;;  %v2908_v7 = vld [vmem:[%s2901_s14 + $0x30] sm:$0xff]  ;;  %s4223_s19 = sshll.u32 %s6982_s13, 6 }
 0x498   : > { %v6947_v56 = vmin.f32 %v2767_v24, %v2820_v2  ;;  %v6952_v31 = vmin.f32 %v2768_v58, %v2821_v1  ;;  %v6957_v54 = vmin.f32 %v2769_v0, %v2822_v47  ;;  %v6962_v14 = vmin.f32 %v2770_v39, %v2823_v59  ;;  %v2855_v24 = vld [vmem:[%s2850_s1 + $0x20] sm:$0xff]  ;;  %v2858_v58 = vld [vmem:[%s2850_s1 + $0x38] sm:$0xff]  ;;  %v2914_v47 = vld [vmem:[%s2911_s7 + $0x10] sm:$0xff]  ;;  %s2972_s22 = scalar_lea.vmem [#allocation2], %s4223_s19  ;;  %s4226_s0 = sshll.u32 %s7047_s20, 6 }
 0x499   : > { %v2860_v60 = vmul.f32 %v6907_v42, %v2841_v6  ;;  %v2861_v13 = vmul.f32 %v6907_v42, %v2842_v11  ;;  %v2862_v40 = vmul.f32 %v6907_v42, %v2843_v45  ;;  %v2863_v0 = vmul.f32 %v6907_v42, %v2844_v48  ;;  %v2909_v29 = vld [vmem:[%s2901_s14 + $0x38] sm:$0xff]  ;;  %v2912_v52 = vld [vmem:[%s2911_s7] sm:$0xff]  ;;  %v2913_v11 = vld [vmem:[%s2911_s7 + $0x8] sm:$0xff]  ;;  %s3033_s27 = scalar_lea.vmem [#allocation2], %s4226_s0 }
 0x49a   : > { %v2864_v10 = vmul.f32 %v6907_v42, %v2845_v4  ;;  %v2865_v32 = vmul.f32 %v6907_v42, %v2846_v62  ;;  %v2866_v39 = vmul.f32 %v6907_v42, %v2847_v63  ;;  %v2867_v20 = vmul.f32 %v6907_v42, %v2848_v57  ;;  %v2915_v59 = vld [vmem:[%s2911_s7 + $0x18] sm:$0xff]  ;;  %v2916_v4 = vld [vmem:[%s2911_s7 + $0x20] sm:$0xff] }
 0x49b   : > { %v2869_v16 = vmul.f32 %v6910_v43, %v2851_v21  ;;  %v2870_v25 = vmul.f32 %v6910_v43, %v2852_v37  ;;  %v2871_v41 = vmul.f32 %v6910_v43, %v2853_v61  ;;  %v2872_v8 = vmul.f32 %v6910_v43, %v2854_v28  ;;  %v2919_v57 = vld [vmem:[%s2911_s7 + $0x38] sm:$0xff] }
 0x49c   : > { %v2873_v36 = vmul.f32 %v6910_v43, %v2855_v24  ;;  %v2874_v49 = vmul.f32 %v6910_v43, %v2856_v18  ;;  %v2875_v46 = vmul.f32 %v6910_v43, %v2857_v30  ;;  %v2876_v42 = vmul.f32 %v6910_v43, %v2858_v58 }
 0x49d   : > { %v6992_v55 = vadd.f32 %v2869_v16, %v2860_v60  ;;  %v6994_v9 = vadd.f32 %v2870_v25, %v2861_v13  ;;  %v6996_v33 = vadd.f32 %v2871_v41, %v2862_v40  ;;  %v6998_v34 = vadd.f32 %v2872_v8, %v2863_v0  ;;  %v2964_v25 = vld [vmem:[%s2962_s21 + $0x8] sm:$0xff]  ;;  %v2965_v41 = vld [vmem:[%s2962_s21 + $0x10] sm:$0xff]  ;;  %v2966_v8 = vld [vmem:[%s2962_s21 + $0x18] sm:$0xff] }
 0x49e   : > { %v7005_v44 = vadd.f32 %v2873_v36, %v2864_v10  ;;  %v7007_v43 = vadd.f32 %v2874_v49, %v2865_v32  ;;  %v7009_v50 = vadd.f32 %v2875_v46, %v2866_v39  ;;  %v7011_v53 = vadd.f32 %v2876_v42, %v2867_v20  ;;  %v2963_v10 = vld [vmem:[%s2962_s21] sm:$0xff] }
 0x49f   : > { %v2885_v12 = vmin.f32 %v6930_v23, %v6992_v55  ;;  %v2886_v6 = vmin.f32 %v6932_v19, %v6994_v9  ;;  %v2887_v17 = vmin.f32 %v6934_v27, %v6996_v33  ;;  %v2888_v35 = vmin.f32 %v6936_v51, %v6998_v34  ;;  %v2917_v27 = vld [vmem:[%s2911_s7 + $0x28] sm:$0xff]  ;;  %v2918_v51 = vld [vmem:[%s2911_s7 + $0x30] sm:$0xff]  ;;  %v2967_v55 = vld [vmem:[%s2962_s21 + $0x20] sm:$0xff] }
 0x4a0   : > { %v2889_v45 = vmin.f32 %v6947_v56, %v7005_v44  ;;  %v2890_v48 = vmin.f32 %v6952_v31, %v7007_v43  ;;  %v2891_v2 = vmin.f32 %v6957_v54, %v7009_v50  ;;  %v2892_v1 = vmin.f32 %v6962_v14, %v7011_v53  ;;  %v2968_v9 = vld [vmem:[%s2962_s21 + $0x28] sm:$0xff]  ;;  %v2969_v33 = vld [vmem:[%s2962_s21 + $0x30] sm:$0xff]  ;;  %v2973_v44 = vld [vmem:[%s2972_s22] sm:$0xff] }
 0x4a1   : > { %v2920_v62 = vstv %s6923_s30  ;;  %v2929_v63 = vstv %s6927_s4  ;;  %v7039_v23 = vstv %s6965_s10  ;;  %v7042_v19 = vstv %s6974_s12 }
 0x4a2   : > { %v2921_v21 = vmul.f32 %v2920_v62, %v2902_v3  ;;  %v2922_v37 = vmul.f32 %v2920_v62, %v2903_v15  ;;  %v2923_v56 = vmul.f32 %v2920_v62, %v2904_v26  ;;  %v2924_v31 = vmul.f32 %v2920_v62, %v2905_v22  ;;  %v2970_v22 = vld [vmem:[%s2962_s21 + $0x38] sm:$0xff]  ;;  %v2974_v43 = vld [vmem:[%s2972_s22 + $0x8] sm:$0xff] }
 0x4a3   : > { %v2925_v54 = vmul.f32 %v2920_v62, %v2906_v38  ;;  %v2926_v14 = vmul.f32 %v2920_v62, %v2907_v5  ;;  %v2927_v61 = vmul.f32 %v2920_v62, %v2908_v7  ;;  %v2928_v28 = vmul.f32 %v2920_v62, %v2909_v29  ;;  %v2975_v7 = vld [vmem:[%s2972_s22 + $0x10] sm:$0xff]  ;;  %v2980_v29 = vld [vmem:[%s2972_s22 + $0x38] sm:$0xff] }
 0x4a4   : > { %v2930_v24 = vmul.f32 %v2929_v63, %v2912_v52  ;;  %v2931_v18 = vmul.f32 %v2929_v63, %v2913_v11  ;;  %v2932_v30 = vmul.f32 %v2929_v63, %v2914_v47  ;;  %v2933_v58 = vmul.f32 %v2929_v63, %v2915_v59 }
 0x4a5   : > { %v2934_v60 = vmul.f32 %v2929_v63, %v2916_v4  ;;  %v2935_v13 = vmul.f32 %v2929_v63, %v2917_v27  ;;  %v2936_v40 = vmul.f32 %v2929_v63, %v2918_v51  ;;  %v2937_v0 = vmul.f32 %v2929_v63, %v2919_v57 }
 0x4a6   : > { %v2938_v32 = vadd.f32 %v2930_v24, %v2921_v21  ;;  %v2939_v39 = vadd.f32 %v2931_v18, %v2922_v37  ;;  %v2940_v20 = vadd.f32 %v2932_v30, %v2923_v56  ;;  %v2941_v16 = vadd.f32 %v2933_v58, %v2924_v31  ;;  %v3026_v58 = vld [vmem:[%s3023_s26 + $0x10] sm:$0xff] }
 0x4a7   : > { %v2942_v36 = vadd.f32 %v2934_v60, %v2925_v54  ;;  %v2943_v49 = vadd.f32 %v2935_v13, %v2926_v14  ;;  %v2944_v46 = vadd.f32 %v2936_v40, %v2927_v61  ;;  %v2945_v42 = vadd.f32 %v2937_v0, %v2928_v28  ;;  %v3024_v14 = vld [vmem:[%s3023_s26] sm:$0xff]  ;;  %v3025_v61 = vld [vmem:[%s3023_s26 + $0x8] sm:$0xff]  ;;  %v3027_v60 = vld [vmem:[%s3023_s26 + $0x18] sm:$0xff] }
 0x4a8   : > { %v7051_v34 = vmin.f32 %v2885_v12, %v2938_v32  ;;  %v7053_v3 = vmin.f32 %v2886_v6, %v2939_v39  ;;  %v7055_v15 = vmin.f32 %v2887_v17, %v2940_v20  ;;  %v7057_v26 = vmin.f32 %v2888_v35, %v2941_v16  ;;  %v2976_v12 = vld [vmem:[%s2972_s22 + $0x18] sm:$0xff]  ;;  %v2977_v6 = vld [vmem:[%s2972_s22 + $0x20] sm:$0xff]  ;;  %v2978_v17 = vld [vmem:[%s2972_s22 + $0x28] sm:$0xff] }
 0x4a9   : > { %v7062_v50 = vmin.f32 %v2889_v45, %v2942_v36  ;;  %v7064_v53 = vmin.f32 %v2890_v48, %v2943_v49  ;;  %v7066_v38 = vmin.f32 %v2891_v2, %v2944_v46  ;;  %v7068_v5 = vmin.f32 %v2892_v1, %v2945_v42  ;;  %v2979_v35 = vld [vmem:[%s2972_s22 + $0x30] sm:$0xff]  ;;  %v3028_v13 = vld [vmem:[%s3023_s26 + $0x20] sm:$0xff]  ;;  %v3029_v0 = vld [vmem:[%s3023_s26 + $0x28] sm:$0xff] }
 0x4aa   : > { %v2982_v52 = vmul.f32 %v7039_v23, %v2963_v10  ;;  %v2983_v11 = vmul.f32 %v7039_v23, %v2964_v25  ;;  %v2984_v45 = vmul.f32 %v7039_v23, %v2965_v41  ;;  %v2985_v48 = vmul.f32 %v7039_v23, %v2966_v8  ;;  %v3030_v10 = vld [vmem:[%s3023_s26 + $0x30] sm:$0xff]  ;;  %v3031_v32 = vld [vmem:[%s3023_s26 + $0x38] sm:$0xff]  ;;  %v3034_v41 = vld [vmem:[%s3033_s27] sm:$0xff] }
 0x4ab   : > { %v2986_v2 = vmul.f32 %v7039_v23, %v2967_v55  ;;  %v2987_v1 = vmul.f32 %v7039_v23, %v2968_v9  ;;  %v2988_v47 = vmul.f32 %v7039_v23, %v2969_v33  ;;  %v2989_v59 = vmul.f32 %v7039_v23, %v2970_v22  ;;  %v3035_v8 = vld [vmem:[%s3033_s27 + $0x8] sm:$0xff]  ;;  %v3036_v36 = vld [vmem:[%s3033_s27 + $0x10] sm:$0xff]  ;;  %v3037_v42 = vld [vmem:[%s3033_s27 + $0x18] sm:$0xff] }
 0x4ac   : > { %v2991_v4 = vmul.f32 %v7042_v19, %v2973_v44  ;;  %v2992_v62 = vmul.f32 %v7042_v19, %v2974_v43  ;;  %v2993_v63 = vmul.f32 %v7042_v19, %v2975_v7  ;;  %v2994_v27 = vmul.f32 %v7042_v19, %v2976_v12  ;;  %v3038_v55 = vld [vmem:[%s3033_s27 + $0x20] sm:$0xff] }
 0x4ad   : > { %v2995_v51 = vmul.f32 %v7042_v19, %v2977_v6  ;;  %v2996_v57 = vmul.f32 %v7042_v19, %v2978_v17  ;;  %v2997_v21 = vmul.f32 %v7042_v19, %v2979_v35  ;;  %v2998_v37 = vmul.f32 %v7042_v19, %v2980_v29 }
 0x4ae   : > { %v2999_v56 = vadd.f32 %v2991_v4, %v2982_v52  ;;  %v3000_v31 = vadd.f32 %v2992_v62, %v2983_v11  ;;  %v3001_v23 = vadd.f32 %v2993_v63, %v2984_v45  ;;  %v3002_v54 = vadd.f32 %v2994_v27, %v2985_v48 }
 0x4af   : > { %v3003_v28 = vadd.f32 %v2995_v51, %v2986_v2  ;;  %v3004_v24 = vadd.f32 %v2996_v57, %v2987_v1  ;;  %v3005_v18 = vadd.f32 %v2997_v21, %v2988_v47  ;;  %v3006_v30 = vadd.f32 %v2998_v37, %v2989_v59 }
 0x4b0   : > { %v3007_v40 = vmin.f32 %v7051_v34, %v2999_v56  ;;  %v3008_v19 = vmin.f32 %v7053_v3, %v3000_v31  ;;  %v3009_v39 = vmin.f32 %v7055_v15, %v3001_v23  ;;  %v3010_v20 = vmin.f32 %v7057_v26, %v3002_v54  ;;  %v3039_v34 = vld [vmem:[%s3033_s27 + $0x28] sm:$0xff]  ;;  %v3040_v3 = vld [vmem:[%s3033_s27 + $0x30] sm:$0xff]  ;;  %v3041_v15 = vld [vmem:[%s3033_s27 + $0x38] sm:$0xff] }
 0x4b1   : > { %v3011_v16 = vmin.f32 %v7062_v50, %v3003_v28  ;;  %v3012_v25 = vmin.f32 %v7064_v53, %v3004_v24  ;;  %v3013_v49 = vmin.f32 %v7066_v38, %v3005_v18  ;;  %v3014_v46 = vmin.f32 %v7068_v5, %v3006_v30 }
 0x4b2   : > { %v3042_v9 = vstv %s7071_s24  ;;  %v3051_v33 = vstv %s7079_s25  ;;  %v7151_v23 = vmov (%p2576_p0), 0.0   ;;  %v7153_v54 = vmov (%p2576_p0), 0.0  }
 0x4b3   : > { %v3043_v26 = vmul.f32 %v3042_v9, %v3024_v14  ;;  %v3044_v22 = vmul.f32 %v3042_v9, %v3025_v61  ;;  %v3045_v44 = vmul.f32 %v3042_v9, %v3026_v58  ;;  %v3046_v43 = vmul.f32 %v3042_v9, %v3027_v60 }
 0x4b4   : > { %v3047_v50 = vmul.f32 %v3042_v9, %v3028_v13  ;;  %v3048_v53 = vmul.f32 %v3042_v9, %v3029_v0  ;;  %v3049_v7 = vmul.f32 %v3042_v9, %v3030_v10  ;;  %v3050_v12 = vmul.f32 %v3042_v9, %v3031_v32 }
 0x4b5   : > { %v3052_v6 = vmul.f32 %v3051_v33, %v3034_v41  ;;  %v3053_v17 = vmul.f32 %v3051_v33, %v3035_v8  ;;  %v3054_v38 = vmul.f32 %v3051_v33, %v3036_v36  ;;  %v3055_v35 = vmul.f32 %v3051_v33, %v3037_v42 }
 0x4b6   : > { %v3056_v5 = vmul.f32 %v3051_v33, %v3038_v55  ;;  %v3057_v29 = vmul.f32 %v3051_v33, %v3039_v34  ;;  %v3058_v52 = vmul.f32 %v3051_v33, %v3040_v3  ;;  %v3059_v11 = vmul.f32 %v3051_v33, %v3041_v15 }
 0x4b7   : > { %v3060_v45 = vadd.f32 %v3052_v6, %v3043_v26  ;;  %v3061_v48 = vadd.f32 %v3053_v17, %v3044_v22  ;;  %v3062_v2 = vadd.f32 %v3054_v38, %v3045_v44  ;;  %v3063_v1 = vadd.f32 %v3055_v35, %v3046_v43 }
 0x4b8   : > { %v3064_v47 = vadd.f32 %v3056_v5, %v3047_v50  ;;  %v3065_v59 = vadd.f32 %v3057_v29, %v3048_v53  ;;  %v3066_v4 = vadd.f32 %v3058_v52, %v3049_v7  ;;  %v3067_v62 = vadd.f32 %v3059_v11, %v3050_v12 }
 0x4b9   : > { %v7108_v50 = vmin.f32 %v3007_v40, %v3060_v45   ;;  %v7110_v5 = vmin.f32 %v3008_v19, %v3061_v48   ;;  %v7112_v38 = vmin.f32 %v3009_v39, %v3062_v2   ;;  %v7114_v7 = vmin.f32 %v3010_v20, %v3063_v1  }
 0x4ba   : > { %v7116_v12 = vmin.f32 %v3011_v16, %v3064_v47   ;;  %v7118_v2 = vmin.f32 %v3012_v25, %v3065_v59   ;;  %v7120_v59 = vmin.f32 %v3013_v49, %v3066_v4   ;;  %v7122_v47 = vmin.f32 %v3014_v46, %v3067_v62   ;;  %2578 = sbr.rel (!%p2576_p0) target bundleno = 1131 (0x46b), region = 94 }
 0x4bb   : > { %v8731_v63 = vmov %v7108_v50  ;;  %v8732_v27 = vmov %v7110_v5  ;;  %v8733_v51 = vmov %v7112_v38  ;;  %v8734_v57 = vmov %v7114_v7 }
 0x4bc   : > { %v8735_v21 = vmov %v7116_v12  ;;  %v8736_v37 = vmov %v7118_v2  ;;  %v8737_v56 = vmov %v7120_v59  ;;  %v8738_v31 = vmov %v7122_v47 }
 0x4bd   : > { %v8739_v47 = vmov %v8738_v31  ;;  %v8740_v59 = vmov %v8737_v56  ;;  %v8741_v2 = vmov %v8736_v37  ;;  %v8742_v12 = vmov %v8735_v21 }
 0x4be   : > { %v8743_v7 = vmov %v8734_v57  ;;  %v8744_v38 = vmov %v8733_v51  ;;  %v8745_v5 = vmov %v8732_v27  ;;  %v8746_v50 = vmov %v8731_v63 }
 0x4bf   :  { %v7155_v14 = vmov 0.0   ;;  %v7157_v61 = vmov 0.0   ;;  %v7159_v28 = vmov 0.0   ;;  %v7161_v24 = vmov 0.0  }
 0x4c0   :  { %v7163_v18 = vmov 0.0   ;;  %v7165_v30 = vmov 0.0   ;;  %v7167_v58 = vmov 0.0   ;;  %v7169_v60 = vmov 0.0  }
 0x4c1   :  { %v7171_v13 = vmov 0.0   ;;  %v7173_v40 = vmov 0.0   ;;  %v7175_v19 = vmov 0.0   ;;  %v7177_v0 = vmov 0.0  }
 0x4c2   :  { %v7179_v10 = vmov 0.0   ;;  %v7181_v32 = vmov 0.0  }
 0x4c3 LB: > { %s7237_s28 = sshll.u32 %s4910_s2, 10  ;;  %s7265_s18 = sshll.u32 %s4910_s2, 3  ;;  %s4910_s2 = sphi %s7183_s2, %s3081_s2   ;;  %v4906_v32 = vphi %v7181_v32, %v8785_v32   ;;  %v4902_v10 = vphi %v7179_v10, %v8784_v10   ;;  %v4898_v0 = vphi %v7177_v0, %v8783_v0   ;;  %v4894_v19 = vphi %v7175_v19, %v8782_v19   ;;  %v4890_v40 = vphi %v7173_v40, %v8781_v40   ;;  %v4886_v13 = vphi %v7171_v13, %v8780_v13   ;;  %v4882_v60 = vphi %v7169_v60, %v8779_v60   ;;  %v4878_v58 = vphi %v7167_v58, %v8778_v58   ;;  %v4874_v30 = vphi %v7165_v30, %v8777_v30   ;;  %v4870_v18 = vphi %v7163_v18, %v8776_v18   ;;  %v4866_v24 = vphi %v7161_v24, %v8775_v24   ;;  %v4862_v28 = vphi %v7159_v28, %v8774_v28   ;;  %v4858_v61 = vphi %v7157_v61, %v8773_v61   ;;  %v4854_v14 = vphi %v7155_v14, %v8772_v14   ;;  %v4850_v54 = vphi %v7153_v54, %v8771_v54   ;;  %v4846_v23 = vphi %v7151_v23, %v8770_v23  }
 0x4c4   : > { %s3100_s3 = sld [smem:[#allocation3 + %s7237_s28]]  ;;  %s3101_s29 = sadd.s32 1, %s7237_s28 }
 0x4c5   : > { %s3102_s30 = sld [smem:[#allocation3 + %s3101_s29]]  ;;  %s7243_s1 = sadd.s32 128, %s7237_s28 }
 0x4c6   : > { %s3103_s4 = sld [smem:[#allocation5 + %s7237_s28]]  ;;  %s3204_s9 = sadd.s32 1, %s7243_s1 }
 0x4c7   : > { %s3104_s6 = sld [smem:[#allocation5 + %s3101_s29]]  ;;  %s7270_s19 = sadd.s32 256, %s7237_s28 }
 0x4c8   : > { %s7247_s12 = sld [smem:[#allocation3 + %s7243_s1]]  ;;  %s3183_s20 = scvt.s32.f32 %s7265_s18 }
 0x4c9   : > { %s7251_s14 = sld [smem:[#allocation3 + %s3204_s9]]  ;;  %s3201_s23 = sadd.s32 1, %s7265_s18 }
 0x4ca   : > { %s4229_s8 = sshll.u32 %s3100_s3, 6  ;;  %s7255_s15 = sld [smem:[#allocation5 + %s7243_s1]] }
 0x4cb   : > { %s4230_s10 = sshll.u32 %s3102_s30, 6  ;;  %s3106_s11 = scalar_lea.vmem [#allocation2], %s4229_s8 }
 0x4cc   : > { %v3107_v39 = vld [vmem:[%s3106_s11] sm:$0xff]  ;;  %v3108_v20 = vld [vmem:[%s3106_s11 + $0x8] sm:$0xff]  ;;  %v3109_v16 = vld [vmem:[%s3106_s11 + $0x10] sm:$0xff]  ;;  %v3125_v25 = vstv %s3103_s4  ;;  %s3116_s13 = scalar_lea.vmem [#allocation2], %s4230_s10  ;;  %s3207_s7 = sld [smem:[#allocation5 + %s3204_s9]] }
 0x4cd   : > { %v3110_v41 = vld [vmem:[%s3106_s11 + $0x18] sm:$0xff]  ;;  %v3111_v8 = vld [vmem:[%s3106_s11 + $0x20] sm:$0xff]  ;;  %v3126_v36 = vmul.f32 %v3125_v25, %v3107_v39  ;;  %v3134_v49 = vstv %s3104_s6  ;;  %v3112_v46 = vld [vmem:[%s3106_s11 + $0x28] sm:$0xff]  ;;  %v3127_v9 = vmul.f32 %v3125_v25, %v3108_v20  ;;  %v3128_v33 = vmul.f32 %v3125_v25, %v3109_v16  ;;  %s3307_s24 = sadd.s32 1, %s7270_s19  ;;  %s7287_s25 = sld [smem:[#allocation3 + %s7270_s19]] }
 0x4ce   : > { %v3113_v42 = vld [vmem:[%s3106_s11 + $0x30] sm:$0xff]  ;;  %v3117_v55 = vld [vmem:[%s3116_s13] sm:$0xff]  ;;  %v3118_v34 = vld [vmem:[%s3116_s13 + $0x8] sm:$0xff]  ;;  %v3129_v26 = vmul.f32 %v3125_v25, %v3110_v41  ;;  %v3130_v38 = vmul.f32 %v3125_v25, %v3111_v8  ;;  %v3131_v29 = vmul.f32 %v3125_v25, %v3112_v46  ;;  %s4232_s16 = sshll.u32 %s7247_s12, 6  ;;  %s3286_s0 = scvt.s32.f32 %s3201_s23 }
 0x4cf   : > { %v3119_v3 = vld [vmem:[%s3116_s13 + $0x10] sm:$0xff]  ;;  %v3120_v15 = vld [vmem:[%s3116_s13 + $0x18] sm:$0xff]  ;;  %v3135_v22 = vmul.f32 %v3134_v49, %v3117_v55  ;;  %v3121_v44 = vld [vmem:[%s3116_s13 + $0x20] sm:$0xff]  ;;  %v3136_v53 = vmul.f32 %v3134_v49, %v3118_v34  ;;  %v3132_v48 = vmul.f32 %v3125_v25, %v3113_v42  ;;  %s4233_s17 = sshll.u32 %s7251_s14, 6  ;;  %s3209_s21 = scalar_lea.vmem [#allocation2], %s4232_s16 }
 0x4d0   : > { %v3122_v43 = vld [vmem:[%s3116_s13 + $0x28] sm:$0xff]  ;;  %v3123_v50 = vld [vmem:[%s3116_s13 + $0x30] sm:$0xff]  ;;  %v3137_v7 = vmul.f32 %v3134_v49, %v3119_v3  ;;  %v3138_v12 = vmul.f32 %v3134_v49, %v3120_v15  ;;  %v3114_v6 = vld [vmem:[%s3106_s11 + $0x38] sm:$0xff]  ;;  %v3139_v35 = vmul.f32 %v3134_v49, %v3121_v44  ;;  %s7275_s22 = scalar_lea.vmem [#allocation2], %s4233_s17  ;;  %s7293_s26 = sld [smem:[#allocation3 + %s3307_s24]] }
 0x4d1   : > { %v3124_v17 = vld [vmem:[%s3116_s13 + $0x38] sm:$0xff]  ;;  %v3143_v5 = vadd.f32 %v3135_v22, %v3126_v36  ;;  %v3140_v52 = vmul.f32 %v3134_v49, %v3122_v43  ;;  %v3144_v11 = vadd.f32 %v3136_v53, %v3127_v9  ;;  %v3141_v2 = vmul.f32 %v3134_v49, %v3123_v50  ;;  %v3210_v3 = vld [vmem:[%s3209_s21] sm:$0xff]  ;;  %v3211_v43 = vld [vmem:[%s3209_s21 + $0x8] sm:$0xff]  ;;  %s7310_s27 = sld [smem:[#allocation5 + %s7270_s19]]  ;;  %s7360_s4 = sadd.s32 384, %s7237_s28 }
 0x4d2   : > { %v3145_v45 = vadd.f32 %v3137_v7, %v3128_v33  ;;  %v3146_v1 = vadd.f32 %v3138_v12, %v3129_v26  ;;  %v3133_v59 = vmul.f32 %v3125_v25, %v3114_v6  ;;  %v3142_v4 = vmul.f32 %v3134_v49, %v3124_v17  ;;  %v3220_v15 = vld [vmem:[%s7275_s22] sm:$0xff]  ;;  %v3212_v53 = vld [vmem:[%s3209_s21 + $0x10] sm:$0xff]  ;;  %v3213_v7 = vld [vmem:[%s3209_s21 + $0x18] sm:$0xff]  ;;  %s7321_s3 = sld [smem:[#allocation5 + %s3307_s24]]  ;;  %s3304_s6 = sadd.s32 2, %s7265_s18 }
 0x4d3   : > { %v3151_v47 = vsub.f32 %v8731_v63, %v3143_v5  ;;  %v3152_v62 = vsub.f32 %v8732_v27, %v3144_v11  ;;  %v3147_v39 = vadd.f32 %v3139_v35, %v3130_v38  ;;  %v3148_v20 = vadd.f32 %v3140_v52, %v3131_v29  ;;  %v3221_v12 = vld [vmem:[%s7275_s22 + $0x8] sm:$0xff]  ;;  %v3214_v17 = vld [vmem:[%s3209_s21 + $0x20] sm:$0xff]  ;;  %v3222_v35 = vld [vmem:[%s7275_s22 + $0x10] sm:$0xff]  ;;  %s4235_s29 = sshll.u32 %s7287_s25, 6  ;;  %s3410_s9 = sadd.s32 1, %s7360_s4 }
 0x4d4   : > { %v3153_v16 = vsub.f32 %v8733_v51, %v3145_v45  ;;  %v3149_v41 = vadd.f32 %v3141_v2, %v3132_v48  ;;  %v3154_v8 = vsub.f32 %v8734_v57, %v3146_v1  ;;  %v3150_v25 = vadd.f32 %v3142_v4, %v3133_v59  ;;  %v3215_v38 = vld [vmem:[%s3209_s21 + $0x28] sm:$0xff]  ;;  %v3216_v45 = vld [vmem:[%s3209_s21 + $0x30] sm:$0xff]  ;;  %v3217_v48 = vld [vmem:[%s3209_s21 + $0x38] sm:$0xff]  ;;  %s7367_s1 = scalar_lea.vmem [#allocation2], %s4235_s29  ;;  %s7387_s10 = sld [smem:[#allocation5 + %s7360_s4]] }
 0x4d5   : > { %v3159_v36 = vmul.f32 1.442695, %v3151_v47  ;;  %v3161_v49 = vmul.f32 1.442695, %v3152_v62  ;;  %v3155_v46 = vsub.f32 %v8735_v21, %v3147_v39  ;;  %v3156_v42 = vsub.f32 %v8736_v37, %v3148_v20  ;;  %v3223_v47 = vld [vmem:[%s7275_s22 + $0x18] sm:$0xff]  ;;  %v3224_v20 = vld [vmem:[%s7275_s22 + $0x20] sm:$0xff]  ;;  %s3389_s12 = scvt.s32.f32 %s3304_s6 }
 0x4d6   : > { %v3163_v55 = vmul.f32 1.442695, %v3153_v16  ;;  %v3157_v9 = vsub.f32 %v8737_v56, %v3149_v41  ;;  %v3165_v33 = vmul.f32 1.442695, %v3154_v8  ;;  %v3158_v34 = vsub.f32 %v8738_v31, %v3150_v25  ;;  %v3225_v16 = vld [vmem:[%s7275_s22 + $0x28] sm:$0xff]  ;;  %v3226_v25 = vld [vmem:[%s7275_s22 + $0x30] sm:$0xff] }
 0x4d7   : > { %4532 = vpow2.f32 %v3159_v36  ;;  %v3228_v26 = vstv %s7255_s15  ;;  %v7279_v22 = vstv %s3207_s7  ;;  %v3167_v44 = vmul.f32 1.442695, %v3155_v46  ;;  %s4236_s30 = sshll.u32 %s7293_s26, 6  ;;  %s7406_s11 = sld [smem:[#allocation3 + %s7360_s4]] }
 0x4d8   : > { %4534 = vpow2.f32 %v3161_v49  ;;  %v3169_v50 = vmul.f32 1.442695, %v3156_v42  ;;  %v3171_v6 = vmul.f32 1.442695, %v3157_v9  ;;  %v3229_v5 = vmul.f32 %v3228_v26, %v3210_v3  ;;  %s7370_s8 = scalar_lea.vmem [#allocation2], %s4236_s30  ;;  %s7416_s13 = sld [smem:[#allocation3 + %s3410_s9]] }
 0x4d9   : > { %4536 = vpow2.f32 %v3163_v55  ;;  %v3238_v29 = vmul.f32 %v7279_v22, %v3220_v15  ;;  %v3173_v52 = vmul.f32 1.442695, %v3158_v34  ;;  %v7289_v11 = vstv %s3183_s20  ;;  %s7438_s14 = sld [smem:[#allocation5 + %s3410_s9]]  ;;  %s7494_s19 = sadd.s32 512, %s7237_s28 }
 0x4da   : > { %4538 = vpow2.f32 %v3165_v33  ;;  %v3230_v2 = vmul.f32 %v3228_v26, %v3211_v43  ;;  %v3231_v59 = vmul.f32 %v3228_v26, %v3212_v53  ;;  %v3232_v4 = vmul.f32 %v3228_v26, %v3213_v7  ;;  %v3227_v33 = vld [vmem:[%s7275_s22 + $0x38] sm:$0xff]  ;;  %s3513_s20 = sadd.s32 1, %s7494_s19  ;;  %s7523_s21 = sld [smem:[#allocation3 + %s7494_s19]] }
 0x4db   : > { %4540 = vpow2.f32 %v3167_v44  ;;  %v3239_v62 = vmul.f32 %v7279_v22, %v3221_v12  ;;  %v3233_v41 = vmul.f32 %v3228_v26, %v3214_v17  ;;  %v3234_v8 = vmul.f32 %v3228_v26, %v3215_v38  ;;  %s7535_s22 = sld [smem:[#allocation3 + %s3513_s20]]  ;;  %s3407_s26 = sadd.s32 3, %s7265_s18 }
 0x4dc   : > { %4542 = vpow2.f32 %v3169_v50  ;;  %v3240_v36 = vmul.f32 %v7279_v22, %v3222_v35  ;;  %v3235_v49 = vmul.f32 %v3228_v26, %v3216_v45  ;;  %v3236_v46 = vmul.f32 %v3228_v26, %v3217_v48  ;;  %s7560_s23 = sld [smem:[#allocation5 + %s7494_s19]]  ;;  %s3510_s6 = sadd.s32 4, %s7265_s18 }
 0x4dd   : > { %v4533_v1 = vpop.eup %4532  ;;  %4544 = vpow2.f32 %v3171_v6  ;;  %v3246_v42 = vadd.f32 %v3238_v29, %v3229_v5  ;;  %v3241_v34 = vmul.f32 %v7279_v22, %v3223_v47  ;;  %v7304_v3 = vstv %s3286_s0  ;;  %s4238_s15 = sshll.u32 %s7406_s11, 6  ;;  %s7570_s24 = sld [smem:[#allocation5 + %s3513_s20]] }
 0x4de   : > { %v4535_v39 = vpop.eup %4534  ;;  %4546 = vpow2.f32 %v3173_v52  ;;  %v3185_v9 = vmul.f32 %v4533_v1, %v7289_v11  ;;  %v3242_v43 = vmul.f32 %v7279_v22, %v3224_v20  ;;  %v3243_v50 = vmul.f32 %v7279_v22, %v3225_v16  ;;  %s4239_s7 = sshll.u32 %s7416_s13, 6  ;;  %s7482_s16 = scalar_lea.vmem [#allocation2], %s4238_s15 }
 0x4df   : > { %v4537_v55 = vpop.eup %4536  ;;  %v3186_v44 = vmul.f32 %v4535_v39, %v7289_v11  ;;  %v3247_v53 = vadd.f32 %v3239_v62, %v3230_v2  ;;  %v7313_v26 = vadd.f32 %v4906_v32, %v4533_v1  ;;  %v7316_v7 = vadd.f32 %v4902_v10, %v4535_v39  ;;  %s7487_s17 = scalar_lea.vmem [#allocation2], %s4239_s7  ;;  %s3595_s9 = scvt.s32.f32 %s3510_s6 }
 0x4e0   : > { %v4539_v15 = vpop.eup %4538  ;;  %v3244_v12 = vmul.f32 %v7279_v22, %v3226_v25  ;;  %v3248_v6 = vadd.f32 %v3240_v36, %v3231_v59  ;;  %v7324_v38 = vadd.f32 %v4898_v0, %v4537_v55  ;;  %v3187_v35 = vmul.f32 %v4537_v55, %v7289_v11  ;;  %s4241_s25 = sshll.u32 %s7523_s21, 6  ;;  %s7765_s7 = sadd.s32 768, %s7237_s28 }
 0x4e1   : > { %v4541_v17 = vpop.eup %4540  ;;  %v3245_v5 = vmul.f32 %v7279_v22, %v3227_v33  ;;  %v3254_v32 = vsub.f32 %v8731_v63, %v3246_v42  ;;  %v7330_v10 = vadd.f32 %v4894_v19, %v4539_v15  ;;  %v3188_v52 = vmul.f32 %v4539_v15, %v7289_v11  ;;  %s4242_s0 = sshll.u32 %s7535_s22, 6  ;;  %s7616_s29 = scalar_lea.vmem [#allocation2], %s4241_s25 }
 0x4e2   : > { %v4543_v29 = vpop.eup %4542  ;;  %v7334_v45 = vadd.f32 %v4874_v30, %v3185_v9  ;;  %v3249_v48 = vadd.f32 %v3241_v34, %v3232_v4  ;;  %v7339_v2 = vadd.f32 %v4870_v18, %v3186_v44  ;;  %v3250_v1 = vadd.f32 %v3242_v43, %v3233_v41  ;;  %v3314_v44 = vld [vmem:[%s7367_s1 + $0x8] sm:$0xff]  ;;  %s7619_s30 = scalar_lea.vmem [#allocation2], %s4242_s0  ;;  %s3719_s19 = sadd.s32 1, %s7765_s7 }
 0x4e3   : > { %v4545_v0 = vpop.eup %4544  ;;  %v3251_v22 = vadd.f32 %v3243_v50, %v3234_v8  ;;  %v3255_v47 = vsub.f32 %v8732_v27, %v3247_v53  ;;  %v7343_v19 = vadd.f32 %v4890_v40, %v4541_v17  ;;  %v3189_v62 = vmul.f32 %v4541_v17, %v7289_v11  ;;  %v3315_v53 = vld [vmem:[%s7367_s1 + $0x10] sm:$0xff]  ;;  %s7787_s20 = sld [smem:[#allocation3 + %s7765_s7]]  ;;  %s7842_s0 = sadd.s32 896, %s7237_s28 }
 0x4e4   : > { %v4547_v59 = vpop.eup %4546  ;;  %v3252_v30 = vadd.f32 %v3244_v12, %v3235_v49  ;;  %v3256_v4 = vsub.f32 %v8733_v51, %v3248_v6  ;;  %v7348_v39 = vadd.f32 %v4886_v13, %v4543_v29  ;;  %v7351_v18 = vadd.f32 %v4866_v24, %v3187_v35  ;;  %v3316_v12 = vld [vmem:[%s7367_s1 + $0x18] sm:$0xff]  ;;  %v3324_v6 = vld [vmem:[%s7370_s8 + $0x8] sm:$0xff]  ;;  %v3317_v35 = vld [vmem:[%s7367_s1 + $0x20] sm:$0xff]  ;;  %s7797_s22 = sld [smem:[#allocation3 + %s3719_s19]]  ;;  %s3081_s2 = sadd.s32 1, %s4910_s2  }
 0x4e5   : > { %v3253_v20 = vadd.f32 %v3245_v5, %v3236_v46  ;;  %v3262_v16 = vmul.f32 1.442695, %v3254_v32  ;;  %v3190_v41 = vmul.f32 %v4543_v29, %v7289_v11  ;;  %v3191_v40 = vmul.f32 %v4545_v0, %v7289_v11  ;;  %v3325_v5 = vld [vmem:[%s7370_s8 + $0x10] sm:$0xff]  ;;  %p8094_p1 = scmp.ge.s32.totalorder %s3081_s2, 2  }
 0x4e6   : > { %v7356_v8 = vadd.f32 %v4862_v28, %v3188_v52  ;;  %v3257_v36 = vsub.f32 %v8734_v57, %v3249_v48  ;;  %v3192_v13 = vmul.f32 %v4547_v59, %v7289_v11  ;;  %v3258_v24 = vsub.f32 %v8735_v21, %v3250_v1  ;;  %v3313_v28 = vld [vmem:[%s7367_s1] sm:$0xff]  ;;  %v3326_v48 = vld [vmem:[%s7370_s8 + $0x18] sm:$0xff]  ;;  %v3319_v1 = vld [vmem:[%s7367_s1 + $0x30] sm:$0xff] }
 0x4e7   : > { %v3259_v25 = vsub.f32 %v8736_v37, %v3251_v22  ;;  %v3264_v49 = vmul.f32 1.442695, %v3255_v47  ;;  %v3260_v46 = vsub.f32 %v8737_v56, %v3252_v30  ;;  %v3266_v42 = vmul.f32 1.442695, %v3256_v4  ;;  %v3323_v11 = vld [vmem:[%s7370_s8] sm:$0xff]  ;;  %v3320_v22 = vld [vmem:[%s7367_s1 + $0x38] sm:$0xff] }
 0x4e8   : > { %v3331_v55 = vstv %s7310_s27  ;;  %v7375_v9 = vstv %s7321_s3  ;;  %v7378_v33 = vadd.f32 %v4882_v60, %v4545_v0  ;;  %v7381_v34 = vadd.f32 %v4858_v61, %v3189_v62  ;;  %v3327_v47 = vld [vmem:[%s7370_s8 + $0x20] sm:$0xff]  ;;  %v3328_v30 = vld [vmem:[%s7370_s8 + $0x28] sm:$0xff]  ;;  %s7598_s27 = sadd.s32 640, %s7237_s28  ;;  %s7614_s3 = scvt.s32.f32 %s3407_s26 }
 0x4e9   : > { %v3261_v15 = vsub.f32 %v8738_v31, %v3253_v20  ;;  %4548 = vpow2.f32 %v3262_v16  ;;  %v7390_v43 = vadd.f32 %v4878_v58, %v4547_v59  ;;  %v7393_v60 = vadd.f32 %v4854_v14, %v3190_v41  ;;  %v3318_v58 = vld [vmem:[%s7367_s1 + $0x28] sm:$0xff]  ;;  %s3616_s4 = sadd.s32 1, %s7598_s27  ;;  %s7651_s1 = sld [smem:[#allocation3 + %s7598_s27]] }
 0x4ea   : > { %v7396_v50 = vadd.f32 %v4850_v54, %v3191_v40  ;;  %v3268_v61 = vmul.f32 1.442695, %v3257_v36  ;;  %4550 = vpow2.f32 %v3264_v49  ;;  %v3270_v17 = vmul.f32 1.442695, %v3258_v24  ;;  %v3329_v40 = vld [vmem:[%s7370_s8 + $0x30] sm:$0xff]  ;;  %s7690_s11 = sld [smem:[#allocation5 + %s3616_s4]] }
 0x4eb   : > { %v3332_v14 = vmul.f32 %v3331_v55, %v3313_v28  ;;  %v3341_v32 = vmul.f32 %v7375_v9, %v3323_v11  ;;  %v7409_v54 = vadd.f32 %v4846_v23, %v3192_v13  ;;  %4552 = vpow2.f32 %v3266_v42  ;;  %s4248_s25 = sshll.u32 %s7797_s22, 6  ;;  %s3822_s28 = sadd.s32 1, %s7842_s0 }
 0x4ec   : > { %v3272_v29 = vmul.f32 1.442695, %v3259_v25  ;;  %v3274_v52 = vmul.f32 1.442695, %v3260_v46  ;;  %v3276_v0 = vmul.f32 1.442695, %v3261_v15  ;;  %v3333_v59 = vmul.f32 %v3331_v55, %v3314_v44 }
 0x4ed   : > { %v3334_v62 = vmul.f32 %v3331_v55, %v3315_v53  ;;  %v3342_v23 = vmul.f32 %v7375_v9, %v3324_v6  ;;  %4554 = vpow2.f32 %v3268_v61  ;;  %v3335_v4 = vmul.f32 %v3331_v55, %v3316_v12  ;;  %v3330_v25 = vld [vmem:[%s7370_s8 + $0x38] sm:$0xff]  ;;  %s7659_s8 = sld [smem:[#allocation3 + %s3616_s4]] }
 0x4ee   : > { %v3336_v20 = vmul.f32 %v3331_v55, %v3317_v35  ;;  %v3343_v16 = vmul.f32 %v7375_v9, %v3325_v5  ;;  %4556 = vpow2.f32 %v3270_v17  ;;  %v3337_v36 = vmul.f32 %v3331_v55, %v3318_v58  ;;  %s7917_s4 = sld [smem:[#allocation5 + %s3822_s28]] }
 0x4ef   : > { %v4549_v41 = vpop.eup %4548  ;;  %v3344_v13 = vmul.f32 %v7375_v9, %v3326_v48  ;;  %v3349_v24 = vadd.f32 %v3341_v32, %v3332_v14  ;;  %v3338_v49 = vmul.f32 %v3331_v55, %v3319_v1  ;;  %v3339_v46 = vmul.f32 %v3331_v55, %v3320_v22 }
 0x4f0   : > { %v3345_v42 = vmul.f32 %v7375_v9, %v3327_v47  ;;  %v7428_v28 = vstv %s3389_s12  ;;  %v4551_v11 = vpop.eup %4550  ;;  %4558 = vpow2.f32 %v3272_v29  ;;  %v3346_v15 = vmul.f32 %v7375_v9, %v3328_v30  ;;  %s4244_s12 = sshll.u32 %s7651_s1, 6 }
 0x4f1   : > { %v3350_v44 = vadd.f32 %v3342_v23, %v3333_v59  ;;  %v7432_v61 = vstv %s7387_s10  ;;  %v4553_v53 = vpop.eup %4552  ;;  %4560 = vpow2.f32 %v3274_v52  ;;  %v3288_v12 = vmul.f32 %v4549_v41, %v7304_v3  ;;  %s7684_s10 = sld [smem:[#allocation5 + %s7598_s27]] }
 0x4f2   : > { %v3347_v6 = vmul.f32 %v7375_v9, %v3329_v40  ;;  %v3351_v55 = vadd.f32 %v3343_v16, %v3334_v62  ;;  %4562 = vpow2.f32 %v3276_v0  ;;  %v3348_v17 = vmul.f32 %v7375_v9, %v3330_v25  ;;  %s7880_s27 = sld [smem:[#allocation3 + %s7842_s0]] }
 0x4f3   : > { %v3352_v35 = vadd.f32 %v3344_v13, %v3335_v4  ;;  %v3357_v58 = vsub.f32 %v8731_v63, %v3349_v24  ;;  %v4555_v5 = vpop.eup %4554  ;;  %v7443_v14 = vadd.f32 %v4549_v41, %v7313_v26  ;;  %v7446_v32 = vadd.f32 %v4551_v11, %v7316_v7  ;;  %s4245_s13 = sshll.u32 %s7659_s8, 6 }
 0x4f4   : > { %v3289_v29 = vmul.f32 %v4551_v11, %v7304_v3  ;;  %v3353_v52 = vadd.f32 %v3345_v42, %v3336_v20  ;;  %v4557_v48 = vpop.eup %4556  ;;  %v7452_v0 = vadd.f32 %v4553_v53, %v7324_v38  ;;  %v3290_v9 = vmul.f32 %v4553_v53, %v7304_v3  ;;  %v3427_v53 = vld [vmem:[%s7487_s17 + $0x8] sm:$0xff]  ;;  %s7741_s15 = scalar_lea.vmem [#allocation2], %s4245_s13 }
 0x4f5   : > { %v3354_v1 = vadd.f32 %v3346_v15, %v3337_v36  ;;  %v3358_v22 = vsub.f32 %v8732_v27, %v3350_v44  ;;  %v7457_v26 = vadd.f32 %v4555_v5, %v7330_v10  ;;  %v7460_v7 = vadd.f32 %v3288_v12, %v7334_v45  ;;  %v3417_v44 = vld [vmem:[%s7482_s16 + $0x8] sm:$0xff] }
 0x4f6   : > { %v3355_v47 = vadd.f32 %v3347_v6, %v3338_v49  ;;  %v3359_v59 = vsub.f32 %v8733_v51, %v3351_v55  ;;  %v4559_v62 = vpop.eup %4558  ;;  %v3291_v23 = vmul.f32 %v4555_v5, %v7304_v3  ;;  %v3356_v30 = vadd.f32 %v3348_v17, %v3339_v46 }
 0x4f7   : > { %v3360_v38 = vsub.f32 %v8734_v57, %v3352_v35  ;;  %v3365_v4 = vmul.f32 1.442695, %v3357_v58  ;;  %v4561_v20 = vpop.eup %4560  ;;  %v7466_v16 = vadd.f32 %v4557_v48, %v7343_v19  ;;  %v3292_v10 = vmul.f32 %v4557_v48, %v7304_v3  ;;  %v3418_v35 = vld [vmem:[%s7482_s16 + $0x10] sm:$0xff]  ;;  %v3429_v48 = vld [vmem:[%s7487_s17 + $0x18] sm:$0xff] }
 0x4f8   : > { %v7470_v45 = vadd.f32 %v3289_v29, %v7339_v2  ;;  %v3361_v41 = vsub.f32 %v8735_v21, %v3353_v52  ;;  %v4563_v40 = vpop.eup %4562  ;;  %v7474_v36 = vadd.f32 %v4559_v62, %v7348_v39  ;;  %v7477_v13 = vadd.f32 %v3290_v9, %v7351_v18  ;;  %v3416_v2 = vld [vmem:[%s7482_s16] sm:$0xff]  ;;  %v3428_v58 = vld [vmem:[%s7487_s17 + $0x10] sm:$0xff]  ;;  %v3419_v52 = vld [vmem:[%s7482_s16 + $0x18] sm:$0xff]  ;;  %s4250_s6 = sshll.u32 %s7880_s27, 6 }
 0x4f9   : > { %v3362_v24 = vsub.f32 %v8736_v37, %v3354_v1  ;;  %v3367_v19 = vmul.f32 1.442695, %v3358_v22  ;;  %v3293_v25 = vmul.f32 %v4559_v62, %v7304_v3  ;;  %v3363_v49 = vsub.f32 %v8737_v56, %v3355_v47  ;;  %v3426_v39 = vld [vmem:[%s7487_s17] sm:$0xff]  ;;  %s7969_s8 = scalar_lea.vmem [#allocation2], %s4250_s6 }
 0x4fa   : > { %v3369_v46 = vmul.f32 1.442695, %v3359_v59  ;;  %v7491_v18 = vstv %s7438_s14  ;;  %v7497_v42 = vadd.f32 %v3291_v23, %v7356_v8  ;;  %v3364_v11 = vsub.f32 %v8738_v31, %v3356_v30  ;;  %v3420_v62 = vld [vmem:[%s7482_s16 + $0x20] sm:$0xff]  ;;  %v3421_v23 = vld [vmem:[%s7482_s16 + $0x28] sm:$0xff]  ;;  %s7738_s14 = scalar_lea.vmem [#allocation2], %s4244_s12  ;;  %s3819_s12 = sadd.s32 7, %s7265_s18 }
 0x4fb   : > { %4564 = vpow2.f32 %v3365_v4  ;;  %v3371_v15 = vmul.f32 1.442695, %v3360_v38  ;;  %v7503_v12 = vadd.f32 %v4561_v20, %v7378_v33  ;;  %v3294_v6 = vmul.f32 %v4561_v20, %v7304_v3  ;;  %v3430_v30 = vld [vmem:[%s7487_s17 + $0x20] sm:$0xff]  ;;  %v3422_v4 = vld [vmem:[%s7482_s16 + $0x30] sm:$0xff]  ;;  %v3423_v20 = vld [vmem:[%s7482_s16 + $0x38] sm:$0xff]  ;;  %s3613_s16 = sadd.s32 5, %s7265_s18 }
 0x4fc   : > { %v3295_v55 = vmul.f32 %v4563_v40, %v7304_v3  ;;  %v3373_v17 = vmul.f32 1.442695, %v3361_v41  ;;  %4566 = vpow2.f32 %v3367_v19  ;;  %v3375_v8 = vmul.f32 1.442695, %v3362_v24  ;;  %v3431_v19 = vld [vmem:[%s7487_s17 + $0x28] sm:$0xff]  ;;  %s3698_s21 = scvt.s32.f32 %s3613_s16 }
 0x4fd   : > { %v3435_v5 = vmul.f32 %v7432_v61, %v3416_v2  ;;  %v3444_v29 = vmul.f32 %v7491_v18, %v3426_v39  ;;  %4568 = vpow2.f32 %v3369_v46  ;;  %v3377_v33 = vmul.f32 1.442695, %v3363_v49  ;;  %v3433_v2 = vld [vmem:[%s7487_s17 + $0x38] sm:$0xff] }
 0x4fe   : > { %v3436_v3 = vmul.f32 %v7432_v61, %v3417_v44  ;;  %v3445_v9 = vmul.f32 %v7491_v18, %v3427_v53  ;;  %v7517_v1 = vadd.f32 %v4563_v40, %v7390_v43  ;;  %v7520_v22 = vadd.f32 %v3292_v10, %v7381_v34 }
 0x4ff   : > { %4570 = vpow2.f32 %v3371_v15  ;;  %v3379_v47 = vmul.f32 1.442695, %v3364_v11  ;;  %v7526_v59 = vadd.f32 %v3293_v25, %v7393_v60  ;;  %v3437_v43 = vmul.f32 %v7432_v61, %v3418_v35  ;;  %v3432_v25 = vld [vmem:[%s7487_s17 + $0x30] sm:$0xff]  ;;  %s7775_s17 = sld [smem:[#allocation5 + %s7765_s7]] }
 0x500   : > { %4572 = vpow2.f32 %v3373_v17  ;;  %v3446_v38 = vmul.f32 %v7491_v18, %v3428_v58  ;;  %v3438_v60 = vmul.f32 %v7432_v61, %v3419_v52  ;;  %v3447_v10 = vmul.f32 %v7491_v18, %v3429_v48 }
 0x501   : > { %v4565_v34 = vpop.eup %4564  ;;  %4574 = vpow2.f32 %v3375_v8  ;;  %v3452_v41 = vadd.f32 %v3444_v29, %v3435_v5  ;;  %v7542_v40 = vadd.f32 %v3294_v6, %v7396_v50  ;;  %v7545_v24 = vadd.f32 %v3295_v55, %v7409_v54 }
 0x502   : > { %4576 = vpow2.f32 %v3377_v33  ;;  %v3453_v49 = vadd.f32 %v3445_v9, %v3436_v3  ;;  %v4567_v46 = vpop.eup %4566  ;;  %v3439_v39 = vmul.f32 %v7432_v61, %v3420_v62  ;;  %v3440_v11 = vmul.f32 %v7432_v61, %v3421_v23 }
 0x503   : > { %4578 = vpow2.f32 %v3379_v47  ;;  %v3448_v15 = vmul.f32 %v7491_v18, %v3430_v30  ;;  %v4569_v44 = vpop.eup %4568  ;;  %v3391_v50 = vmul.f32 %v4565_v34, %v7428_v28  ;;  %v3441_v54 = vmul.f32 %v7432_v61, %v3422_v4 }
 0x504   : > { %v3442_v53 = vmul.f32 %v7432_v61, %v3423_v20  ;;  %v3454_v6 = vadd.f32 %v3446_v38, %v3437_v43  ;;  %v3449_v17 = vmul.f32 %v7491_v18, %v3431_v19  ;;  %v3450_v8 = vmul.f32 %v7491_v18, %v3432_v25 }
 0x505   : > { %v4571_v55 = vpop.eup %4570  ;;  %v3455_v35 = vadd.f32 %v3447_v10, %v3438_v60  ;;  %v3460_v58 = vsub.f32 %v8731_v63, %v3452_v41  ;;  %v7563_v29 = vadd.f32 %v4565_v34, %v7443_v14  ;;  %v3392_v33 = vmul.f32 %v4567_v46, %v7428_v28 }
 0x506   : > { %v4573_v5 = vpop.eup %4572  ;;  %v3451_v61 = vmul.f32 %v7491_v18, %v3433_v2  ;;  %v3461_v52 = vsub.f32 %v8732_v27, %v3453_v49  ;;  %v7573_v3 = vadd.f32 %v4567_v46, %v7446_v32  ;;  %v7576_v9 = vadd.f32 %v4569_v44, %v7452_v0 }
 0x507   : > { %v4575_v48 = vpop.eup %4574  ;;  %v3393_v14 = vmul.f32 %v4569_v44, %v7428_v28  ;;  %v3456_v47 = vadd.f32 %v3448_v15, %v3439_v39  ;;  %v7580_v23 = vadd.f32 %v4571_v55, %v7457_v26  ;;  %v3394_v18 = vmul.f32 %v4571_v55, %v7428_v28  ;;  %v3520_v55 = vld [vmem:[%s7616_s29 + $0x8] sm:$0xff] }
 0x508   : > { %v4577_v62 = vpop.eup %4576  ;;  %v7584_v30 = vadd.f32 %v3391_v50, %v7460_v7  ;;  %v3462_v32 = vsub.f32 %v8733_v51, %v3454_v6  ;;  %v3457_v43 = vadd.f32 %v3449_v17, %v3440_v11  ;;  %v3458_v38 = vadd.f32 %v3450_v8, %v3441_v54  ;;  %v3519_v11 = vld [vmem:[%s7616_s29] sm:$0xff] }
 0x509   : > { %v4579_v0 = vpop.eup %4578  ;;  %v3463_v34 = vsub.f32 %v8734_v57, %v3455_v35  ;;  %v3468_v4 = vmul.f32 1.442695, %v3460_v58  ;;  %v7591_v20 = vadd.f32 %v4573_v5, %v7466_v16  ;;  %v7594_v26 = vadd.f32 %v3392_v33, %v7470_v45  ;;  %v3530_v35 = vld [vmem:[%s7619_s30 + $0x8] sm:$0xff]  ;;  %v3531_v33 = vld [vmem:[%s7619_s30 + $0x10] sm:$0xff] }
 0x50a   : > { %v3459_v60 = vadd.f32 %v3451_v61, %v3442_v53  ;;  %v3470_v7 = vmul.f32 1.442695, %v3461_v52  ;;  %v7601_v10 = vadd.f32 %v4575_v48, %v7474_v36  ;;  %v3395_v41 = vmul.f32 %v4573_v5, %v7428_v28  ;;  %v3524_v5 = vld [vmem:[%s7616_s29 + $0x28] sm:$0xff] }
 0x50b   : > { %v7605_v19 = vadd.f32 %v3393_v14, %v7477_v13  ;;  %v3464_v25 = vsub.f32 %v8735_v21, %v3456_v47  ;;  %v3396_v16 = vmul.f32 %v4575_v48, %v7428_v28  ;;  %v3397_v45 = vmul.f32 %v4577_v62, %v7428_v28  ;;  %v3525_v47 = vld [vmem:[%s7616_s29 + $0x30] sm:$0xff] }
 0x50c   : > { %v3398_v49 = vmul.f32 %v4579_v0, %v7428_v28  ;;  %v3472_v46 = vmul.f32 1.442695, %v3462_v32  ;;  %v3465_v36 = vsub.f32 %v8736_v37, %v3457_v43  ;;  %v3466_v2 = vsub.f32 %v8737_v56, %v3458_v38  ;;  %v3529_v28 = vld [vmem:[%s7619_s30] sm:$0xff]  ;;  %v3532_v32 = vld [vmem:[%s7619_s30 + $0x18] sm:$0xff] }
 0x50d   : > { %4580 = vpow2.f32 %v3468_v4  ;;  %v3474_v13 = vmul.f32 1.442695, %v3463_v34  ;;  %v3467_v39 = vsub.f32 %v8738_v31, %v3459_v60  ;;  %v3537_v15 = vstv %s7560_s23  ;;  %v3533_v4 = vld [vmem:[%s7619_s30 + $0x20] sm:$0xff]  ;;  %s7829_s23 = sld [smem:[#allocation5 + %s3719_s19]] }
 0x50e   : > { %4582 = vpow2.f32 %v3470_v7  ;;  %v7624_v44 = vstv %s7570_s24  ;;  %v7628_v50 = vadd.f32 %v4577_v62, %v7503_v12  ;;  %v7631_v54 = vadd.f32 %v3394_v18, %v7497_v42  ;;  %v3521_v42 = vld [vmem:[%s7616_s29 + $0x10] sm:$0xff]  ;;  %v3526_v62 = vld [vmem:[%s7616_s29 + $0x38] sm:$0xff]  ;;  %s4247_s24 = sshll.u32 %s7787_s20, 6 }
 0x50f   : > { %v7634_v53 = vadd.f32 %v3395_v41, %v7520_v22  ;;  %v3476_v6 = vmul.f32 1.442695, %v3464_v25  ;;  %v7639_v17 = vadd.f32 %v4579_v0, %v7517_v1  ;;  %v7642_v8 = vadd.f32 %v3396_v16, %v7526_v59  ;;  %v3522_v22 = vld [vmem:[%s7616_s29 + $0x18] sm:$0xff]  ;;  %v3523_v1 = vld [vmem:[%s7616_s29 + $0x20] sm:$0xff]  ;;  %v3535_v16 = vld [vmem:[%s7619_s30 + $0x30] sm:$0xff]  ;;  %s7864_s26 = scalar_lea.vmem [#allocation2], %s4247_s24 }
 0x510   : > { %v7645_v12 = vadd.f32 %v3397_v45, %v7542_v40  ;;  %4584 = vpow2.f32 %v3472_v46  ;;  %v3478_v58 = vmul.f32 1.442695, %v3465_v36  ;;  %v3538_v59 = vmul.f32 %v3537_v15, %v3519_v11  ;;  %v3536_v45 = vld [vmem:[%s7619_s30 + $0x38] sm:$0xff]  ;;  %s7890_s29 = sld [smem:[#allocation3 + %s3822_s28]] }
 0x511   : > { %4586 = vpow2.f32 %v3474_v13  ;;  %v3547_v61 = vmul.f32 %v7624_v44, %v3529_v28  ;;  %v7662_v40 = vadd.f32 %v3398_v49, %v7545_v24  ;;  %v3480_v52 = vmul.f32 1.442695, %v3466_v2  ;;  %v3534_v24 = vld [vmem:[%s7619_s30 + $0x28] sm:$0xff]  ;;  %s7912_s30 = sld [smem:[#allocation5 + %s7842_s0]] }
 0x512   : > { %v3482_v48 = vmul.f32 1.442695, %v3467_v39  ;;  %v7665_v14 = vstv %s7614_s3  ;;  %4588 = vpow2.f32 %v3476_v6  ;;  %v3539_v0 = vmul.f32 %v3537_v15, %v3520_v55  ;;  %s3734_s3 = scalar_lea.vmem [#allocation2], %s4248_s25 }
 0x513   : > { %v4581_v18 = vpop.eup %4580  ;;  %v3540_v43 = vmul.f32 %v3537_v15, %v3521_v42  ;;  %v3548_v38 = vmul.f32 %v7624_v44, %v3530_v35  ;;  %v3541_v60 = vmul.f32 %v3537_v15, %v3522_v22  ;;  %v3542_v7 = vmul.f32 %v3537_v15, %v3523_v1 }
 0x514   : > { %v4583_v34 = vpop.eup %4582  ;;  %v3543_v41 = vmul.f32 %v3537_v15, %v3524_v5  ;;  %v3549_v25 = vmul.f32 %v7624_v44, %v3531_v33  ;;  %4590 = vpow2.f32 %v3478_v58  ;;  %v3544_v49 = vmul.f32 %v3537_v15, %v3525_v47 }
 0x515   : > { %v3545_v46 = vmul.f32 %v3537_v15, %v3526_v62  ;;  %v3555_v36 = vadd.f32 %v3547_v61, %v3538_v59  ;;  %4592 = vpow2.f32 %v3480_v52  ;;  %v3494_v13 = vmul.f32 %v4581_v18, %v7665_v14 }
 0x516   : > { %v4585_v2 = vpop.eup %4584  ;;  %v3550_v39 = vmul.f32 %v7624_v44, %v3532_v32  ;;  %v7678_v11 = vstv %s3595_s9  ;;  %v3495_v6 = vmul.f32 %v4583_v34, %v7665_v14  ;;  %v3551_v55 = vmul.f32 %v7624_v44, %v3533_v4  ;;  %s4251_s1 = sshll.u32 %s7890_s29, 6 }
 0x517   : > { %v4587_v28 = vpop.eup %4586  ;;  %v3552_v42 = vmul.f32 %v7624_v44, %v3534_v24  ;;  %v3556_v22 = vadd.f32 %v3548_v38, %v3539_v0  ;;  %4594 = vpow2.f32 %v3482_v48  ;;  %v3553_v15 = vmul.f32 %v7624_v44, %v3535_v16  ;;  %s7986_s9 = scalar_lea.vmem [#allocation2], %s4251_s1 }
 0x518   : > { %v3554_v35 = vmul.f32 %v7624_v44, %v3536_v45  ;;  %v3557_v58 = vadd.f32 %v3549_v25, %v3540_v43  ;;  %v4589_v1 = vpop.eup %4588  ;;  %v7693_v5 = vadd.f32 %v4581_v18, %v7563_v29  ;;  %v7696_v33 = vadd.f32 %v4583_v34, %v7573_v3 }
 0x519   : > { %v3496_v59 = vmul.f32 %v4585_v2, %v7665_v14  ;;  %v3563_v61 = vsub.f32 %v8731_v63, %v3555_v36  ;;  %v7701_v52 = vadd.f32 %v4585_v2, %v7576_v9  ;;  %v3497_v44 = vmul.f32 %v4587_v28, %v7665_v14 }
 0x51a   : > { %v7705_v48 = vadd.f32 %v3494_v13, %v7584_v30  ;;  %v3558_v47 = vadd.f32 %v3550_v39, %v3541_v60  ;;  %v4591_v29 = vpop.eup %4590  ;;  %v7710_v62 = vadd.f32 %v4587_v28, %v7580_v23  ;;  %v7713_v3 = vadd.f32 %v3495_v6, %v7594_v26  ;;  %v3623_v28 = vld [vmem:[%s7738_s14 + $0x8] sm:$0xff] }
 0x51b   : > { %v3559_v18 = vadd.f32 %v3551_v55, %v3542_v7  ;;  %v3564_v32 = vsub.f32 %v8732_v27, %v3556_v22  ;;  %v4593_v9 = vpop.eup %4592  ;;  %v7717_v0 = vadd.f32 %v4589_v1, %v7591_v20  ;;  %v3498_v30 = vmul.f32 %v4589_v1, %v7665_v14  ;;  %v3633_v6 = vld [vmem:[%s7741_s15 + $0x8] sm:$0xff]  ;;  %v3635_v1 = vld [vmem:[%s7741_s15 + $0x18] sm:$0xff] }
 0x51c   : > { %v3560_v43 = vadd.f32 %v3552_v42, %v3543_v41  ;;  %v3565_v38 = vsub.f32 %v8733_v51, %v3557_v58  ;;  %v7722_v34 = vadd.f32 %v4591_v29, %v7601_v10  ;;  %v7725_v23 = vadd.f32 %v3496_v59, %v7605_v19  ;;  %v3625_v58 = vld [vmem:[%s7738_s14 + $0x18] sm:$0xff] }
 0x51d   : > { %v3561_v26 = vadd.f32 %v3553_v15, %v3544_v49  ;;  %v3571_v4 = vmul.f32 1.442695, %v3563_v61  ;;  %v4595_v24 = vpop.eup %4594  ;;  %v3499_v60 = vmul.f32 %v4591_v29, %v7665_v14  ;;  %v7729_v20 = vadd.f32 %v3497_v44, %v7631_v54  ;;  %v3622_v54 = vld [vmem:[%s7738_s14] sm:$0xff]  ;;  %v3624_v15 = vld [vmem:[%s7738_s14 + $0x10] sm:$0xff] }
 0x51e   : > { %v3562_v7 = vadd.f32 %v3554_v35, %v3545_v46  ;;  %v3566_v41 = vsub.f32 %v8734_v57, %v3558_v47  ;;  %v7733_v25 = vadd.f32 %v4593_v9, %v7628_v50  ;;  %v3500_v10 = vmul.f32 %v4593_v9, %v7665_v14  ;;  %v3632_v50 = vld [vmem:[%s7741_s15] sm:$0xff]  ;;  %v3634_v35 = vld [vmem:[%s7741_s15 + $0x10] sm:$0xff]  ;;  %v3627_v9 = vld [vmem:[%s7738_s14 + $0x28] sm:$0xff] }
 0x51f   : > { %v3567_v19 = vsub.f32 %v8735_v21, %v3559_v18  ;;  %v3573_v16 = vmul.f32 1.442695, %v3564_v32  ;;  %v3568_v45 = vsub.f32 %v8736_v37, %v3560_v43  ;;  %v3575_v49 = vmul.f32 1.442695, %v3565_v38  ;;  %v3626_v61 = vld [vmem:[%s7738_s14 + $0x20] sm:$0xff] }
 0x520   : > { %v3640_v46 = vstv %s7684_s10  ;;  %v7746_v36 = vstv %s7690_s11  ;;  %v7749_v2 = vadd.f32 %v4595_v24, %v7639_v17  ;;  %v7752_v13 = vadd.f32 %v3498_v30, %v7634_v53  ;;  %v3636_v44 = vld [vmem:[%s7741_s15 + $0x20] sm:$0xff]  ;;  %s3716_s10 = sadd.s32 6, %s7265_s18  ;;  %s3904_s18 = scvt.s32.f32 %s3819_s12 }
 0x521   : > { %v3569_v39 = vsub.f32 %v8737_v56, %v3561_v26  ;;  %4596 = vpow2.f32 %v3571_v4  ;;  %v3501_v55 = vmul.f32 %v4595_v24, %v7665_v14  ;;  %v7759_v42 = vadd.f32 %v3499_v60, %v7642_v8  ;;  %v3628_v26 = vld [vmem:[%s7738_s14 + $0x30] sm:$0xff]  ;;  %v3629_v4 = vld [vmem:[%s7738_s14 + $0x38] sm:$0xff]  ;;  %s3801_s11 = scvt.s32.f32 %s3716_s10 }
 0x522   : > { %v3570_v17 = vsub.f32 %v8738_v31, %v3562_v7  ;;  %v3577_v22 = vmul.f32 1.442695, %v3566_v41  ;;  %4598 = vpow2.f32 %v3573_v16  ;;  %v3579_v53 = vmul.f32 1.442695, %v3567_v19  ;;  %v3637_v7 = vld [vmem:[%s7741_s15 + $0x28] sm:$0xff] }
 0x523   : > { %v3641_v14 = vmul.f32 %v3640_v46, %v3622_v54  ;;  %v3650_v59 = vmul.f32 %v7746_v36, %v3632_v50  ;;  %4600 = vpow2.f32 %v3575_v49  ;;  %v3581_v8 = vmul.f32 1.442695, %v3568_v45  ;;  %v3638_v45 = vld [vmem:[%s7741_s15 + $0x30] sm:$0xff] }
 0x524   : > { %v3642_v47 = vmul.f32 %v3640_v46, %v3623_v28  ;;  %v3651_v29 = vmul.f32 %v7746_v36, %v3633_v6  ;;  %v7778_v18 = vadd.f32 %v3500_v10, %v7645_v12  ;;  %v3583_v32 = vmul.f32 1.442695, %v3569_v39  ;;  %v3639_v39 = vld [vmem:[%s7741_s15 + $0x38] sm:$0xff] }
 0x525   : > { %v3643_v30 = vmul.f32 %v3640_v46, %v3624_v15  ;;  %v3652_v43 = vmul.f32 %v7746_v36, %v3634_v35  ;;  %4602 = vpow2.f32 %v3577_v22  ;;  %v3585_v38 = vmul.f32 1.442695, %v3570_v17 }
 0x526   : > { %v3644_v24 = vmul.f32 %v3640_v46, %v3625_v58  ;;  %v3653_v60 = vmul.f32 %v7746_v36, %v3635_v1  ;;  %4604 = vpow2.f32 %v3579_v53  ;;  %v3645_v41 = vmul.f32 %v3640_v46, %v3626_v61 }
 0x527   : > { %v4597_v12 = vpop.eup %4596  ;;  %v3654_v10 = vmul.f32 %v7746_v36, %v3636_v44  ;;  %v3658_v19 = vadd.f32 %v3650_v59, %v3641_v14  ;;  %v7792_v16 = vadd.f32 %v3501_v55, %v7662_v40  ;;  %4606 = vpow2.f32 %v3581_v8 }
 0x528   : > { %v3646_v49 = vmul.f32 %v3640_v46, %v3627_v9  ;;  %v3659_v54 = vadd.f32 %v3651_v29, %v3642_v47  ;;  %v4599_v50 = vpop.eup %4598  ;;  %4608 = vpow2.f32 %v3583_v32  ;;  %v3647_v28 = vmul.f32 %v3640_v46, %v3628_v26 }
 0x529   : > { %v3648_v6 = vmul.f32 %v3640_v46, %v3629_v4  ;;  %v3660_v17 = vadd.f32 %v3652_v43, %v3643_v30  ;;  %v4601_v22 = vpop.eup %4600  ;;  %4610 = vpow2.f32 %v3585_v38  ;;  %v3597_v15 = vmul.f32 %v4597_v12, %v7678_v11 }
 0x52a   : > { %v3655_v40 = vmul.f32 %v7746_v36, %v3637_v7  ;;  %v3661_v55 = vadd.f32 %v3653_v60, %v3644_v24  ;;  %v3656_v35 = vmul.f32 %v7746_v36, %v3638_v45  ;;  %v3662_v53 = vadd.f32 %v3654_v10, %v3645_v41 }
 0x52b   : > { %v3666_v58 = vsub.f32 %v8731_v63, %v3658_v19  ;;  %v7804_v1 = vstv %s3698_s21  ;;  %v4603_v14 = vpop.eup %4602  ;;  %v3598_v46 = vmul.f32 %v4599_v50, %v7678_v11  ;;  %v3657_v59 = vmul.f32 %v7746_v36, %v3639_v39 }
 0x52c   : > { %v3667_v8 = vsub.f32 %v8732_v27, %v3659_v54  ;;  %v7810_v61 = vstv %s7775_s17  ;;  %v4605_v44 = vpop.eup %4604  ;;  %v7813_v47 = vadd.f32 %v4597_v12, %v7693_v5  ;;  %v7816_v29 = vadd.f32 %v4599_v50, %v7696_v33 }
 0x52d   : > { %v3599_v32 = vmul.f32 %v4601_v22, %v7678_v11  ;;  %v3668_v9 = vsub.f32 %v8733_v51, %v3660_v17  ;;  %v4607_v30 = vpop.eup %4606  ;;  %v7821_v43 = vadd.f32 %v4601_v22, %v7701_v52  ;;  %v7824_v36 = vadd.f32 %v3597_v15, %v7705_v48  ;;  %v3726_v15 = vld [vmem:[%s7864_s26 + $0x8] sm:$0xff] }
 0x52e   : > { %v3663_v38 = vadd.f32 %v3655_v40, %v3646_v49  ;;  %v3669_v5 = vsub.f32 %v8734_v57, %v3661_v55  ;;  %v4609_v33 = vpop.eup %4608  ;;  %v7833_v26 = vadd.f32 %v4603_v14, %v7710_v62  ;;  %v3664_v4 = vadd.f32 %v3656_v35, %v3647_v28  ;;  %v3727_v40 = vld [vmem:[%s7864_s26 + $0x10] sm:$0xff]  ;;  %v3728_v55 = vld [vmem:[%s7864_s26 + $0x18] sm:$0xff] }
 0x52f   : > { %v3670_v52 = vsub.f32 %v8735_v21, %v3662_v53  ;;  %v3674_v24 = vmul.f32 1.442695, %v3666_v58  ;;  %v4611_v60 = vpop.eup %4610  ;;  %v3600_v48 = vmul.f32 %v4603_v14, %v7678_v11  ;;  %v7838_v12 = vadd.f32 %v3598_v46, %v7713_v3  ;;  %v3736_v53 = vld [vmem:[%s3734_s3 + $0x8] sm:$0xff] }
 0x530   : > { %v3665_v7 = vadd.f32 %v3657_v59, %v3648_v6  ;;  %v3676_v41 = vmul.f32 1.442695, %v3667_v8  ;;  %v7845_v10 = vadd.f32 %v4605_v44, %v7717_v0  ;;  %v3601_v62 = vmul.f32 %v4605_v44, %v7678_v11  ;;  %v3729_v59 = vld [vmem:[%s7864_s26 + $0x20] sm:$0xff]  ;;  %v3730_v8 = vld [vmem:[%s7864_s26 + $0x28] sm:$0xff]  ;;  %v3738_v44 = vld [vmem:[%s3734_s3 + $0x18] sm:$0xff] }
 0x531   : > { %v7849_v19 = vadd.f32 %v3599_v32, %v7725_v23  ;;  %v3678_v45 = vmul.f32 1.442695, %v3668_v9  ;;  %v3602_v49 = vmul.f32 %v4607_v30, %v7678_v11  ;;  %v3603_v3 = vmul.f32 %v4609_v33, %v7678_v11  ;;  %v3731_v9 = vld [vmem:[%s7864_s26 + $0x30] sm:$0xff] }
 0x532   : > { %v3671_v54 = vsub.f32 %v8736_v37, %v3663_v38  ;;  %v3680_v50 = vmul.f32 1.442695, %v3669_v5  ;;  %v3604_v39 = vmul.f32 %v4611_v60, %v7678_v11  ;;  %v3672_v28 = vsub.f32 %v8737_v56, %v3664_v4  ;;  %v3725_v11 = vld [vmem:[%s7864_s26] sm:$0xff]  ;;  %v3740_v38 = vld [vmem:[%s3734_s3 + $0x28] sm:$0xff] }
 0x533   : > { %4612 = vpow2.f32 %v3674_v24  ;;  %v3682_v0 = vmul.f32 1.442695, %v3670_v52  ;;  %v7858_v6 = vadd.f32 %v4607_v30, %v7722_v34  ;;  %v7861_v23 = vadd.f32 %v3600_v48, %v7729_v20  ;;  %v3739_v30 = vld [vmem:[%s3734_s3 + $0x20] sm:$0xff]  ;;  %v3732_v52 = vld [vmem:[%s7864_s26 + $0x38] sm:$0xff]  ;;  %v3741_v24 = vld [vmem:[%s3734_s3 + $0x30] sm:$0xff] }
 0x534   : > { %v3673_v17 = vsub.f32 %v8738_v31, %v3665_v7  ;;  %4614 = vpow2.f32 %v3676_v41  ;;  %v7868_v22 = vadd.f32 %v4609_v33, %v7733_v25  ;;  %v7871_v34 = vadd.f32 %v4611_v60, %v7749_v2  ;;  %v3735_v2 = vld [vmem:[%s3734_s3] sm:$0xff] }
 0x535   : > { %v7874_v20 = vadd.f32 %v3601_v62, %v7752_v13  ;;  %4616 = vpow2.f32 %v3678_v45  ;;  %v7883_v35 = vadd.f32 %v3602_v49, %v7759_v42  ;;  %v3684_v25 = vmul.f32 1.442695, %v3671_v54  ;;  %v3737_v13 = vld [vmem:[%s3734_s3 + $0x10] sm:$0xff] }
 0x536   : > { %4618 = vpow2.f32 %v3680_v50  ;;  %v3752_v58 = vstv %s7829_s23  ;;  %v7893_v14 = vadd.f32 %v3603_v3, %v7778_v18  ;;  %v7896_v46 = vadd.f32 %v3604_v39, %v7792_v16  ;;  %v3742_v16 = vld [vmem:[%s3734_s3 + $0x38] sm:$0xff] }
 0x537   : > { %4620 = vpow2.f32 %v3682_v0  ;;  %v3686_v42 = vmul.f32 1.442695, %v3672_v28  ;;  %v3688_v32 = vmul.f32 1.442695, %v3673_v17  ;;  %v3744_v5 = vmul.f32 %v7810_v61, %v3725_v11 }
 0x538   : > { %v3745_v33 = vmul.f32 %v7810_v61, %v3726_v15  ;;  %v3746_v4 = vmul.f32 %v7810_v61, %v3727_v40  ;;  %v3747_v60 = vmul.f32 %v7810_v61, %v3728_v55  ;;  %v3753_v48 = vmul.f32 %v3752_v58, %v3735_v2 }
 0x539   : > { %v4613_v18 = vpop.eup %4612  ;;  %v3754_v7 = vmul.f32 %v3752_v58, %v3736_v53  ;;  %v3755_v41 = vmul.f32 %v3752_v58, %v3737_v13  ;;  %4622 = vpow2.f32 %v3684_v25  ;;  %v3748_v45 = vmul.f32 %v7810_v61, %v3729_v59 }
 0x53a   : > { %v4615_v62 = vpop.eup %4614  ;;  %v3749_v49 = vmul.f32 %v7810_v61, %v3730_v8  ;;  %v3756_v3 = vmul.f32 %v3752_v58, %v3738_v44  ;;  %4624 = vpow2.f32 %v3686_v42  ;;  %v3750_v50 = vmul.f32 %v7810_v61, %v3731_v9 }
 0x53b   : > { %v4617_v54 = vpop.eup %4616  ;;  %v3757_v39 = vmul.f32 %v3752_v58, %v3739_v30  ;;  %v3758_v28 = vmul.f32 %v3752_v58, %v3740_v38  ;;  %v3700_v17 = vmul.f32 %v4613_v18, %v7804_v1  ;;  %v3751_v11 = vmul.f32 %v7810_v61, %v3732_v52 }
 0x53c   : > { %v4619_v0 = vpop.eup %4618  ;;  %v3759_v15 = vmul.f32 %v3752_v58, %v3741_v24  ;;  %v3760_v40 = vmul.f32 %v3752_v58, %v3742_v16  ;;  %v3701_v25 = vmul.f32 %v4615_v62, %v7804_v1  ;;  %v3761_v2 = vadd.f32 %v3753_v48, %v3744_v5 }
 0x53d   : > { %v4621_v55 = vpop.eup %4620  ;;  %v3762_v53 = vadd.f32 %v3754_v7, %v3745_v33  ;;  %v3763_v13 = vadd.f32 %v3755_v41, %v3746_v4  ;;  %4626 = vpow2.f32 %v3688_v32  ;;  %v7921_v42 = vadd.f32 %v4613_v18, %v7813_v47 }
 0x53e   : > { %v3702_v61 = vmul.f32 %v4617_v54, %v7804_v1  ;;  %v3764_v59 = vadd.f32 %v3756_v3, %v3747_v60  ;;  %v7926_v58 = vadd.f32 %v4615_v62, %v7816_v29  ;;  %v3703_v8 = vmul.f32 %v4619_v0, %v7804_v1  ;;  %v3830_v62 = vld [vmem:[%s7969_s8 + $0x10] sm:$0xff] }
 0x53f   : > { %v7929_v44 = vadd.f32 %v3757_v39, %v3748_v45  ;;  %v7931_v9 = vadd.f32 %v3758_v28, %v3749_v49  ;;  %v4623_v30 = vpop.eup %4622  ;;  %v7934_v38 = vadd.f32 %v4617_v54, %v7821_v43  ;;  %v3704_v47 = vmul.f32 %v4621_v55, %v7804_v1  ;;  %v3831_v45 = vld [vmem:[%s7969_s8 + $0x18] sm:$0xff]  ;;  %v3838_v49 = vld [vmem:[%s7986_s9] sm:$0xff]  ;;  %v3839_v39 = vld [vmem:[%s7986_s9 + $0x8] sm:$0xff] }
 0x540   : > { %v7938_v32 = vadd.f32 %v3700_v17, %v7824_v36  ;;  %v7940_v5 = vadd.f32 %v3759_v15, %v3750_v50  ;;  %v4625_v33 = vpop.eup %4624  ;;  %v7943_v29 = vadd.f32 %v4619_v0, %v7833_v26  ;;  %v7946_v4 = vadd.f32 %v3701_v25, %v7838_v12  ;;  %v3832_v50 = vld [vmem:[%s7969_s8 + $0x20] sm:$0xff]  ;;  %v3840_v28 = vld [vmem:[%s7986_s9 + $0x10] sm:$0xff] }
 0x541   : > { %v7948_v18 = vadd.f32 %v3760_v40, %v3751_v11  ;;  %v3769_v52 = vsub.f32 %v8731_v63, %v3761_v2  ;;  %v7952_v43 = vadd.f32 %v4621_v55, %v7845_v10  ;;  %v7955_v24 = vadd.f32 %v4623_v30, %v7858_v6  ;;  %v3829_v6 = vld [vmem:[%s7969_s8 + $0x8] sm:$0xff]  ;;  %v3841_v40 = vld [vmem:[%s7986_s9 + $0x18] sm:$0xff]  ;;  %v3842_v55 = vld [vmem:[%s7986_s9 + $0x20] sm:$0xff] }
 0x542   : > { %v7958_v36 = vadd.f32 %v3702_v61, %v7849_v19  ;;  %v3770_v26 = vsub.f32 %v8732_v27, %v3762_v53  ;;  %v7962_v12 = vmul.f32 %v4623_v30, %v7804_v1  ;;  %v7965_v16 = vadd.f32 %v3703_v8, %v7861_v23  ;;  %v3828_v19 = vld [vmem:[%s7969_s8] sm:$0xff]  ;;  %v3833_v53 = vld [vmem:[%s7969_s8 + $0x28] sm:$0xff]  ;;  %v3834_v8 = vld [vmem:[%s7969_s8 + $0x30] sm:$0xff] }
 0x543   : > { %8747 = vst [vmem:[#allocation99_spill] sm:$0xff] %v7955_v24  ;;  %v3771_v60 = vsub.f32 %v8733_v51, %v3763_v13  ;;  %v3772_v10 = vsub.f32 %v8734_v57, %v3764_v59  ;;  %v4627_v48 = vpop.eup %4626  ;;  %v7974_v7 = vadd.f32 %v4625_v33, %v7868_v22  ;;  %v7977_v23 = vmul.f32 %v4625_v33, %v7804_v1  ;;  %v3843_v13 = vld [vmem:[%s7986_s9 + $0x28] sm:$0xff]  ;;  %v3835_v33 = vld [vmem:[%s7969_s8 + $0x38] sm:$0xff] }
 0x544   : > { %8748 = vst [vmem:[#allocation100_spill] sm:$0xff] %v7958_v36  ;;  %v7980_v41 = vadd.f32 %v3704_v47, %v7874_v20  ;;  %v3846_v3 = vstv %s7912_s30  ;;  %v7991_v22 = vadd.f32 %v4627_v48, %v7871_v34  ;;  %v3773_v20 = vsub.f32 %v8735_v21, %v7929_v44  ;;  %v3844_v44 = vld [vmem:[%s7986_s9 + $0x30] sm:$0xff] }
 0x545   : > { %8749 = vst [vmem:[#allocation101_spill] sm:$0xff] %v7965_v16  ;;  %v3774_v54 = vsub.f32 %v8736_v37, %v7931_v9  ;;  %v3855_v0 = vstv %s7917_s4  ;;  %v3775_v17 = vsub.f32 %v8737_v56, %v7940_v5  ;;  %v3776_v34 = vsub.f32 %v8738_v31, %v7948_v18  ;;  %v3845_v18 = vld [vmem:[%s7986_s9 + $0x38] sm:$0xff] }
 0x546   : > { %8750 = vst [vmem:[#allocation102_spill] sm:$0xff] %v7974_v7  ;;  %v3777_v11 = vmul.f32 1.442695, %v3769_v52  ;;  %v3779_v15 = vmul.f32 1.442695, %v3770_v26  ;;  %v3847_v61 = vmul.f32 %v3846_v3, %v3828_v19  ;;  %v3856_v59 = vmul.f32 %v3855_v0, %v3838_v49 }
 0x547   : > { %8751 = vst [vmem:[#allocation103_spill] sm:$0xff] %v7980_v41  ;;  %v3781_v25 = vmul.f32 1.442695, %v3771_v60  ;;  %v3783_v2 = vmul.f32 1.442695, %v3772_v10  ;;  %v3848_v9 = vmul.f32 %v3846_v3, %v3829_v6  ;;  %v3849_v30 = vmul.f32 %v3846_v3, %v3830_v62 }
 0x548   : > { %8752 = vst [vmem:[#allocation104_spill] sm:$0xff] %v7991_v22  ;;  %v3850_v47 = vmul.f32 %v3846_v3, %v3831_v45  ;;  %v3857_v5 = vmul.f32 %v3855_v0, %v3839_v39  ;;  %v3851_v52 = vmul.f32 %v3846_v3, %v3832_v50  ;;  %v3858_v26 = vmul.f32 %v3855_v0, %v3840_v28 }
 0x549   : > { %v3859_v22 = vmul.f32 %v3855_v0, %v3841_v40  ;;  %v3860_v41 = vmul.f32 %v3855_v0, %v3842_v55  ;;  %v3785_v16 = vmul.f32 1.442695, %v3773_v20  ;;  %v3787_v60 = vmul.f32 1.442695, %v3774_v54 }
 0x54a   : > { %v3852_v10 = vmul.f32 %v3846_v3, %v3833_v53  ;;  %v3861_v7 = vmul.f32 %v3855_v0, %v3843_v13  ;;  %4628 = vpow2.f32 %v3777_v11  ;;  %v3853_v19 = vmul.f32 %v3846_v3, %v3834_v8 }
 0x54b   : > { %v3862_v49 = vmul.f32 %v3855_v0, %v3844_v44  ;;  %v3864_v36 = vadd.f32 %v3856_v59, %v3847_v61  ;;  %4630 = vpow2.f32 %v3779_v15  ;;  %v3854_v6 = vmul.f32 %v3846_v3, %v3835_v33 }
 0x54c   : > { %v3863_v62 = vmul.f32 %v3855_v0, %v3845_v18  ;;  %v3865_v45 = vadd.f32 %v3857_v5, %v3848_v9  ;;  %4632 = vpow2.f32 %v3781_v25  ;;  %v3866_v39 = vadd.f32 %v3858_v26, %v3849_v30 }
 0x54d   : > { %v3867_v24 = vadd.f32 %v3859_v22, %v3850_v47  ;;  %v3868_v50 = vadd.f32 %v3860_v41, %v3851_v52  ;;  %v3707_v28 = vmul.f32 %v4627_v48, %v7804_v1  ;;  %4634 = vpow2.f32 %v3783_v2 }
 0x54e   : > { %v3789_v20 = vmul.f32 1.442695, %v3775_v17  ;;  %v3869_v54 = vadd.f32 %v3861_v7, %v3852_v10  ;;  %v8017_v11 = vadd.f32 %v7962_v12, %v7883_v35  ;;  %v8019_v40 = vstv %s3801_s11 }
 0x54f   : > { %v3870_v15 = vadd.f32 %v3862_v49, %v3853_v19  ;;  %v3872_v3 = vsub.f32 %v8731_v63, %v3864_v36  ;;  %4636 = vpow2.f32 %v3785_v16  ;;  %v3791_v0 = vmul.f32 1.442695, %v3776_v34 }
 0x550   : > { %v3871_v55 = vadd.f32 %v3863_v62, %v3854_v6  ;;  %v3873_v41 = vsub.f32 %v8732_v27, %v3865_v45  ;;  %v4629_v22 = vpop.eup %4628  ;;  %4638 = vpow2.f32 %v3787_v60  ;;  %v3874_v1 = vsub.f32 %v8733_v51, %v3866_v39  ;;  %v8753_v6 = vld [vmem:[#allocation99_spill] sm:$0xff]  ;;  %v8754_v45 = vld [vmem:[#allocation100_spill] sm:$0xff] }
 0x551   : > { %v3875_v48 = vsub.f32 %v8734_v57, %v3867_v24  ;;  %v3876_v35 = vsub.f32 %v8735_v21, %v3868_v50  ;;  %v4631_v12 = vpop.eup %4630  ;;  %v8028_v7 = vadd.f32 %v7977_v23, %v7893_v14  ;;  %v8031_v36 = vadd.f32 %v3707_v28, %v7896_v46 }
 0x552   : > { %4640 = vpow2.f32 %v3789_v20  ;;  %v3877_v16 = vsub.f32 %v8736_v37, %v3869_v54  ;;  %v4633_v17 = vpop.eup %4632  ;;  %v3878_v34 = vsub.f32 %v8737_v56, %v3870_v15  ;;  %v3880_v25 = vmul.f32 1.442695, %v3872_v3  ;;  %v8756_v20 = vld [vmem:[#allocation101_spill] sm:$0xff] }
 0x553   : > { %v3882_v2 = vmul.f32 1.442695, %v3873_v41  ;;  %v3884_v24 = vmul.f32 1.442695, %v3874_v1  ;;  %v4635_v53 = vpop.eup %4634  ;;  %4642 = vpow2.f32 %v3791_v0  ;;  %v3803_v13 = vmul.f32 %v4629_v22, %v8019_v40  ;;  %v8757_v41 = vld [vmem:[#allocation103_spill] sm:$0xff] }
 0x554   : > { %v3879_v14 = vsub.f32 %v8738_v31, %v3871_v55  ;;  %v3886_v23 = vmul.f32 1.442695, %v3875_v48  ;;  %v3793_v46 = vadd.f32 %v4629_v22, %v7921_v42  ;;  %v3804_v61 = vmul.f32 %v4631_v12, %v8019_v40 }
 0x555   : > { %4644 = vpow2.f32 %v3880_v25  ;;  %v3888_v59 = vmul.f32 1.442695, %v3876_v35  ;;  %v4637_v8 = vpop.eup %4636  ;;  %v3794_v44 = vadd.f32 %v4631_v12, %v7926_v58  ;;  %v3805_v9 = vmul.f32 %v4633_v17, %v8019_v40  ;;  %v8758_v12 = vld [vmem:[#allocation104_spill] sm:$0xff] }
 0x556   : > { %4646 = vpow2.f32 %v3882_v2  ;;  %v3890_v30 = vmul.f32 1.442695, %v3877_v16  ;;  %v4639_v47 = vpop.eup %4638  ;;  %v3795_v5 = vadd.f32 %v4633_v17, %v7934_v38  ;;  %v3806_v33 = vmul.f32 %v4635_v53, %v8019_v40 }
 0x557   : > { %4648 = vpow2.f32 %v3884_v24  ;;  %v3892_v18 = vmul.f32 1.442695, %v3878_v34  ;;  %v3796_v52 = vadd.f32 %v4635_v53, %v7943_v29  ;;  %v3811_v26 = vadd.f32 %v3803_v13, %v7938_v32  ;;  %v8755_v29 = vld [vmem:[#allocation102_spill] sm:$0xff] }
 0x558   : > { %v4641_v42 = vpop.eup %4640  ;;  %4650 = vpow2.f32 %v3886_v23  ;;  %v3894_v60 = vmul.f32 1.442695, %v3879_v14  ;;  %v3807_v58 = vmul.f32 %v4637_v8, %v8019_v40  ;;  %v3812_v10 = vadd.f32 %v3804_v61, %v7946_v4 }
 0x559   : > { %4652 = vpow2.f32 %v3888_v59  ;;  %v3905_v19 = vstv %s3904_s18  ;;  %v4643_v49 = vpop.eup %4642  ;;  %v3797_v38 = vadd.f32 %v4637_v8, %v7952_v43  ;;  %v3798_v62 = vadd.f32 %v4639_v47, %v8753_v6 }
 0x55a   : > { %v3813_v39 = vadd.f32 %v3805_v9, %v8754_v45  ;;  %4654 = vpow2.f32 %v3890_v30  ;;  %v3799_v28 = vadd.f32 %v4641_v42, %v8755_v29  ;;  %v3808_v32 = vmul.f32 %v4639_v47, %v8019_v40 }
 0x55b   : > { %v4645_v50 = vpop.eup %4644  ;;  %v3814_v54 = vadd.f32 %v3806_v33, %v8756_v20  ;;  %4656 = vpow2.f32 %v3892_v18  ;;  %v3809_v4 = vmul.f32 %v4641_v42, %v8019_v40  ;;  %v3810_v55 = vmul.f32 %v4643_v49, %v8019_v40 }
 0x55c   : > { %v4647_v15 = vpop.eup %4646  ;;  %4658 = vpow2.f32 %v3894_v60  ;;  %v8055_v3 = vadd.f32 %v4645_v50, %v3793_v46   ;;  %v3906_v43 = vmul.f32 %v4645_v50, %v3905_v19  ;;  %v3815_v22 = vadd.f32 %v3807_v58, %v8757_v41 }
 0x55d   : > { %v4649_v0 = vpop.eup %4648  ;;  %v8059_v1 = vadd.f32 %v4647_v15, %v3794_v44   ;;  %v3907_v48 = vmul.f32 %v4647_v15, %v3905_v19  ;;  %v3800_v16 = vadd.f32 %v4643_v49, %v8758_v12  ;;  %v3816_v24 = vadd.f32 %v3808_v32, %v8017_v11 }
 0x55e   : > { %v4651_v35 = vpop.eup %4650  ;;  %v8062_v17 = vadd.f32 %v4649_v0, %v3795_v5   ;;  %v3908_v34 = vmul.f32 %v4649_v0, %v3905_v19  ;;  %v8064_v30 = vadd.f32 %v3906_v43, %v3811_v26   ;;  %v3817_v14 = vadd.f32 %v3809_v4, %v8028_v7 }
 0x55f   : > { %v4653_v2 = vpop.eup %4652  ;;  %v8067_v53 = vadd.f32 %v4651_v35, %v3796_v52   ;;  %v3909_v13 = vmul.f32 %v4651_v35, %v3905_v19  ;;  %v8069_v18 = vadd.f32 %v3907_v48, %v3812_v10   ;;  %v3818_v9 = vadd.f32 %v3810_v55, %v8031_v36 }
 0x560   : > { %v8759_v25 = vmov %v8064_v30  ;;  %v4655_v40 = vpop.eup %4654  ;;  %v8072_v23 = vadd.f32 %v4653_v2, %v3797_v38   ;;  %v3910_v61 = vmul.f32 %v4653_v2, %v3905_v19  ;;  %v8074_v8 = vadd.f32 %v3908_v34, %v3813_v39  }
 0x561   : > { %v8760_v46 = vmov %v8069_v18  ;;  %v4657_v44 = vpop.eup %4656  ;;  %v8077_v30 = vadd.f32 %v4655_v40, %v3798_v62   ;;  %v3911_v5 = vmul.f32 %v4655_v40, %v3905_v19  ;;  %v8079_v11 = vadd.f32 %v3909_v13, %v3814_v54  }
 0x562   : > { %v8761_v59 = vmov %v8072_v23  ;;  %v4659_v33 = vpop.eup %4658  ;;  %v8081_v60 = vadd.f32 %v4657_v44, %v3799_v28   ;;  %v3912_v18 = vmul.f32 %v4657_v44, %v3905_v19  ;;  %v8083_v61 = vadd.f32 %v3910_v61, %v3815_v22  }
 0x563   : > { %v8762_v47 = vmov %v8077_v30  ;;  %v8085_v58 = vadd.f32 %v4659_v33, %v3800_v16   ;;  %v3913_v26 = vmul.f32 %v4659_v33, %v3905_v19  ;;  %v8087_v10 = vadd.f32 %v3911_v5, %v3816_v24  }
 0x564   : > { %v8763_v42 = vmov %v8081_v60  ;;  %v8764_v52 = vmov %v8083_v61  ;;  %v8089_v54 = vadd.f32 %v3912_v18, %v3817_v14   ;;  %v8774_v28 = vmov %v8079_v11 }
 0x565   : > { %v8765_v7 = vmov %v8085_v58  ;;  %v8766_v49 = vmov %v8087_v10  ;;  %v8091_v23 = vadd.f32 %v3913_v26, %v3818_v9   ;;  %v8773_v61 = vmov %v8764_v52  ;;  %3080 = sbr.rel (!%p8094_p1) target bundleno = 1219 (0x4c3), region = 105 }
 0x566   : > { %v8767_v38 = vmov %v8089_v54  ;;  %v8772_v14 = vmov %v8766_v49  ;;  %v8775_v24 = vmov %v8074_v8  ;;  %v8776_v18 = vmov %v8760_v46 }
 0x567   : > { %v8768_v36 = vmov %v8091_v23  ;;  %v8771_v54 = vmov %v8767_v38  ;;  %v8777_v30 = vmov %v8759_v25  ;;  %v8778_v58 = vmov %v8765_v7 }
 0x568   : > { %v8770_v23 = vmov %v8768_v36  ;;  %v8779_v60 = vmov %v8763_v42  ;;  %v8780_v13 = vmov %v8762_v47  ;;  %v8781_v40 = vmov %v8761_v59 }
 0x569   : > { %v8782_v19 = vmov %v8067_v53  ;;  %v8783_v0 = vmov %v8062_v17  ;;  %v8784_v10 = vmov %v8059_v1  ;;  %v8785_v32 = vmov %v8055_v3 }
 0x56a   :  { %4660 = vrcp.f32 %v8055_v3  ;;  %v3931_v6 = vand.u32 2147483647, %v8055_v3  ;;  %v3933_v62 = vand.u32 2147483648, %v8055_v3  ;;  %v3946_v45 = vand.u32 2147483647, %v8059_v1 }
 0x56b   :  { %4662 = vrcp.f32 %v8059_v1  ;;  %v3948_v39 = vand.u32 2147483648, %v8059_v1  ;;  %v3961_v50 = vand.u32 2147483647, %v8062_v17  ;;  %v3963_v29 = vand.u32 2147483648, %v8062_v17 }
 0x56c   :  { %4664 = vrcp.f32 %v8062_v17  ;;  %vm3927_vm3 = vweird.f32 %v8055_v3  ;;  %vm3942_vm4 = vweird.f32 %v8059_v1  ;;  %v3978_v63 = vand.u32 2147483648, %v8067_v53 }
 0x56d   :  { %4666 = vrcp.f32 %v8067_v53  ;;  %vm8163_vm5 = vcmp.eq.f32.partialorder %v3931_v6, 8.507059e+37  ;;  %v3934_v51 = vor.u32 1.1754944e-38, %v3933_v62  ;;  %vm3957_vm6 = vweird.f32 %v8062_v17 }
 0x56e   :  { %v3976_v57 = vand.u32 2147483647, %v8067_v53  ;;  %4668 = vrcp.f32 %v8761_v59  ;;  %vm8170_vm7 = vcmp.eq.f32.partialorder %v3946_v45, 8.507059e+37  ;;  %v3949_v56 = vor.u32 1.1754944e-38, %v3948_v39 }
 0x56f   :  { %vm3972_vm8 = vweird.f32 %v8067_v53  ;;  %v3991_v31 = vand.u32 2147483647, %v8761_v59  ;;  %v3993_v60 = vand.u32 2147483648, %v8761_v59  ;;  %vm8178_vm9 = vcmp.eq.f32.partialorder %v3961_v50, 8.507059e+37 }
 0x570   :  { %v4661_v21 = vpop.eup %4660  ;;  %v3964_v32 = vor.u32 1.1754944e-38, %v3963_v29  ;;  %4670 = vrcp.f32 %v8762_v47  ;;  %v3979_v15 = vor.u32 1.1754944e-38, %v3978_v63  ;;  %vm8187_vm14 = vcmp.eq.f32.partialorder %v3976_v57, 8.507059e+37 }
 0x571   :  { %v4663_v58 = vpop.eup %4662  ;;  %v3923_v19 = vmul.f32 %v4661_v21, %v8055_v3  ;;  %vm3928_vm11 = vweird.f32 %v4661_v21  ;;  %v4006_v55 = vand.u32 2147483647, %v8762_v47  ;;  %vm8192_vm15 = vcmp.eq.f32.partialorder %v3991_v31, 8.507059e+37 }
 0x572   :  { %v4665_v20 = vpop.eup %4664  ;;  %v3938_v54 = vmul.f32 %v4663_v58, %v8059_v1  ;;  %vm3943_vm13 = vweird.f32 %v4663_v58  ;;  %v3994_v35 = vor.u32 1.1754944e-38, %v3993_v60  ;;  %v4008_v12 = vand.u32 2147483648, %v8762_v47  ;;  %vm8202_vm1 = vmor %vm3927_vm3, %vm3928_vm11 }
 0x573   :  { %v3924_v4 = vsub.f32 1.0, %v3923_v19  ;;  %v3953_v43 = vmul.f32 %v4665_v20, %v8062_v17  ;;  %v4667_v41 = vpop.eup %4666  ;;  %4672 = vrcp.f32 %v8763_v42  ;;  %vm3958_vm0 = vweird.f32 %v4665_v20  ;;  %vm8210_vm10 = vmor %vm3942_vm4, %vm3943_vm13 }
 0x574   :  { %v3939_v22 = vsub.f32 1.0, %v3938_v54  ;;  %v4669_v16 = vpop.eup %4668  ;;  %v3968_v24 = vmul.f32 %v4667_v41, %v8067_v53  ;;  %vm3973_vm12 = vweird.f32 %v4667_v41  ;;  %vm8214_vm3 = vcmp.eq.f32.partialorder %v4006_v55, 8.507059e+37  ;;  %vm8222_vm2 = vmor %vm3957_vm6, %vm3958_vm0 }
 0x575   :  { %v3925_v34 = vmul.f32 %v4661_v21, %v3924_v4  ;;  %v3954_v2 = vsub.f32 1.0, %v3953_v43  ;;  %v3983_v14 = vmul.f32 %v4669_v16, %v8761_v59  ;;  %vm4017_vm11 = vweird.f32 %v8763_v42  ;;  %vm8236_vm6 = vmor %vm3972_vm8, %vm3973_vm12 }
 0x576   :  { %v3940_v40 = vmul.f32 %v4663_v58, %v3939_v22  ;;  %v4671_v23 = vpop.eup %4670  ;;  %v3969_v3 = vsub.f32 1.0, %v3968_v24  ;;  %v4009_v26 = vor.u32 1.1754944e-38, %v4008_v12  ;;  %vm8810_vm8 = vcmask 261120  }
 0x577   :  { %v3926_v61 = vadd.f32 %v4661_v21, %v3925_v34  ;;  %v3955_v9 = vmul.f32 %v4665_v20, %v3954_v2  ;;  %v3984_v1 = vsub.f32 1.0, %v3983_v14  ;;  %v3998_v18 = vmul.f32 %v4671_v23, %v8762_v47  ;;  %vm8815_vm0 = vmmov %vm8810_vm8 }
 0x578   :  { %v3941_v5 = vadd.f32 %v4663_v58, %v3940_v40  ;;  %v3970_v62 = vmul.f32 %v4667_v41, %v3969_v3  ;;  %vm4003_vm4 = vweird.f32 %v4671_v23  ;;  %v4021_v19 = vand.u32 2147483647, %v8763_v42 }
 0x579   :  { %v3930_v10 = vsel %vm8202_vm1, %v4661_v21, %v3926_v61  ;;  %v3956_v6 = vadd.f32 %v4665_v20, %v3955_v9  ;;  %v4673_v45 = vpop.eup %4672  ;;  %v3985_v29 = vmul.f32 %v4669_v16, %v3984_v1  ;;  %v3999_v63 = vsub.f32 1.0, %v3998_v18 }
 0x57a   :  { %v3935_v39 = vsel %vm8163_vm5, %v3934_v51, %v3930_v10  ;;  %v3945_v17 = vsel %vm8210_vm10, %v4663_v58, %v3941_v5  ;;  %v3971_v51 = vadd.f32 %v4667_v41, %v3970_v62  ;;  %vm8806_vm5 = vweird.f32 %v4669_v16 }
 0x57b   :  { %v3936_v57 = vmul.f32 %v3935_v39, %v8759_v25  ;;  %v3950_v21 = vsel %vm8170_vm7, %v3949_v56, %v3945_v17  ;;  %v3960_v27 = vsel %vm8222_vm2, %v4665_v20, %v3956_v6  ;;  %vm8807_vm10 = vweird.f32 %v8761_v59 }
 0x57c   :  { %vm8248_vm13 = vmor %vm8807_vm10, %vm8806_vm5  ;;  %v3951_v31 = vmul.f32 %v3950_v21, %v8760_v46  ;;  %v3965_v60 = vsel %vm8178_vm9, %v3964_v32, %v3960_v27  ;;  %v3986_v25 = vadd.f32 %v4669_v16, %v3985_v29  ;;  %v4000_v58 = vmul.f32 %v4671_v23, %v3999_v63 }
 0x57d   :  { %4042 = vst.msk [vmem:[%s8327_s5] sm:$0xff] %vm8810_vm8, %v3936_v57  ;;  %v3966_v37 = vmul.f32 %v3965_v60, %v8074_v8  ;;  %v3975_v59 = vsel %vm8236_vm6, %v4667_v41, %v3971_v51  ;;  %vm8811_vm2 = vweird.f32 %v8762_v47  ;;  %v4013_v56 = vmul.f32 %v4673_v45, %v8763_v42  ;;  %vm8814_vm9 = vmmov %vm8810_vm8 }
 0x57e   :  { %vm8265_vm7 = vmor %vm8811_vm2, %vm4003_vm4  ;;  %4043 = vst.msk [vmem:[%s8327_s5 + $0x8] sm:$0xff] %vm8814_vm9, %v3951_v31  ;;  %v3980_v8 = vsel %vm8187_vm14, %v3979_v15, %v3975_v59  ;;  %v3990_v28 = vsel %vm8248_vm13, %v4669_v16, %v3986_v25  ;;  %v4001_v47 = vadd.f32 %v4671_v23, %v4000_v58  ;;  %vm4018_vm12 = vweird.f32 %v4673_v45 }
 0x57f   :  { %4044 = vst.msk [vmem:[%s8327_s5 + $0x10] sm:$0xff] %vm8815_vm0, %v3966_v37  ;;  %v3981_v32 = vmul.f32 %v3980_v8, %v8079_v11  ;;  %v3995_v20 = vsel %vm8192_vm15, %v3994_v35, %v3990_v28  ;;  %v4014_v54 = vsub.f32 1.0, %v4013_v56  ;;  %v4023_v4 = vand.u32 2147483648, %v8763_v42  ;;  %vm8816_vm14 = vmmov %vm8815_vm0 }
 0x580   :  { %v3996_v15 = vmul.f32 %v3995_v20, %v8764_v52  ;;  %v4005_v43 = vsel %vm8265_vm7, %v4671_v23, %v4001_v47  ;;  %4674 = vrcp.f32 %v8765_v7  ;;  %vm8817_vm15 = vmmov %vm8815_vm0  ;;  %vm4022_vm4 = vcmp.eq.f32.partialorder %v4021_v19, 8.507059e+37 }
 0x581   :  { %4045 = vst.msk [vmem:[%s8327_s5 + $0x18] sm:$0xff] %vm8816_vm14, %v3981_v32  ;;  %v4010_v11 = vsel %vm8214_vm3, %v4009_v26, %v4005_v43  ;;  %v4015_v0 = vmul.f32 %v4673_v45, %v4014_v54  ;;  %vm4019_vm1 = vmor %vm4017_vm11, %vm4018_vm12  ;;  %v4024_v55 = vor.u32 1.1754944e-38, %v4023_v4  ;;  %vm4032_vm11 = vweird.f32 %v8765_v7 }
 0x582   :  { %4046 = vst.msk [vmem:[%s8327_s5 + $0x20] sm:$0xff] %vm8817_vm15, %v3996_v15  ;;  %v4011_v52 = vmul.f32 %v4010_v11, %v8766_v49  ;;  %vm8818_vm6 = vmmov %vm8815_vm0  ;;  %v4038_v49 = vand.u32 2147483648, %v8765_v7  ;;  %v4036_v34 = vand.u32 2147483647, %v8765_v7 }
 0x583   :  { %v4016_v41 = vadd.f32 %v4673_v45, %v4015_v0  ;;  %vm8819_vm3 = vmmov %vm8815_vm0 }
 0x584   :  { %4047 = vst.msk [vmem:[%s8327_s5 + $0x28] sm:$0xff] %vm8818_vm6, %v4011_v52  ;;  %v4039_v24 = vor.u32 1.1754944e-38, %v4038_v49  ;;  %vm4037_vm13 = vcmp.eq.f32.partialorder %v4036_v34, 8.507059e+37  ;;  %vm8820_vm8 = vmmov %vm8815_vm0 }
 0x585   :  { %v4020_v22 = vsel %vm4019_vm1, %v4673_v45, %v4016_v41 }
 0x586   :  { %v4675_v48 = vpop.eup %4674  ;;  %v4025_v35 = vsel %vm4022_vm4, %v4024_v55, %v4020_v22 }
 0x587   :  { %v4026_v12 = vmul.f32 %v4025_v35, %v8767_v38  ;;  %v4028_v16 = vmul.f32 %v4675_v48, %v8765_v7  ;;  %vm4033_vm5 = vweird.f32 %v4675_v48 }
 0x588   :  { %vm4034_vm10 = vmor %vm4032_vm11, %vm4033_vm5 }
 0x589   :  { %4048 = vst.msk [vmem:[%s8327_s5 + $0x30] sm:$0xff] %vm8819_vm3, %v4026_v12  ;;  %v4029_v42 = vsub.f32 1.0, %v4028_v16 }
 0x58b   :  { %v4030_v2 = vmul.f32 %v4675_v48, %v4029_v42 }
 0x58d   :  { %v4031_v13 = vadd.f32 %v4675_v48, %v4030_v2 }
 0x58f   :  { %v4035_v38 = vsel %vm4034_vm10, %v4675_v48, %v4031_v13 }
 0x590   :  { %v4040_v40 = vsel %vm4037_vm13, %v4039_v24, %v4035_v38 }
 0x591   :  { %v4041_v14 = vmul.f32 %v4040_v40, %v8768_v36 }
 0x593   :  { %4049 = vst.msk [vmem:[%s8327_s5 + $0x38] sm:$0xff] %vm8820_vm8, %v4041_v14 }
 0x594   :  { %4054 = vsyncpa [#allocation4], 1 }
 0x595   :  { %4055 = vsyncpa [#allocation6], 1 }

</bundles_post_ra>
